<compile_context>
chip_gen: v7x
topology: tpu7x:2x2x1
jax: 0.10.0
libtpu: 0.0.40
codegen_flags: <defaults>
</compile_context>

<pallas_src>
import math
import functools

import jax
import jax.numpy as jnp
from jax.experimental import pallas as pl
from jax.experimental.pallas import tpu as pltpu

EPS = 1e-5  # PyTorch nn.LayerNorm default


# ----------------------------- in-kernel helpers -----------------------------

def _layernorm(x, g, b):
    mu = jnp.mean(x, axis=-1, keepdims=True)
    var = jnp.mean((x - mu) ** 2, axis=-1, keepdims=True)
    return (x - mu) * jax.lax.rsqrt(var + EPS) * g + b


def _gelu_tanh(x):
    c = math.sqrt(2.0 / math.pi)
    return 0.5 * x * (1.0 + jnp.tanh(c * (x + 0.044715 * x * x * x)))


def _dot(a_bf16, w_bf16):
    # bf16 operands, f32 accumulation on the MXU.
    return jnp.dot(a_bf16, w_bf16, preferred_element_type=jnp.float32)


# ---------------------------- transformer block kernel -----------------------

def block_kernel(x_ref, ln1g, ln1b, wa, ba, wp, bp,
                 ln2g, ln2b, wf, bf_, wp2, bp2, o_ref, *, n_heads, seq_tile):
    # One batch element per grid step; processes the full (T, C) sequence.
    # TODO(synk): for v7x with B == 1, add a second ("parallel") q-tile grid
    #             axis (qkv precomputed to HBM or recomputed per tile) so both
    #             TensorCores get work; kept fused here to avoid the extra
    #             qkv HBM round trip.
    x = x_ref[...]                                    # (T, C) f32
    T, C = x.shape
    H = n_heads
    Dh = C // H
    scale = 1.0 / math.sqrt(Dh)
    TQ = seq_tile
    nq = T // TQ

    # --- attention branch (flash-style: (H,T,T) never materialized) ---
    xn = _layernorm(x, ln1g[...], ln1b[...])          # f32
    qkv = _dot(xn.astype(jnp.bfloat16), wa[...]) + ba[...]      # (T, 3C) f32

    def heads(t2d):                                   # (T, C) -> (H, T, Dh)
        return jnp.transpose(t2d.reshape(T, H, Dh), (1, 0, 2))

    # Scale q once (T*C multiplies) instead of scaling scores.
    q_all = heads(qkv[:, 0:C] * scale).astype(jnp.bfloat16)
    k_all = heads(qkv[:, C:2 * C]).astype(jnp.bfloat16)
    v_all = heads(qkv[:, 2 * C:3 * C]).astype(jnp.bfloat16)

    row = jax.lax.broadcasted_iota(jnp.int32, (TQ, TQ), 0)
    col = jax.lax.broadcasted_iota(jnp.int32, (TQ, TQ), 1)
    diag_mask = (row >= col)[None, :, :]              # (1, TQ, TQ)

    out_tiles = []
    for qi in range(nq):                              # static unroll over q tiles
        q0 = qi * TQ
        q_t = q_all[:, q0:q0 + TQ, :]                 # (H, TQ, Dh) bf16
        m_i = jnp.full((H, TQ, 1), -1e30, jnp.float32)
        l_i = jnp.zeros((H, TQ, 1), jnp.float32)
        acc = jnp.zeros((H, TQ, Dh), jnp.float32)
        for ki in range(qi + 1):                      # causal: past tiles only
            k0 = ki * TQ
            k_t = k_all[:, k0:k0 + TQ, :]
            v_t = v_all[:, k0:k0 + TQ, :]
            s = jnp.einsum('htd,hsd->hts', q_t, k_t,
                           preferred_element_type=jnp.float32)   # (H,TQ,TQ) f32
            if ki == qi:                              # diagonal tile -> causal mask
                s = jnp.where(diag_mask, s, -1e30)
            m_new = jnp.maximum(m_i, jnp.max(s, axis=-1, keepdims=True))
            a = jnp.exp(m_i - m_new)
            p = jnp.exp(s - m_new)
            l_i = a * l_i + jnp.sum(p, axis=-1, keepdims=True)
            acc = a * acc + jnp.einsum('hts,hsd->htd', p.astype(jnp.bfloat16), v_t,
                                       preferred_element_type=jnp.float32)
            m_i = m_new
        # EUP approx reciprocal instead of a VPU divide.
        o_t = acc * pl.reciprocal(l_i, approx=True)   # (H, TQ, Dh) f32
        out_tiles.append(jnp.transpose(o_t, (1, 0, 2)).reshape(TQ, C))
    o = out_tiles[0] if nq == 1 else jnp.concatenate(out_tiles, axis=0)  # (T, C)

    attn = _dot(o.astype(jnp.bfloat16), wp[...]) + bp[...]
    x = x + attn

    # --- MLP branch ---
    # TODO(synk): for C >= 1024 on v7x, stream w_fc / w_proj2 in N-tiles
    #             (pltpu.emit_pipeline) instead of keeping them VMEM-resident.
    xn2 = _layernorm(x, ln2g[...], ln2b[...])
    h1 = _gelu_tanh(_dot(xn2.astype(jnp.bfloat16), wf[...]) + bf_[...])  # (T, 4C)
    h2 = _dot(h1.astype(jnp.bfloat16), wp2[...]) + bp2[...]              # (T, C)
    o_ref[...] = (x + h2).astype(o_ref.dtype)


# ----------------------------- final ln_f + lm_head --------------------------

def lnf_kernel(x_ref, g_ref, b_ref, o_ref):
    # ln_f computed once per row tile (hoisted out of the vocab-tiled lm_head);
    # bf16 output halves HBM read traffic for the lm_head matmul.
    o_ref[...] = _layernorm(x_ref[...], g_ref[...], b_ref[...]).astype(o_ref.dtype)


def lm_head_kernel(xn_ref, wte_ref, logits_ref):
    # xn_ref: (TM, C) bf16, wte_ref: (TV, C) bf16 (tied embedding, untransposed).
    logits_ref[...] = jax.lax.dot_general(
        xn_ref[...], wte_ref[...],
        (((1,), (1,)), ((), ())),                    # contract on C, no wte.T
        preferred_element_type=jnp.float32).astype(logits_ref.dtype)


# --------------------------------- wrappers -----------------------------------

def _vmem_limit_bytes():
    # ~75% of physical VMEM (64 MiB on v7x, 128 MiB on v5e/v6e) leaves headroom
    # for Mosaic internal scratch / semaphores / double-buffers.
    try:
        cap = int(pltpu.get_tpu_info().vmem_capacity_bytes)
    except Exception:
        cap = 64 * 1024 * 1024
    return max(int(cap * 0.75), 32 * 1024 * 1024)


def _pick_seq_tile(T):
    # >= 256-high q/kv tiles keep the 256x256 MXU (v6e/v7x) fed; small T just
    # uses the whole sequence as one tile.
    for t in (256, 128, 64, 32, 16, 8):
        if T % t == 0:
            return t
    return T


def _pick_row_tile(M):
    for t in (512, 256, 128, 64, 32, 16, 8):
        if M % t == 0:
            return t
    return M


def _pick_vocab_tile(V):
    for t in (2048, 1024, 512, 256, 128):
        if V % t == 0:
            return t
    # Last tile may be partial: OOB output writes are dropped by Pallas, but
    # prefer padding V to a 128-multiple in real configs (e.g. 50257 -> 50304).
    return min(V, 2048)


def run_block(x, lp, n_heads, seq_tile, vmem_limit):
    B, T, C = x.shape
    params = [lp[k] for k in ("ln1_g", "ln1_b", "w_attn", "b_attn",
                              "w_proj", "b_proj", "ln2_g", "ln2_b",
                              "w_fc", "b_fc", "w_proj2", "b_proj2")]
    # Weights / biases are grid-invariant: pass them as whole-array VMEM
    # residents (single copy, no per-step double-buffering).
    weight_spec = pl.BlockSpec(memory_space=pltpu.MemorySpace.VMEM)
    in_specs = [pl.BlockSpec((None, T, C), lambda b: (b, 0, 0))] + \
               [weight_spec] * len(params)
    return pl.pallas_call(
        functools.partial(block_kernel, n_heads=n_heads, seq_tile=seq_tile),
        out_shape=jax.ShapeDtypeStruct((B, T, C), x.dtype),
        grid=(B,),
        in_specs=in_specs,
        out_specs=pl.BlockSpec((None, T, C), lambda b: (b, 0, 0)),
        compiler_params=pltpu.CompilerParams(
            dimension_semantics=("parallel",),
            vmem_limit_bytes=vmem_limit),
    )(x, *params)


def run_final(x, lnf_g, lnf_b, wte_bf16, vmem_limit):
    B, T, C = x.shape
    V = wte_bf16.shape[0]
    M = B * T
    x2 = x.reshape(M, C)
    TM = _pick_row_tile(M)
    nm = M // TM

    # 1) ln_f once over the flattened (M, C) activations, bf16 output.
    xn = pl.pallas_call(
        lnf_kernel,
        out_shape=jax.ShapeDtypeStruct((M, C), jnp.bfloat16),
        grid=(nm,),
        in_specs=[pl.BlockSpec((TM, C), lambda m: (m, 0)),
                  pl.BlockSpec(memory_space=pltpu.MemorySpace.VMEM),
                  pl.BlockSpec(memory_space=pltpu.MemorySpace.VMEM)],
        out_specs=pl.BlockSpec((TM, C), lambda m: (m, 0)),
        compiler_params=pltpu.CompilerParams(
            dimension_semantics=("parallel",),
            vmem_limit_bytes=vmem_limit),
    )(x2, lnf_g, lnf_b)

    # 2) lm_head, tiled over (vocab, rows); vocab axis outermost so each wte
    #    tile is DMA'd once and stays resident while all row tiles stream.
    TV = _pick_vocab_tile(V)
    nv = pl.cdiv(V, TV)
    logits = pl.pallas_call(
        lm_head_kernel,
        out_shape=jax.ShapeDtypeStruct((M, V), jnp.float32),
        grid=(nv, nm),
        in_specs=[pl.BlockSpec((TM, C), lambda v, m: (m, 0)),
                  pl.BlockSpec((TV, C), lambda v, m: (v, 0))],
        out_specs=pl.BlockSpec((TM, TV), lambda v, m: (m, v)),
        compiler_params=pltpu.CompilerParams(
            dimension_semantics=("parallel", "parallel"),
            vmem_limit_bytes=vmem_limit),
    )(xn, wte_bf16)
    return logits.reshape(B, T, V)


def gpt_forward(params, idx, n_heads, seq_tile=None):
    # TODO(synk): embedding-table gather left in plain JAX (no clean Pallas
    #             gather for (vocab, C) tables).
    B, T = idx.shape
    tok_emb = jnp.take(params["wte"], idx, axis=0)     # (B, T, C) f32
    pos_emb = params["wpe"][:T]                        # (T, C) f32
    x = (tok_emb + pos_emb[None, :, :]).astype(jnp.float32)

    vmem_limit = _vmem_limit_bytes()
    if seq_tile is None:
        seq_tile = _pick_seq_tile(T)
    for lp in params["layers"]:
        x = run_block(x, lp, n_heads, seq_tile, vmem_limit)

    # Tied lm_head weight, bf16 for MXU + halved HBM/VMEM traffic.
    wte_b = params["wte"].astype(jnp.bfloat16)
    logits = run_final(x, params["lnf_g"], params["lnf_b"], wte_b, vmem_limit)
    return logits
    # TODO(synk): cross-entropy loss (targets path) not implemented; forward
    #             returns logits only (matches GPT.forward with targets=None).


# ------------------------------ parameter init --------------------------------

def init_params(key, *, vocab_size, block_size, n_layers, n_embed):
    C = n_embed
    std = 0.02
    rstd = 0.02 * (n_layers * 2) ** (-0.5)  # NANOGPT_RESIDUAL_SCALE linears
    keys = jax.random.split(key, 2 + n_layers * 4)
    ki = iter(keys)

    wte = std * jax.random.normal(next(ki), (vocab_size, C), jnp.float32)
    wpe = std * jax.random.normal(next(ki), (block_size, C), jnp.float32)

    def bf16(w):
        return w.astype(jnp.bfloat16)

    layers = []
    for _ in range(n_layers):
        layers.append(dict(
            ln1_g=jnp.ones((1, C), jnp.float32),
            ln1_b=jnp.zeros((1, C), jnp.float32),
            w_attn=bf16(std * jax.random.normal(next(ki), (C, 3 * C), jnp.float32)),
            b_attn=jnp.zeros((1, 3 * C), jnp.float32),
            w_proj=bf16(rstd * jax.random.normal(next(ki), (C, C), jnp.float32)),
            b_proj=jnp.zeros((1, C), jnp.float32),
            ln2_g=jnp.ones((1, C), jnp.float32),
            ln2_b=jnp.zeros((1, C), jnp.float32),
            w_fc=bf16(std * jax.random.normal(next(ki), (C, 4 * C), jnp.float32)),
            b_fc=jnp.zeros((1, 4 * C), jnp.float32),
            w_proj2=bf16(rstd * jax.random.normal(next(ki), (4 * C, C), jnp.float32)),
            b_proj2=jnp.zeros((1, C), jnp.float32),
        ))

    return dict(
        wte=wte, wpe=wpe, layers=layers,
        lnf_g=jnp.ones((1, C), jnp.float32),
        lnf_b=jnp.zeros((1, C), jnp.float32),
    )


# ----------------------------- pure-JAX reference ------------------------------

def _ref_forward(params, idx, n_heads):
    B, T = idx.shape
    C = params["wte"].shape[1]
    H = n_heads
    Dh = C // H

    def ln(x, g, b):
        mu = x.mean(-1, keepdims=True)
        var = ((x - mu) ** 2).mean(-1, keepdims=True)
        return (x - mu) / jnp.sqrt(var + EPS) * g + b

    x = jnp.take(params["wte"], idx, axis=0) + params["wpe"][:T][None]
    for lp in params["layers"]:
        xn = ln(x, lp["ln1_g"], lp["ln1_b"])
        qkv = xn @ lp["w_attn"].astype(jnp.float32) + lp["b_attn"]
        q, k, v = jnp.split(qkv, 3, axis=-1)

        def hsplit(t):
            return jnp.transpose(t.reshape(B, T, H, Dh), (0, 2, 1, 3))

        q, k, v = hsplit(q), hsplit(k), hsplit(v)
        s = jnp.einsum('bhtd,bhsd->bhts', q, k) / math.sqrt(Dh)
        mask = jnp.tril(jnp.ones((T, T), bool))
        s = jnp.where(mask[None, None], s, -jnp.inf)
        p = jax.nn.softmax(s, axis=-1)
        o = jnp.einsum('bhts,bhsd->bhtd', p, v)
        o = jnp.transpose(o, (0, 2, 1, 3)).reshape(B, T, C)
        x = x + o @ lp["w_proj"].astype(jnp.float32) + lp["b_proj"]
        xn2 = ln(x, lp["ln2_g"], lp["ln2_b"])
        h = _gelu_tanh(xn2 @ lp["w_fc"].astype(jnp.float32) + lp["b_fc"])
        x = x + h @ lp["w_proj2"].astype(jnp.float32) + lp["b_proj2"]
    xf = ln(x, params["lnf_g"], params["lnf_b"])
    return xf @ params["wte"].T


# ----------------------------------- main --------------------------------------

if __name__ == "__main__":
    # Small synthetic config (same structure as GPTConfig, scaled down).
    # T=32 with seq_tile=16 exercises the flash-style multi-tile path
    # (diagonal-masked tile + off-diagonal tile, online softmax across tiles);
    # vocab_size=384 with TILE_V=128 exercises vocab tiling (3 tiles).
    B, T = 2, 32
    cfg = dict(vocab_size=384, block_size=64, n_layers=2, n_embed=32)
    n_heads = 4

    key = jax.random.PRNGKey(0)
    pkey, ikey = jax.random.split(key)
    params = init_params(pkey, **cfg)
    idx = jax.random.randint(ikey, (B, T), 0, cfg["vocab_size"], dtype=jnp.int32)

    logits = gpt_forward(params, idx, n_heads, seq_tile=16)
    logits = jax.block_until_ready(logits)
    assert logits.shape == (B, T, cfg["vocab_size"])
    assert bool(jnp.all(jnp.isfinite(logits)))

    ref = _ref_forward(params, idx, n_heads)
    max_diff = float(jnp.max(jnp.abs(logits - ref)))
    assert bool(jnp.allclose(logits, ref, atol=4e-2, rtol=4e-2)), max_diff

    print("KERNEL_OK")
</pallas_src>

<mosaic_0001>
module attributes {stable_mosaic.version = 11 : i64} {
  func.func @block_kernel(%arg0: i32, %arg1: memref<1x32x32xf32, #tpu.memory_space<vmem>>, %arg2: memref<1x32xf32, #tpu.memory_space<vmem>>, %arg3: memref<1x32xf32, #tpu.memory_space<vmem>>, %arg4: memref<32x96xbf16, #tpu.memory_space<vmem>>, %arg5: memref<1x96xf32, #tpu.memory_space<vmem>>, %arg6: memref<32x32xbf16, #tpu.memory_space<vmem>>, %arg7: memref<1x32xf32, #tpu.memory_space<vmem>>, %arg8: memref<1x32xf32, #tpu.memory_space<vmem>>, %arg9: memref<1x32xf32, #tpu.memory_space<vmem>>, %arg10: memref<32x128xbf16, #tpu.memory_space<vmem>>, %arg11: memref<1x128xf32, #tpu.memory_space<vmem>>, %arg12: memref<128x32xbf16, #tpu.memory_space<vmem>>, %arg13: memref<1x32xf32, #tpu.memory_space<vmem>>, %arg14: memref<1x32x32xf32, #tpu.memory_space<vmem>>) attributes {dimension_semantics = [#tpu.dimension_semantics<parallel>], iteration_bounds = array<i64: 2>, scalar_prefetch = 0 : i64, scratch_operands = 0 : i64, tpu.core_type = #tpu.core_type<tc>, window_params = [{transform_indices = @transform_0, window_bounds = array<i64: 1, 32, 32>}, {pipeline_mode = #tpu.pipeline_mode<synchronous>, transform_indices = @transform_1, window_bounds = array<i64: 1, 32>}, {pipeline_mode = #tpu.pipeline_mode<synchronous>, transform_indices = @transform_2, window_bounds = array<i64: 1, 32>}, {pipeline_mode = #tpu.pipeline_mode<synchronous>, transform_indices = @transform_3, window_bounds = array<i64: 32, 96>}, {pipeline_mode = #tpu.pipeline_mode<synchronous>, transform_indices = @transform_4, window_bounds = array<i64: 1, 96>}, {pipeline_mode = #tpu.pipeline_mode<synchronous>, transform_indices = @transform_5, window_bounds = array<i64: 32, 32>}, {pipeline_mode = #tpu.pipeline_mode<synchronous>, transform_indices = @transform_6, window_bounds = array<i64: 1, 32>}, {pipeline_mode = #tpu.pipeline_mode<synchronous>, transform_indices = @transform_7, window_bounds = array<i64: 1, 32>}, {pipeline_mode = #tpu.pipeline_mode<synchronous>, transform_indices = @transform_8, window_bounds = array<i64: 1, 32>}, {pipeline_mode = #tpu.pipeline_mode<synchronous>, transform_indices = @transform_9, window_bounds = array<i64: 32, 128>}, {pipeline_mode = #tpu.pipeline_mode<synchronous>, transform_indices = @transform_10, window_bounds = array<i64: 1, 128>}, {pipeline_mode = #tpu.pipeline_mode<synchronous>, transform_indices = @transform_11, window_bounds = array<i64: 128, 32>}, {pipeline_mode = #tpu.pipeline_mode<synchronous>, transform_indices = @transform_12, window_bounds = array<i64: 1, 32>}, {transform_indices = @transform_13, window_bounds = array<i64: 1, 32, 32>}]} {
    %c0 = arith.constant 0 : index
    %c0_0 = arith.constant 0 : index
    %c0_1 = arith.constant 0 : index
    %0 = vector.load %arg1[%c0, %c0_0, %c0_1] : memref<1x32x32xf32, #tpu.memory_space<vmem>>, vector<1x32x32xf32>
    %1 = vector.shape_cast %0 : vector<1x32x32xf32> to vector<32x32xf32>
    %c0_2 = arith.constant 0 : index
    %c0_3 = arith.constant 0 : index
    %2 = vector.load %arg2[%c0_2, %c0_3] : memref<1x32xf32, #tpu.memory_space<vmem>>, vector<1x32xf32>
    %c0_4 = arith.constant 0 : index
    %c0_5 = arith.constant 0 : index
    %3 = vector.load %arg3[%c0_4, %c0_5] : memref<1x32xf32, #tpu.memory_space<vmem>>, vector<1x32xf32>
    %cst = arith.constant dense<0.000000e+00> : vector<32xf32>
    %4 = vector.multi_reduction <add>, %1, %cst [1] : vector<32x32xf32> to vector<32xf32>
    %5 = vector.shape_cast %4 : vector<32xf32> to vector<32x1xf32>
    %cst_6 = arith.constant 3.200000e+01 : f32
    %6 = vector.broadcast %cst_6 : f32 to vector<32x1xf32>
    %7 = arith.divf %5, %6 : vector<32x1xf32>
    %8 = vector.broadcast %7 : vector<32x1xf32> to vector<32x32xf32>
    %9 = arith.subf %1, %8 : vector<32x32xf32>
    %10 = arith.mulf %9, %9 : vector<32x32xf32>
    %cst_7 = arith.constant dense<0.000000e+00> : vector<32xf32>
    %11 = vector.multi_reduction <add>, %10, %cst_7 [1] : vector<32x32xf32> to vector<32xf32>
    %12 = vector.shape_cast %11 : vector<32xf32> to vector<32x1xf32>
    %cst_8 = arith.constant 3.200000e+01 : f32
    %13 = vector.broadcast %cst_8 : f32 to vector<32x1xf32>
    %14 = arith.divf %12, %13 : vector<32x1xf32>
    %15 = vector.broadcast %7 : vector<32x1xf32> to vector<32x32xf32>
    %16 = arith.subf %1, %15 : vector<32x32xf32>
    %cst_9 = arith.constant 9.99999974E-6 : f32
    %17 = vector.broadcast %cst_9 : f32 to vector<32x1xf32>
    %18 = arith.addf %14, %17 : vector<32x1xf32>
    %19 = math.rsqrt %18 : vector<32x1xf32>
    %20 = vector.broadcast %19 : vector<32x1xf32> to vector<32x32xf32>
    %21 = arith.mulf %16, %20 : vector<32x32xf32>
    %22 = vector.broadcast %2 : vector<1x32xf32> to vector<32x32xf32>
    %23 = arith.mulf %21, %22 : vector<32x32xf32>
    %24 = vector.broadcast %3 : vector<1x32xf32> to vector<32x32xf32>
    %25 = arith.addf %23, %24 : vector<32x32xf32>
    %26 = arith.truncf %25 : vector<32x32xf32> to vector<32x32xbf16>
    %c0_10 = arith.constant 0 : index
    %c0_11 = arith.constant 0 : index
    %27 = vector.load %arg4[%c0_10, %c0_11] : memref<32x96xbf16, #tpu.memory_space<vmem>>, vector<32x96xbf16>
    %cst_12 = arith.constant dense<0.000000e+00> : vector<32x96xf32>
    %28 = tpu.matmul %26, %27, %cst_12 {dimension_numbers = #tpu.dot_dimension_numbers<[1], [0], [0], [1], [0, 0, 1, 1], [], []>} : vector<32x32xbf16>, vector<32x96xbf16>, vector<32x96xf32> -> vector<32x96xf32>
    %c0_13 = arith.constant 0 : index
    %c0_14 = arith.constant 0 : index
    %29 = vector.load %arg5[%c0_13, %c0_14] : memref<1x96xf32, #tpu.memory_space<vmem>>, vector<1x96xf32>
    %30 = vector.broadcast %29 : vector<1x96xf32> to vector<32x96xf32>
    %31 = arith.addf %28, %30 : vector<32x96xf32>
    %32 = vector.extract_strided_slice %31 {offsets = [0, 0], sizes = [32, 32], strides = [1, 1]} : vector<32x96xf32> to vector<32x32xf32>
    %cst_15 = arith.constant 0.353553385 : f32
    %33 = vector.broadcast %cst_15 : f32 to vector<32x32xf32>
    %34 = arith.mulf %32, %33 : vector<32x32xf32>
    %35 = vector.shape_cast %34 : vector<32x32xf32> to vector<32x4x8xf32>
    %36 = tpu.transpose %35, [1, 0, 2] : vector<32x4x8xf32> -> vector<4x32x8xf32>
    %37 = arith.truncf %36 : vector<4x32x8xf32> to vector<4x32x8xbf16>
    %38 = vector.extract_strided_slice %31 {offsets = [0, 32], sizes = [32, 32], strides = [1, 1]} : vector<32x96xf32> to vector<32x32xf32>
    %39 = vector.shape_cast %38 : vector<32x32xf32> to vector<32x4x8xf32>
    %40 = tpu.transpose %39, [1, 0, 2] : vector<32x4x8xf32> -> vector<4x32x8xf32>
    %41 = arith.truncf %40 : vector<4x32x8xf32> to vector<4x32x8xbf16>
    %42 = vector.extract_strided_slice %31 {offsets = [0, 64], sizes = [32, 32], strides = [1, 1]} : vector<32x96xf32> to vector<32x32xf32>
    %43 = vector.shape_cast %42 : vector<32x32xf32> to vector<32x4x8xf32>
    %44 = tpu.transpose %43, [1, 0, 2] : vector<32x4x8xf32> -> vector<4x32x8xf32>
    %45 = arith.truncf %44 : vector<4x32x8xf32> to vector<4x32x8xbf16>
    %46 = tpu.iota {dimensions = array<i32: 0>} : vector<16x16xi32>
    %47 = tpu.iota {dimensions = array<i32: 1>} : vector<16x16xi32>
    %48 = arith.cmpi sge, %46, %47 : vector<16x16xi32>
    %49 = vector.shape_cast %48 : vector<16x16xi1> to vector<1x16x16xi1>
    %50 = vector.extract_strided_slice %37 {offsets = [0, 0, 0], sizes = [4, 16, 8], strides = [1, 1, 1]} : vector<4x32x8xbf16> to vector<4x16x8xbf16>
    %cst_16 = arith.constant -1.000000e+30 : f32
    %51 = vector.broadcast %cst_16 : f32 to vector<4x16x1xf32>
    %cst_17 = arith.constant 0.000000e+00 : f32
    %52 = vector.broadcast %cst_17 : f32 to vector<4x16x1xf32>
    %cst_18 = arith.constant 0.000000e+00 : f32
    %53 = vector.broadcast %cst_18 : f32 to vector<4x16x8xf32>
    %54 = vector.extract_strided_slice %41 {offsets = [0, 0, 0], sizes = [4, 16, 8], strides = [1, 1, 1]} : vector<4x32x8xbf16> to vector<4x16x8xbf16>
    %55 = vector.extract_strided_slice %45 {offsets = [0, 0, 0], sizes = [4, 16, 8], strides = [1, 1, 1]} : vector<4x32x8xbf16> to vector<4x16x8xbf16>
    "tpu.trace_start"() <{level = 10 : i32, message = "htd,hsd->hts"}> : () -> ()
    %cst_19 = arith.constant dense<0.000000e+00> : vector<4x16x16xf32>
    %56 = tpu.matmul %50, %54, %cst_19 {dimension_numbers = #tpu.dot_dimension_numbers<[2], [2], [1], [1], [0, 0, 0, 1, 1, 1], [0], [0]>} : vector<4x16x8xbf16>, vector<4x16x8xbf16>, vector<4x16x16xf32> -> vector<4x16x16xf32>
    %cst_20 = arith.constant -1.000000e+30 : f32
    "tpu.trace_stop"() : () -> ()
    %57 = vector.shape_cast %49 : vector<1x16x16xi1> to vector<1x16x16xi1>
    %58 = vector.broadcast %57 : vector<1x16x16xi1> to vector<4x16x16xi1>
    %59 = vector.broadcast %cst_20 : f32 to vector<4x16x16xf32>
    %60 = arith.select %58, %56, %59 : vector<4x16x16xi1>, vector<4x16x16xf32>
    %cst_21 = arith.constant dense<0xFF800000> : vector<4x16xf32>
    %61 = vector.multi_reduction <maximumf>, %60, %cst_21 [2] : vector<4x16x16xf32> to vector<4x16xf32>
    %62 = vector.shape_cast %61 : vector<4x16xf32> to vector<4x16x1xf32>
    %63 = arith.maximumf %51, %62 : vector<4x16x1xf32>
    %64 = arith.subf %51, %63 : vector<4x16x1xf32>
    %65 = math.exp %64 : vector<4x16x1xf32>
    %66 = vector.broadcast %63 : vector<4x16x1xf32> to vector<4x16x16xf32>
    %67 = arith.subf %60, %66 : vector<4x16x16xf32>
    %68 = math.exp %67 : vector<4x16x16xf32>
    %69 = arith.mulf %65, %52 : vector<4x16x1xf32>
    %cst_22 = arith.constant dense<0.000000e+00> : vector<4x16xf32>
    %70 = vector.multi_reduction <add>, %68, %cst_22 [2] : vector<4x16x16xf32> to vector<4x16xf32>
    %71 = vector.shape_cast %70 : vector<4x16xf32> to vector<4x16x1xf32>
    %72 = arith.addf %69, %71 : vector<4x16x1xf32>
    %73 = vector.broadcast %65 : vector<4x16x1xf32> to vector<4x16x8xf32>
    %74 = arith.mulf %73, %53 : vector<4x16x8xf32>
    %75 = arith.truncf %68 : vector<4x16x16xf32> to vector<4x16x16xbf16>
    "tpu.trace_start"() <{level = 10 : i32, message = "hts,hsd->htd"}> : () -> ()
    %cst_23 = arith.constant dense<0.000000e+00> : vector<4x16x8xf32>
    %76 = tpu.matmul %75, %55, %cst_23 {dimension_numbers = #tpu.dot_dimension_numbers<[2], [1], [1], [2], [0, 0, 0, 1, 1, 2], [0], [0]>} : vector<4x16x16xbf16>, vector<4x16x8xbf16>, vector<4x16x8xf32> -> vector<4x16x8xf32>
    "tpu.trace_stop"() : () -> ()
    %77 = arith.addf %74, %76 : vector<4x16x8xf32>
    %78 = tpu.reciprocal %72 {approx = true} : vector<4x16x1xf32> -> vector<4x16x1xf32>
    %79 = vector.broadcast %78 : vector<4x16x1xf32> to vector<4x16x8xf32>
    %80 = arith.mulf %77, %79 : vector<4x16x8xf32>
    %81 = tpu.transpose %80, [1, 0, 2] : vector<4x16x8xf32> -> vector<16x4x8xf32>
    %82 = vector.shape_cast %81 : vector<16x4x8xf32> to vector<16x32xf32>
    %83 = vector.extract_strided_slice %37 {offsets = [0, 16, 0], sizes = [4, 16, 8], strides = [1, 1, 1]} : vector<4x32x8xbf16> to vector<4x16x8xbf16>
    %cst_24 = arith.constant -1.000000e+30 : f32
    %84 = vector.broadcast %cst_24 : f32 to vector<4x16x1xf32>
    %cst_25 = arith.constant 0.000000e+00 : f32
    %85 = vector.broadcast %cst_25 : f32 to vector<4x16x1xf32>
    %cst_26 = arith.constant 0.000000e+00 : f32
    %86 = vector.broadcast %cst_26 : f32 to vector<4x16x8xf32>
    %87 = vector.extract_strided_slice %41 {offsets = [0, 0, 0], sizes = [4, 16, 8], strides = [1, 1, 1]} : vector<4x32x8xbf16> to vector<4x16x8xbf16>
    %88 = vector.extract_strided_slice %45 {offsets = [0, 0, 0], sizes = [4, 16, 8], strides = [1, 1, 1]} : vector<4x32x8xbf16> to vector<4x16x8xbf16>
    "tpu.trace_start"() <{level = 10 : i32, message = "htd,hsd->hts"}> : () -> ()
    %cst_27 = arith.constant dense<0.000000e+00> : vector<4x16x16xf32>
    %89 = tpu.matmul %83, %87, %cst_27 {dimension_numbers = #tpu.dot_dimension_numbers<[2], [2], [1], [1], [0, 0, 0, 1, 1, 1], [0], [0]>} : vector<4x16x8xbf16>, vector<4x16x8xbf16>, vector<4x16x16xf32> -> vector<4x16x16xf32>
    "tpu.trace_stop"() : () -> ()
    %cst_28 = arith.constant dense<0xFF800000> : vector<4x16xf32>
    %90 = vector.multi_reduction <maximumf>, %89, %cst_28 [2] : vector<4x16x16xf32> to vector<4x16xf32>
    %91 = vector.shape_cast %90 : vector<4x16xf32> to vector<4x16x1xf32>
    %92 = arith.maximumf %84, %91 : vector<4x16x1xf32>
    %93 = arith.subf %84, %92 : vector<4x16x1xf32>
    %94 = math.exp %93 : vector<4x16x1xf32>
    %95 = vector.broadcast %92 : vector<4x16x1xf32> to vector<4x16x16xf32>
    %96 = arith.subf %89, %95 : vector<4x16x16xf32>
    %97 = math.exp %96 : vector<4x16x16xf32>
    %98 = arith.mulf %94, %85 : vector<4x16x1xf32>
    %cst_29 = arith.constant dense<0.000000e+00> : vector<4x16xf32>
    %99 = vector.multi_reduction <add>, %97, %cst_29 [2] : vector<4x16x16xf32> to vector<4x16xf32>
    %100 = vector.shape_cast %99 : vector<4x16xf32> to vector<4x16x1xf32>
    %101 = arith.addf %98, %100 : vector<4x16x1xf32>
    %102 = vector.broadcast %94 : vector<4x16x1xf32> to vector<4x16x8xf32>
    %103 = arith.mulf %102, %86 : vector<4x16x8xf32>
    %104 = arith.truncf %97 : vector<4x16x16xf32> to vector<4x16x16xbf16>
    "tpu.trace_start"() <{level = 10 : i32, message = "hts,hsd->htd"}> : () -> ()
    %cst_30 = arith.constant dense<0.000000e+00> : vector<4x16x8xf32>
    %105 = tpu.matmul %104, %88, %cst_30 {dimension_numbers = #tpu.dot_dimension_numbers<[2], [1], [1], [2], [0, 0, 0, 1, 1, 2], [0], [0]>} : vector<4x16x16xbf16>, vector<4x16x8xbf16>, vector<4x16x8xf32> -> vector<4x16x8xf32>
    "tpu.trace_stop"() : () -> ()
    %106 = arith.addf %103, %105 : vector<4x16x8xf32>
    %107 = vector.extract_strided_slice %41 {offsets = [0, 16, 0], sizes = [4, 16, 8], strides = [1, 1, 1]} : vector<4x32x8xbf16> to vector<4x16x8xbf16>
    %108 = vector.extract_strided_slice %45 {offsets = [0, 16, 0], sizes = [4, 16, 8], strides = [1, 1, 1]} : vector<4x32x8xbf16> to vector<4x16x8xbf16>
    "tpu.trace_start"() <{level = 10 : i32, message = "htd,hsd->hts"}> : () -> ()
    %cst_31 = arith.constant dense<0.000000e+00> : vector<4x16x16xf32>
    %109 = tpu.matmul %83, %107, %cst_31 {dimension_numbers = #tpu.dot_dimension_numbers<[2], [2], [1], [1], [0, 0, 0, 1, 1, 1], [0], [0]>} : vector<4x16x8xbf16>, vector<4x16x8xbf16>, vector<4x16x16xf32> -> vector<4x16x16xf32>
    %cst_32 = arith.constant -1.000000e+30 : f32
    "tpu.trace_stop"() : () -> ()
    %110 = vector.shape_cast %49 : vector<1x16x16xi1> to vector<1x16x16xi1>
    %111 = vector.broadcast %110 : vector<1x16x16xi1> to vector<4x16x16xi1>
    %112 = vector.broadcast %cst_32 : f32 to vector<4x16x16xf32>
    %113 = arith.select %111, %109, %112 : vector<4x16x16xi1>, vector<4x16x16xf32>
    %cst_33 = arith.constant dense<0xFF800000> : vector<4x16xf32>
    %114 = vector.multi_reduction <maximumf>, %113, %cst_33 [2] : vector<4x16x16xf32> to vector<4x16xf32>
    %115 = vector.shape_cast %114 : vector<4x16xf32> to vector<4x16x1xf32>
    %116 = arith.maximumf %92, %115 : vector<4x16x1xf32>
    %117 = arith.subf %92, %116 : vector<4x16x1xf32>
    %118 = math.exp %117 : vector<4x16x1xf32>
    %119 = vector.broadcast %116 : vector<4x16x1xf32> to vector<4x16x16xf32>
    %120 = arith.subf %113, %119 : vector<4x16x16xf32>
    %121 = math.exp %120 : vector<4x16x16xf32>
    %122 = arith.mulf %118, %101 : vector<4x16x1xf32>
    %cst_34 = arith.constant dense<0.000000e+00> : vector<4x16xf32>
    %123 = vector.multi_reduction <add>, %121, %cst_34 [2] : vector<4x16x16xf32> to vector<4x16xf32>
    %124 = vector.shape_cast %123 : vector<4x16xf32> to vector<4x16x1xf32>
    %125 = arith.addf %122, %124 : vector<4x16x1xf32>
    %126 = vector.broadcast %118 : vector<4x16x1xf32> to vector<4x16x8xf32>
    %127 = arith.mulf %126, %106 : vector<4x16x8xf32>
    %128 = arith.truncf %121 : vector<4x16x16xf32> to vector<4x16x16xbf16>
    "tpu.trace_start"() <{level = 10 : i32, message = "hts,hsd->htd"}> : () -> ()
    %cst_35 = arith.constant dense<0.000000e+00> : vector<4x16x8xf32>
    %129 = tpu.matmul %128, %108, %cst_35 {dimension_numbers = #tpu.dot_dimension_numbers<[2], [1], [1], [2], [0, 0, 0, 1, 1, 2], [0], [0]>} : vector<4x16x16xbf16>, vector<4x16x8xbf16>, vector<4x16x8xf32> -> vector<4x16x8xf32>
    "tpu.trace_stop"() : () -> ()
    %130 = arith.addf %127, %129 : vector<4x16x8xf32>
    %131 = tpu.reciprocal %125 {approx = true} : vector<4x16x1xf32> -> vector<4x16x1xf32>
    %132 = vector.broadcast %131 : vector<4x16x1xf32> to vector<4x16x8xf32>
    %133 = arith.mulf %130, %132 : vector<4x16x8xf32>
    %134 = tpu.transpose %133, [1, 0, 2] : vector<4x16x8xf32> -> vector<16x4x8xf32>
    %135 = vector.shape_cast %134 : vector<16x4x8xf32> to vector<16x32xf32>
    %136 = tpu.concatenate %82, %135 in 0 : vector<16x32xf32>, vector<16x32xf32> -> vector<32x32xf32>
    %137 = arith.truncf %136 : vector<32x32xf32> to vector<32x32xbf16>
    %c0_36 = arith.constant 0 : index
    %c0_37 = arith.constant 0 : index
    %138 = vector.load %arg6[%c0_36, %c0_37] : memref<32x32xbf16, #tpu.memory_space<vmem>>, vector<32x32xbf16>
    %cst_38 = arith.constant dense<0.000000e+00> : vector<32x32xf32>
    %139 = tpu.matmul %137, %138, %cst_38 {dimension_numbers = #tpu.dot_dimension_numbers<[1], [0], [0], [1], [0, 0, 1, 1], [], []>} : vector<32x32xbf16>, vector<32x32xbf16>, vector<32x32xf32> -> vector<32x32xf32>
    %c0_39 = arith.constant 0 : index
    %c0_40 = arith.constant 0 : index
    %140 = vector.load %arg7[%c0_39, %c0_40] : memref<1x32xf32, #tpu.memory_space<vmem>>, vector<1x32xf32>
    %141 = vector.broadcast %140 : vector<1x32xf32> to vector<32x32xf32>
    %142 = arith.addf %139, %141 : vector<32x32xf32>
    %143 = arith.addf %1, %142 : vector<32x32xf32>
    %c0_41 = arith.constant 0 : index
    %c0_42 = arith.constant 0 : index
    %144 = vector.load %arg8[%c0_41, %c0_42] : memref<1x32xf32, #tpu.memory_space<vmem>>, vector<1x32xf32>
    %c0_43 = arith.constant 0 : index
    %c0_44 = arith.constant 0 : index
    %145 = vector.load %arg9[%c0_43, %c0_44] : memref<1x32xf32, #tpu.memory_space<vmem>>, vector<1x32xf32>
    %cst_45 = arith.constant dense<0.000000e+00> : vector<32xf32>
    %146 = vector.multi_reduction <add>, %143, %cst_45 [1] : vector<32x32xf32> to vector<32xf32>
    %147 = vector.shape_cast %146 : vector<32xf32> to vector<32x1xf32>
    %cst_46 = arith.constant 3.200000e+01 : f32
    %148 = vector.broadcast %cst_46 : f32 to vector<32x1xf32>
    %149 = arith.divf %147, %148 : vector<32x1xf32>
    %150 = vector.broadcast %149 : vector<32x1xf32> to vector<32x32xf32>
    %151 = arith.subf %143, %150 : vector<32x32xf32>
    %152 = arith.mulf %151, %151 : vector<32x32xf32>
    %cst_47 = arith.constant dense<0.000000e+00> : vector<32xf32>
    %153 = vector.multi_reduction <add>, %152, %cst_47 [1] : vector<32x32xf32> to vector<32xf32>
    %154 = vector.shape_cast %153 : vector<32xf32> to vector<32x1xf32>
    %cst_48 = arith.constant 3.200000e+01 : f32
    %155 = vector.broadcast %cst_48 : f32 to vector<32x1xf32>
    %156 = arith.divf %154, %155 : vector<32x1xf32>
    %157 = vector.broadcast %149 : vector<32x1xf32> to vector<32x32xf32>
    %158 = arith.subf %143, %157 : vector<32x32xf32>
    %cst_49 = arith.constant 9.99999974E-6 : f32
    %159 = vector.broadcast %cst_49 : f32 to vector<32x1xf32>
    %160 = arith.addf %156, %159 : vector<32x1xf32>
    %161 = math.rsqrt %160 : vector<32x1xf32>
    %162 = vector.broadcast %161 : vector<32x1xf32> to vector<32x32xf32>
    %163 = arith.mulf %158, %162 : vector<32x32xf32>
    %164 = vector.broadcast %144 : vector<1x32xf32> to vector<32x32xf32>
    %165 = arith.mulf %163, %164 : vector<32x32xf32>
    %166 = vector.broadcast %145 : vector<1x32xf32> to vector<32x32xf32>
    %167 = arith.addf %165, %166 : vector<32x32xf32>
    %168 = arith.truncf %167 : vector<32x32xf32> to vector<32x32xbf16>
    %c0_50 = arith.constant 0 : index
    %c0_51 = arith.constant 0 : index
    %169 = vector.load %arg10[%c0_50, %c0_51] : memref<32x128xbf16, #tpu.memory_space<vmem>>, vector<32x128xbf16>
    %cst_52 = arith.constant dense<0.000000e+00> : vector<32x128xf32>
    %170 = tpu.matmul %168, %169, %cst_52 {dimension_numbers = #tpu.dot_dimension_numbers<[1], [0], [0], [1], [0, 0, 1, 1], [], []>} : vector<32x32xbf16>, vector<32x128xbf16>, vector<32x128xf32> -> vector<32x128xf32>
    %c0_53 = arith.constant 0 : index
    %c0_54 = arith.constant 0 : index
    %171 = vector.load %arg11[%c0_53, %c0_54] : memref<1x128xf32, #tpu.memory_space<vmem>>, vector<1x128xf32>
    %172 = vector.broadcast %171 : vector<1x128xf32> to vector<32x128xf32>
    %173 = arith.addf %170, %172 : vector<32x128xf32>
    %cst_55 = arith.constant 5.000000e-01 : f32
    %174 = vector.broadcast %cst_55 : f32 to vector<32x128xf32>
    %175 = arith.mulf %174, %173 : vector<32x128xf32>
    %cst_56 = arith.constant 4.471500e-02 : f32
    %176 = vector.broadcast %cst_56 : f32 to vector<32x128xf32>
    %177 = arith.mulf %176, %173 : vector<32x128xf32>
    %178 = arith.mulf %177, %173 : vector<32x128xf32>
    %179 = arith.mulf %178, %173 : vector<32x128xf32>
    %180 = arith.addf %173, %179 : vector<32x128xf32>
    %cst_57 = arith.constant 0.797884583 : f32
    %181 = vector.broadcast %cst_57 : f32 to vector<32x128xf32>
    %182 = arith.mulf %181, %180 : vector<32x128xf32>
    %183 = math.tanh %182 : vector<32x128xf32>
    %cst_58 = arith.constant 1.000000e+00 : f32
    %184 = vector.broadcast %cst_58 : f32 to vector<32x128xf32>
    %185 = arith.addf %184, %183 : vector<32x128xf32>
    %186 = arith.mulf %175, %185 : vector<32x128xf32>
    %187 = arith.truncf %186 : vector<32x128xf32> to vector<32x128xbf16>
    %c0_59 = arith.constant 0 : index
    %c0_60 = arith.constant 0 : index
    %188 = vector.load %arg12[%c0_59, %c0_60] : memref<128x32xbf16, #tpu.memory_space<vmem>>, vector<128x32xbf16>
    %cst_61 = arith.constant dense<0.000000e+00> : vector<32x32xf32>
    %189 = tpu.matmul %187, %188, %cst_61 {dimension_numbers = #tpu.dot_dimension_numbers<[1], [0], [0], [1], [0, 0, 1, 1], [], []>} : vector<32x128xbf16>, vector<128x32xbf16>, vector<32x32xf32> -> vector<32x32xf32>
    %c0_62 = arith.constant 0 : index
    %c0_63 = arith.constant 0 : index
    %190 = vector.load %arg13[%c0_62, %c0_63] : memref<1x32xf32, #tpu.memory_space<vmem>>, vector<1x32xf32>
    %191 = vector.broadcast %190 : vector<1x32xf32> to vector<32x32xf32>
    %192 = arith.addf %189, %191 : vector<32x32xf32>
    %193 = arith.addf %143, %192 : vector<32x32xf32>
    %c0_64 = arith.constant 0 : index
    %c0_65 = arith.constant 0 : index
    %c0_66 = arith.constant 0 : index
    %194 = vector.load %arg14[%c0_64, %c0_65, %c0_66] : memref<1x32x32xf32, #tpu.memory_space<vmem>>, vector<1x32x32xf32>
    %195 = vector.shape_cast %194 : vector<1x32x32xf32> to vector<32x32xf32>
    %196 = vector.shape_cast %193 : vector<32x32xf32> to vector<1x32x32xf32>
    tpu.vector_store %arg14[%c0_64, %c0_65, %c0_66], %196 {strides = array<i32>} : memref<1x32x32xf32, #tpu.memory_space<vmem>>, vector<1x32x32xf32>,
    return
  }
  func.func @transform_0(%arg0: i32) -> (i32, i32, i32) {
    %c0_i32 = arith.constant 0 : i32
    %c0_i32_0 = arith.constant 0 : i32
    %c0_i32_1 = arith.constant 0 : i32
    return %arg0, %c0_i32, %c0_i32_0 : i32, i32, i32
  }
  func.func @transform_1(%arg0: i32) -> (i32, i32) {
    %c0_i32 = arith.constant 0 : i32
    %c0_i32_0 = arith.constant 0 : i32
    %c0_i32_1 = arith.constant 0 : i32
    return %c0_i32, %c0_i32_0 : i32, i32
  }
  func.func @transform_2(%arg0: i32) -> (i32, i32) {
    %c0_i32 = arith.constant 0 : i32
    %c0_i32_0 = arith.constant 0 : i32
    %c0_i32_1 = arith.constant 0 : i32
    return %c0_i32, %c0_i32_0 : i32, i32
  }
  func.func @transform_3(%arg0: i32) -> (i32, i32) {
    %c0_i32 = arith.constant 0 : i32
    %c0_i32_0 = arith.constant 0 : i32
    %c0_i32_1 = arith.constant 0 : i32
    return %c0_i32, %c0_i32_0 : i32, i32
  }
  func.func @transform_4(%arg0: i32) -> (i32, i32) {
    %c0_i32 = arith.constant 0 : i32
    %c0_i32_0 = arith.constant 0 : i32
    %c0_i32_1 = arith.constant 0 : i32
    return %c0_i32, %c0_i32_0 : i32, i32
  }
  func.func @transform_5(%arg0: i32) -> (i32, i32) {
    %c0_i32 = arith.constant 0 : i32
    %c0_i32_0 = arith.constant 0 : i32
    %c0_i32_1 = arith.constant 0 : i32
    return %c0_i32, %c0_i32_0 : i32, i32
  }
  func.func @transform_6(%arg0: i32) -> (i32, i32) {
    %c0_i32 = arith.constant 0 : i32
    %c0_i32_0 = arith.constant 0 : i32
    %c0_i32_1 = arith.constant 0 : i32
    return %c0_i32, %c0_i32_0 : i32, i32
  }
  func.func @transform_7(%arg0: i32) -> (i32, i32) {
    %c0_i32 = arith.constant 0 : i32
    %c0_i32_0 = arith.constant 0 : i32
    %c0_i32_1 = arith.constant 0 : i32
    return %c0_i32, %c0_i32_0 : i32, i32
  }
  func.func @transform_8(%arg0: i32) -> (i32, i32) {
    %c0_i32 = arith.constant 0 : i32
    %c0_i32_0 = arith.constant 0 : i32
    %c0_i32_1 = arith.constant 0 : i32
    return %c0_i32, %c0_i32_0 : i32, i32
  }
  func.func @transform_9(%arg0: i32) -> (i32, i32) {
    %c0_i32 = arith.constant 0 : i32
    %c0_i32_0 = arith.constant 0 : i32
    %c0_i32_1 = arith.constant 0 : i32
    return %c0_i32, %c0_i32_0 : i32, i32
  }
  func.func @transform_10(%arg0: i32) -> (i32, i32) {
    %c0_i32 = arith.constant 0 : i32
    %c0_i32_0 = arith.constant 0 : i32
    %c0_i32_1 = arith.constant 0 : i32
    return %c0_i32, %c0_i32_0 : i32, i32
  }
  func.func @transform_11(%arg0: i32) -> (i32, i32) {
    %c0_i32 = arith.constant 0 : i32
    %c0_i32_0 = arith.constant 0 : i32
    %c0_i32_1 = arith.constant 0 : i32
    return %c0_i32, %c0_i32_0 : i32, i32
  }
  func.func @transform_12(%arg0: i32) -> (i32, i32) {
    %c0_i32 = arith.constant 0 : i32
    %c0_i32_0 = arith.constant 0 : i32
    %c0_i32_1 = arith.constant 0 : i32
    return %c0_i32, %c0_i32_0 : i32, i32
  }
  func.func @transform_13(%arg0: i32) -> (i32, i32, i32) {
    %c0_i32 = arith.constant 0 : i32
    %c0_i32_0 = arith.constant 0 : i32
    %c0_i32_1 = arith.constant 0 : i32
    return %arg0, %c0_i32, %c0_i32_0 : i32, i32, i32
  }
}

</mosaic_0001>

<bundles_post_ra>
// kernel: tpu_custom_call.1
= control target key start
LH: loop header
LB: loop body
LE: loop exit
PB: predicated region body
PF: predicated region fallthrough
CT: control target
= control target key end

     0   :  { %s7736_s0 = inlined_call_operand.vmem [shape: f32[2,32,32], index: 0, kind: input, shape index: {}]   ;;  %s7737_s1 = inlined_call_operand.vmem [shape: f32[1,32], index: 1, kind: input, shape index: {}]   ;;  %s7738_s2 = inlined_call_operand.vmem [shape: f32[1,32], index: 2, kind: input, shape index: {}]   ;;  %s7739_s3 = inlined_call_operand.vmem [shape: bf16[32,96], index: 3, kind: input, shape index: {}]   ;;  %s7740_s4 = inlined_call_operand.hbm [shape: f32[1,96], index: 4, kind: input, shape index: {}]   ;;  %s7741_s5 = inlined_call_operand.hbm [shape: bf16[32,32], index: 5, kind: input, shape index: {}]   ;;  %s7742_s6 = inlined_call_operand.hbm [shape: f32[1,32], index: 6, kind: input, shape index: {}]   ;;  %s7743_s7 = inlined_call_operand.hbm [shape: f32[1,32], index: 7, kind: input, shape index: {}]   ;;  %s7744_s8 = inlined_call_operand.hbm [shape: f32[1,32], index: 8, kind: input, shape index: {}]   ;;  %s7745_s9 = inlined_call_operand.vmem [shape: bf16[32,128], index: 9, kind: input, shape index: {}]   ;;  %s7746_s10 = inlined_call_operand.vmem [shape: f32[1,128], index: 10, kind: input, shape index: {}]   ;;  %s7747_s11 = inlined_call_operand.vmem [shape: bf16[128,32], index: 11, kind: input, shape index: {}]   ;;  %s7748_s12 = inlined_call_operand.vmem [shape: f32[1,32], index: 12, kind: input, shape index: {}]   ;;  %s7749_s13 = inlined_call_operand.hbm [shape: f32[2,32,32], index: 13, kind: output, shape index: {}]  }
   0x1   :  { %7771 = sst [smem:[#allocation37_spill]] %s7748_s12 }
   0x2   :  { %7772 = sst [smem:[#allocation38_spill]] %s7749_s13 }
   0x3   :  { %18 = vsyncpa [#allocation3], 0 }
   0x4   :  { %19 = vsyncpa [#allocation6], 0 }
   0x5   :  { %20 = vsyncpa [#allocation9], 0 }
   0x6   :  { %21 = vsyncpa [#allocation4], 0 }
   0x7   :  { %23 = vsyncpa [#allocation4 + $0x1], 0  ;;  %s6135_s25 = smov 0   ;;  %s6137_s26 = smov 0  }
   0x8   :  { %s6139_s27 = smov 0   ;;  %s6141_s28 = smov 0  }
   0x9 LB: > { %7773 = sst [smem:[#allocation16_spill]] %s6030_s25  ;;  %s6156_s29 = sadd.s32 4294967295, %s6042_s28   ;;  %s6042_s28 = sphi %s6141_s28, %s7834_s28   ;;  %s6038_s27 = sphi %s6139_s27, %s7836_s27   ;;  %s6034_s26 = sphi %s6137_s26, %s7838_s26   ;;  %s6030_s25 = sphi %s6135_s25, %s7837_s25  }
   0xa   : > { %7774 = sst [smem:[#allocation17_spill]] %s6038_s27  ;;  %s5157_s30 = sadd.s32 4294967294, %s6042_s28  }
   0xb   : > { %7775 = sst [smem:[#allocation18_spill]] %s6042_s28  ;;  %s6160_s14 = sadd.s32 1, %s6042_s28  }
   0xc   : > { %7776 = sst [smem:[#allocation19_spill]] %s6160_s14  ;;  %s314_s15 = sadd.s32 1, %s6038_s27 }
   0xd   : > { %s311_s16 = ssub.s32 %s6042_s28, %s6160_s14  ;;  %p324_p0 = scmp.ne.s32.totalorder %s6038_s27, %s6034_s26 }
   0xe   : > { %p312_p1 = scmp.eq.s32.totalorder %s311_s16, 0  ;;  %p325_p2 = scmp.eq.s32.totalorder %s6156_s29, 1 }
   0xf   : > { %p330_p3 = scmp.ne.s32.totalorder %s6034_s26, %s6030_s25  ;;  %p331_p4 = scmp.eq.s32.totalorder %s5157_s30, 1 }
  0x10   : > { %s6171_s17 = scalar_select %p312_p1, %s6038_s27, %s314_s15  }
  0x11   : > { %p6173_p5 = por %p325_p2, %p324_p0  ;;  %p6177_p6 = por %p331_p4, %p330_p3 }
  0x12   : > { %7777 = sst [smem:[#allocation20_spill]] %s6171_s17  ;;  %p5158_p7 = scmp.ge.s32.totalorder %s6042_s28, 1 }
  0x13   : > { %s7778_s18 = scalar_select %p6173_p5, 1, 0 }
  0x14   : > { %s7780_s19 = scalar_select %p6177_p6, 1, 0 }
  0x15   : > { %7779 = sst [smem:[#allocation21_spill]] %s7778_s18  ;;  %p338_p8 = scmp.lt.s32.totalorder %s6042_s28, 3 }
  0x16   : > { %7781 = sst [smem:[#allocation22_spill]] %s7780_s19  ;;  %p7755_p9 = scmp.eq.s32.totalorder %s6156_s29, 0 }
  0x17   : > { %p6184_p10 = pnand %p5158_p7, %p338_p8  ;;  %s6044_s21 = smov [#allocation5]  }
  0x18   : > { %s370_s22 = sshll.u32 %s6044_s21, 4  ;;  %s6045_s24 = smov [#allocation8]   ;;  %s6190_s22 = int_to_ptr.vmem [resolvable:$true] %s370_s22 }
  0x19   : > { %s7782_s20 = scalar_select %p6184_p10, 1, 0 }
  0x1a   : > { %p5545_p11 = pneg %p6184_p10  ;;  %s395_s30 = sshll.u32 %s6045_s24, 4  ;;  %s6198_s30 = int_to_ptr.vmem [resolvable:$true] %s395_s30 }
  0x1b   : > { %s6046_s15 = smov [#allocation2]   ;;  %s5828_s21 = scalar_lea.hbm %s7741_s5, 256 }
  0x1c   : > { %p6194_p12 = pnand %p7755_p9, %p5545_p11  ;;  %s6200_s16 = sshll.u32 %s6046_s15, 4  ;;  %s361_s16 = int_to_ptr.vmem [resolvable:$true] %s6200_s16 }
  0x1d   : > { %p5829_p13 = scmp.ne.s32.totalorder %s7741_s5, %s5828_s21  ;;  %p5835_p3 = scmp.lt.u32.totalorder %s5828_s21, %s7741_s5 }
  0x1e   : > { %p6210_p0 = pneg %p6194_p12 }
  0x20   : > { %p5831_p1 = pnand %p6210_p0, %p5829_p13 }
  0x22   : > { %p5832_p2 = pneg %p5831_p1 }
  0x24   : > { %p5837_p4 = pnand %p5835_p3, %p5832_p2 }
  0x26   : > { %5840 = shalt.err (!%p5837_p4)
}
  0x27   : > { %s5841_s27 = scalar_lea.vmem %s6190_s22, 256  ;;  %p5849_p9 = scmp.lt.s32.totalorder %s6190_s22, %s6190_s22 }
  0x28   : > { %p5842_p7 = scmp.ne.s32.totalorder %s6190_s22, %s5841_s27  ;;  %p5850_p6 = scmp.lt.s32.totalorder %s5841_s27, %s5841_s27 }
  0x2a   : > { %p5844_p8 = pnand %p5842_p7, %p6210_p0  ;;  %p5851_p13 = por %p5850_p6, %p5849_p9 }
  0x2c   : > { %p5845_p11 = pneg %p5844_p8 }
  0x2e   : > { %p5852_p1 = pnand %p5851_p13, %p5845_p11 }
  0x30   : > { %5855 = shalt.err (!%p5852_p1)
}
  0x31   : > { %s6047_s14 = smov 64   ;;  %s6048_s17 = smov 4  }
  0x32   : > { %5551 = dma.hbm_to_vmem [thread:$0]  (!%p6194_p12), %s7741_s5, 256, %s6190_s22, [#allocation6], %s6047_s14, %s6047_s14, %s6048_s17  }
  0x33   : > { %s5856_s28 = scalar_lea.hbm %s7743_s7, 16 }
  0x34   : > { %p5857_p6 = scmp.ne.s32.totalorder %s7743_s7, %s5856_s28  ;;  %p5863_p3 = scmp.lt.u32.totalorder %s5856_s28, %s7743_s7 }
  0x36   : > { %p5859_p9 = pnand %p5857_p6, %p6210_p0 }
  0x38   : > { %p5860_p2 = pneg %p5859_p9 }
  0x3a   : > { %p5865_p4 = pnand %p5863_p3, %p5860_p2 }
  0x3c   : > { %5868 = shalt.err (!%p5865_p4)
}
  0x3d   : > { %s5869_s22 = scalar_lea.vmem %s6198_s30, 16  ;;  %s5876_s13 = scalar_lea.vmem %s6198_s30, 32 }
  0x3e   : > { %p5870_p7 = scmp.ne.s32.totalorder %s6198_s30, %s5869_s22  ;;  %p5877_p13 = scmp.lt.s32.totalorder %s6198_s30, %s6198_s30 }
  0x3f   : > { %p5878_p1 = scmp.lt.s32.totalorder %s5876_s13, %s5869_s22 }
  0x40   : > { %p5872_p8 = pnand %p5870_p7, %p6210_p0 }
  0x41   : > { %p5879_p6 = por %p5878_p1, %p5877_p13 }
  0x42   : > { %p5873_p11 = pneg %p5872_p8 }
  0x44   : > { %p5880_p9 = pnand %p5879_p6, %p5873_p11 }
  0x46   : > { %5883 = shalt.err (!%p5880_p9)
}
  0x47   : > { %5557 = dma.hbm_to_vmem [thread:$0]  (!%p6194_p12), %s7743_s7, 16, %s6198_s30, [#allocation9]  }
  0x48   : > { %s5884_s17 = scalar_lea.hbm %s7740_s4, 16 }
  0x49   : > { %p5885_p2 = scmp.ne.s32.totalorder %s7740_s4, %s5884_s17  ;;  %p5891_p7 = scmp.lt.u32.totalorder %s5884_s17, %s7740_s4 }
  0x4b   : > { %p5887_p3 = pnand %p5885_p2, %p6210_p0 }
  0x4d   : > { %p5888_p4 = pneg %p5887_p3 }
  0x4f   : > { %p5893_p8 = pnand %p5891_p7, %p5888_p4 }
  0x51   : > { %5896 = shalt.err (!%p5893_p8)
}
  0x52   : > { %s5897_s27 = scalar_lea.vmem %s361_s16, 16  ;;  %s5904_s30 = scalar_lea.vmem %s361_s16, 32 }
  0x53   : > { %p5898_p11 = scmp.ne.s32.totalorder %s361_s16, %s5897_s27  ;;  %p5905_p6 = scmp.lt.s32.totalorder %s361_s16, %s361_s16 }
  0x54   : > { %p5906_p9 = scmp.lt.s32.totalorder %s5904_s30, %s5897_s27 }
  0x55   : > { %p5900_p13 = pnand %p5898_p11, %p6210_p0 }
  0x56   : > { %p5907_p5 = por %p5906_p9, %p5905_p6 }
  0x57   : > { %p5901_p1 = pneg %p5900_p13 }
  0x59   : > { %p5908_p10 = pnand %p5907_p5, %p5901_p1 }
  0x5b   : > { %5911 = shalt.err (!%p5908_p10)
}
  0x5c   : > { %5548 = dma.hbm_to_vmem [thread:$0]  (!%p6194_p12), %s7740_s4, 16, %s361_s16, [#allocation3]  }
  0x5d   : > { %s6049_s12 = smov [#allocation7]   ;;  %s6050_s18 = smov [#allocation10]  }
  0x5e   : > { %s384_s28 = sshll.u32 %s6049_s12, 4  ;;  %s406_s14 = sshll.u32 %s6050_s18, 4  ;;  %s385_s28 = int_to_ptr.vmem [resolvable:$true] %s384_s28  ;;  %s407_s14 = int_to_ptr.vmem [resolvable:$true] %s406_s14 }
  0x5f   : > { %s5912_s21 = scalar_lea.hbm %s7742_s6, 16 }
  0x60   : > { %p5913_p5 = scmp.ne.s32.totalorder %s7742_s6, %s5912_s21  ;;  %p5919_p3 = scmp.lt.u32.totalorder %s5912_s21, %s7742_s6 }
  0x62   : > { %p5915_p10 = pnand %p5913_p5, %p6210_p0 }
  0x64   : > { %p5916_p2 = pneg %p5915_p10 }
  0x66   : > { %p5921_p4 = pnand %p5919_p3, %p5916_p2 }
  0x68   : > { %5924 = shalt.err (!%p5921_p4)
}
  0x69   : > { %s5925_s16 = scalar_lea.vmem %s385_s28, 16  ;;  %s5932_s22 = scalar_lea.vmem %s385_s28, 32 }
  0x6a   : > { %p5926_p7 = scmp.ne.s32.totalorder %s385_s28, %s5925_s16  ;;  %p5933_p13 = scmp.lt.s32.totalorder %s385_s28, %s385_s28 }
  0x6b   : > { %p5934_p1 = scmp.lt.s32.totalorder %s5932_s22, %s5925_s16 }
  0x6c   : > { %p5928_p8 = pnand %p5926_p7, %p6210_p0 }
  0x6d   : > { %p5935_p6 = por %p5934_p1, %p5933_p13 }
  0x6e   : > { %p5929_p11 = pneg %p5928_p8 }
  0x70   : > { %p5936_p9 = pnand %p5935_p6, %p5929_p11 }
  0x72   : > { %5939 = shalt.err (!%p5936_p9)
}
  0x73   : > { %5554 = dma.hbm_to_vmem [thread:$0]  (!%p6194_p12), %s7742_s6, 16, %s385_s28, [#allocation6]  }
  0x74   : > { %s5940_s19 = scalar_lea.hbm %s7744_s8, 16 }
  0x75   : > { %p5941_p5 = scmp.ne.s32.totalorder %s7744_s8, %s5940_s19  ;;  %p5947_p3 = scmp.lt.u32.totalorder %s5940_s19, %s7744_s8 }
  0x77   : > { %p5943_p10 = pnand %p5941_p5, %p6210_p0 }
  0x79   : > { %p5944_p2 = pneg %p5943_p10 }
  0x7b   : > { %p5949_p4 = pnand %p5947_p3, %p5944_p2 }
  0x7d   : > { %5952 = shalt.err (!%p5949_p4)
}
  0x7e   : > { %s5953_s30 = scalar_lea.vmem %s407_s14, 16  ;;  %s5960_s28 = scalar_lea.vmem %s407_s14, 32 }
  0x7f   : > { %p5954_p7 = scmp.ne.s32.totalorder %s407_s14, %s5953_s30  ;;  %p5961_p13 = scmp.lt.s32.totalorder %s407_s14, %s407_s14 }
  0x80   : > { %p5962_p1 = scmp.lt.s32.totalorder %s5960_s28, %s5953_s30 }
  0x81   : > { %p5956_p8 = pnand %p5954_p7, %p6210_p0 }
  0x82   : > { %p5963_p6 = por %p5962_p1, %p5961_p13 }
  0x83   : > { %p5957_p11 = pneg %p5956_p8 }
  0x85   : > { %p5964_p9 = pnand %p5963_p6, %p5957_p11 }
  0x87   : > { %5967 = shalt.err (!%p5964_p9)
}
  0x88   : > { %5560 = dma.hbm_to_vmem [thread:$0]  (!%p6194_p12), %s7744_s8, 16, %s407_s14, [#allocation9]  }
  0x89   : > { %p7785_p5 = scmp.ne.s32.totalorder %s7782_s20, 0 }
  0x8b   : > { %439 = sbr.rel (%p7785_p5) target bundleno = 3581 (0xdfd), region = 72 }
  0x92   : > { %p7786_p10 = scmp.eq.s32.totalorder %s6156_s29, 0 }
  0x94   : > { %6013 = dma.done.wait (%p7786_p10), [#allocation3], 16   ;;  %p7787_p0 = pmov %p7786_p10 }
  0x96   : > { %6015 = vsyncadd (%p7787_p0), [#allocation3], 4294967280  ;;  %p7788_p2 = pmov %p7787_p0 }
  0x97   : > { %p7789_p3 = pmov %p7787_p0 }
  0x98   : > { %6017 = dma.done.wait (%p7788_p2), [#allocation6], 272  }
  0x99   : > { %6019 = vsyncadd (%p7789_p3), [#allocation6], 4294967024  ;;  %p7790_p4 = pmov %p7787_p0 }
  0x9a   : > { %p7791_p12 = pmov %p7787_p0 }
  0x9b   : > { %6021 = dma.done.wait (%p7790_p4), [#allocation9], 32  }
  0x9c   : > { %6023 = vsyncadd (%p7791_p12), [#allocation9], 4294967264  ;;  %p499_p7 = scmp.lt.s32.totalorder %s6156_s29, 1  ;;  %vm511_vm0 = vcmask 261120   ;;  %v5658_v28 = vld [vmem:[%s7739_s3] sm:$0xff]   ;;  %v5659_v29 = vld [vmem:[%s7739_s3 + $0x8] sm:$0xff]  }
  0x9d   : > { %5335 = vmatprep.subr.bf16.mxu0 %v5658_v28  ;;  %v5174_v44 = vld [vmem:[%s7737_s1] ss:$0 sm:$0xff]  ;;  %s6051_s30 = smov 112   ;;  %s6052_s28 = smov 120   ;;  %vm6057_vm1 = vmmov 0   ;;  %vm2496_vm2 = vcmask 64512  }
  0x9e   : > { %s500_s25 = scalar_select %p499_p7, %s6156_s29, 1  ;;  %5336 = vmatpush3.bf16.msra.mxu0 %v5658_v28  ;;  %v5175_v49 = vld [vmem:[%s7738_s2] ss:$0 sm:$0xff]  ;;  %vm2697_vm4 = vcmask 130048   ;;  %vm3322_vm6 = vcmask 195584  }
  0x9f   : > { %5337 = vmatprep.subr.bf16.mxu0 %v5659_v29  ;;  %v5176_v62 = vld [vmem:[#allocation2] ss:$0 sm:$0xff]  ;;  %s6053_s16 = smov 104   ;;  %s6054_s22 = smov 96  }
  0xa0   : > { %s5263_s20 = sshll.u32 %s500_s25, 5  ;;  %s6055_s25 = smov 64  }
  0xa1   : > { %s6329_s13 = scalar_lea.vmem %s7736_s0, %s5263_s20  ;;  %s6060_s20 = smov 16  }
  0xa2   : > { %v505_v0 = vld [vmem:[%s6329_s13] sm:$0xff]  ;;  %v507_v1 = vld [vmem:[%s6329_s13 + $0x10] sm:$0xff]  ;;  %v506_v2 = vld [vmem:[%s6329_s13 + $0x8] sm:$0xff]  ;;  %5338 = vmatpush3.bf16.msra.mxu0 %v5659_v29  ;;  %s6061_s23 = smov 8   ;;  %s6062_s14 = smov 24  }
  0xa3   : > { %v512_v3 = vsel %vm511_vm0, %v505_v0, 0.0  ;;  %v518_v4 = vsel %vm511_vm0, %v507_v1, 0.0  ;;  %v508_v5 = vld [vmem:[%s6329_s13 + $0x18] sm:$0xff]  ;;  %v515_v6 = vsel %vm511_vm0, %v506_v2, 0.0  ;;  %s496_s24 = sand.u32 1, %s6034_s26   ;;  %s7828_s12 = sld [smem:[#allocation38_spill]] }
  0xa4   : > { %513 = vadd.xlane.f32.xlu0 %v512_v3  ;;  %519 = vadd.xlane.f32.xlu1 %v518_v4  ;;  %v521_v7 = vsel %vm511_vm0, %v508_v5, 0.0  ;;  %s5171_s15 = sshll.u32 %s496_s24, 5  ;;  %s7694_s18 = scalar_lea.sflag [#allocation4], %s496_s24 }
  0xa5   : > { %s6063_s19 = smov [#allocation11]  }
  0xa6   : > { %s5972_s21 = sshll.u32 %s6063_s19, 4  ;;  %s5973_s21 = int_to_ptr.vmem [resolvable:$false] %s5972_s21 }
  0xa8   : > { %516 = vadd.xlane.f32.xlu0 %v515_v6  ;;  %522 = vadd.xlane.f32.xlu1 %v521_v7 }
 0x131   : > { %v514_v8 = vpop.xlane.xlu0 %513  ;;  %v520_v9 = vpop.xlane.xlu1 %519 }
 0x132   : > { %v525_v10 = vmul.f32 0.03125, %v514_v8  ;;  %v527_v11 = vmul.f32 0.03125, %v520_v9 }
 0x134   : > { %v529_v12 = vsub.f32 %v505_v0, %v525_v10  ;;  %v531_v13 = vsub.f32 %v507_v1, %v527_v11 }
 0x135   : > { %v517_v14 = vpop.xlane.xlu0 %516  ;;  %v523_v15 = vpop.xlane.xlu1 %522 }
 0x136   : > { %v526_v16 = vmul.f32 0.03125, %v517_v14  ;;  %v528_v17 = vmul.f32 0.03125, %v523_v15  ;;  %v533_v18 = vmul.f32 %v529_v12, %v529_v12  ;;  %v535_v19 = vmul.f32 %v531_v13, %v531_v13 }
 0x137   : > { %v7763_v15 = vmov 0.0  }
 0x138   : > { %v530_v20 = vsub.f32 %v506_v2, %v526_v16  ;;  %v532_v21 = vsub.f32 %v508_v5, %v528_v17  ;;  %v537_v22 = vsel %vm511_vm0, %v533_v18, 0.0  ;;  %v543_v23 = vsel %vm511_vm0, %v535_v19, 0.0  ;;  %5343 = vmatprep.subr.bf16.mxu0 %v7763_v15  ;;  %5355 = vmatprep.subr.bf16.mxu1 %v7763_v15 }
 0x139   : > { %538 = vadd.xlane.f32.xlu0 %v537_v22  ;;  %5357 = vmatprep.mubr.msk.bf16.mxu1 %vm6057_vm1, %v7763_v15 }
 0x13a   : > { %v534_v24 = vmul.f32 %v530_v20, %v530_v20  ;;  %v536_v25 = vmul.f32 %v532_v21, %v532_v21 }
 0x13c   : > { %v540_v26 = vsel %vm511_vm0, %v534_v24, 0.0  ;;  %v546_v27 = vsel %vm511_vm0, %v536_v25, 0.0  ;;  %v714_v25 = vlaneseq }
 0x13d   : > { %544 = vadd.xlane.f32.xlu0 %v543_v23  ;;  %541 = vadd.xlane.f32.xlu1 %v540_v26  ;;  %v6058_v23 = vmov 1983009808  }
 0x13e   : > { %v712_v24 = vunpack.c.l.s4 %v6058_v23  ;;  %v6422_v28 = vshrl.u32 %v714_v25, 7 }
 0x141   : > { %547 = vadd.xlane.f32.xlu1 %v546_v27  ;;  %v713_v27 = vunpack.c.0.s8 %v712_v24 }
 0x1c6   : > { %v539_v30 = vpop.xlane.xlu0 %538 }
 0x1c7   : > { %v549_v31 = vmul.f32 0.03125, %v539_v30  ;;  %v6059_v30 = vmov 1934713408  }
 0x1c9   : > { %v553_v32 = vadd.f32 1e-05, %v549_v31  ;;  %v744_v31 = vunpack.c.l.s4 %v6059_v30 }
 0x1ca   : > { %v542_v33 = vpop.xlane.xlu1 %541  ;;  %v545_v34 = vpop.xlane.xlu0 %544 }
 0x1cb   : > { %5672 = vrsqrt.f32 %v553_v32  ;;  %v550_v35 = vmul.f32 0.03125, %v542_v33  ;;  %v551_v36 = vmul.f32 0.03125, %v545_v34  ;;  %v6425_v32 = vsub.s32 %v713_v27, %v6422_v28 }
 0x1cd   : > { %v554_v37 = vadd.f32 1e-05, %v550_v35  ;;  %v555_v38 = vadd.f32 1e-05, %v551_v36 }
 0x1ce   : > { %v548_v39 = vpop.xlane.xlu1 %547 }
 0x1cf   : > { %5674 = vrsqrt.f32 %v554_v37  ;;  %v552_v40 = vmul.f32 0.03125, %v548_v39  ;;  %v745_v37 = vunpack.c.0.s8 %v744_v31 }
 0x1d0   : > { %5676 = vrsqrt.f32 %v555_v38 }
 0x1d1   : > { %v556_v41 = vadd.f32 1e-05, %v552_v40 }
 0x1d3   : > { %5678 = vrsqrt.f32 %v556_v41 }
 0x1d5   : > { %v5673_v42 = vpop.eup %5672 }
 0x1d6   : > { %v561_v43 = vmul.f32 %v5673_v42, %v529_v12 }
 0x1d8   : > { %v571_v48 = vmul.f32 %v5174_v44, %v561_v43 }
 0x1d9   : > { %v5675_v45 = vpop.eup %5674 }
 0x1da   : > { %v5677_v46 = vpop.eup %5676  ;;  %v562_v47 = vmul.f32 %v5675_v45, %v530_v20  ;;  %v581_v53 = vadd.f32 %v5175_v49, %v571_v48 }
 0x1db   : > { %v563_v50 = vmul.f32 %v5677_v46, %v531_v13 }
 0x1dc   : > { %v572_v51 = vmul.f32 %v5174_v44, %v562_v47  ;;  %v6432_v47 = vsub.s32 %v745_v37, %v6422_v28 }
 0x1dd   : > { %v5679_v52 = vpop.eup %5678  ;;  %v573_v56 = vmul.f32 %v5174_v44, %v563_v50 }
 0x1de   : > { %v582_v54 = vadd.f32 %v5175_v49, %v572_v51  ;;  %v564_v55 = vmul.f32 %v5679_v52, %v532_v21 }
 0x1df   : > { %v583_v59 = vadd.f32 %v5175_v49, %v573_v56 }
 0x1e0   : > { %v585_v57 = vpack.c.bf16 %v582_v54, %v581_v53  ;;  %v574_v58 = vmul.f32 %v5174_v44, %v564_v55 }
 0x1e2   : > { %5339 = vmatprep.mubr.msk.bf16.mxu0 %vm511_vm0, %v585_v57  ;;  %v584_v60 = vadd.f32 %v5175_v49, %v574_v58 }
 0x1e4   : > { %v586_v61 = vpack.c.bf16 %v584_v60, %v583_v59 }
 0x1e6   : > { %5340 = vmatmul.mubr.msk.bf16.vlgmr.msra.gmra.mrb[0].mxu0 %vm511_vm0, %v586_v61 }
 0x1e7   : > { %5345 = vmatprep.mubr.msk.bf16.mxu0 %vm6057_vm1, %v7763_v15 }
 0x2b9   : > { %v5341_v63 = vpop.f32.mrb[0].mxu0 }
 0x2ba   : > { %v6357_v0 = vadd.f32 %v5341_v63, %v5176_v62  ;;  %v650_v1 = vpop.f32.mrb[1].mxu0 }
 0x2bb   : > { %v651_v2 = vadd.f32 %v5176_v62, %v650_v1  ;;  %v5342_v3 = vpop.f32.mrb[2].mxu0 }
 0x2bc   : > { %v6359_v4 = vadd.f32 %v5342_v3, %v5176_v62  ;;  %v653_v5 = vpop.f32.mrb[3].mxu0  ;;  %v6402_v17 = vmul.f32 0.35355338, %v6357_v0 }
 0x2bd   : > { %1273 = vrot.lane.b32.xlu1 %v651_v2, %s6051_s30  ;;  %1265 = vrot.lane.b32.xlu0 %v651_v2, %s6052_s28  ;;  %v654_v6 = vadd.f32 %v5176_v62, %v653_v5  ;;  %v6367_v7 = vmul.f32 0.35355338, %v651_v2 }
 0x2be   : > { %v6399_v16 = vmul.f32 0.35355338, %v6359_v4 }
 0x2bf   : > { %v6373_v8 = vmul.f32 0.35355338, %v654_v6 }
 0x2c1   : > { %1267 = vrot.lane.b32.xlu1 %v654_v6, %s6052_s28  ;;  %1281 = vrot.lane.b32.xlu0 %v651_v2, %s6053_s16 }
 0x2c5   : > { %1275 = vrot.lane.b32.xlu1 %v654_v6, %s6051_s30  ;;  %1289 = vrot.lane.b32.xlu0 %v651_v2, %s6054_s22 }
 0x2c9   : > { %1283 = vrot.lane.b32.xlu1 %v654_v6, %s6053_s16  ;;  %673 = vrot.lane.b32.xlu0 %v6367_v7, %s6052_s28 }
 0x2cd   : > { %1291 = vrot.lane.b32.xlu1 %v654_v6, %s6054_s22 }
 0x2d1   : > { %675 = vrot.lane.b32.xlu1 %v6373_v8, %s6052_s28 }
 0x32f   : > { %v1274_v9 = vpop.permute.xlu1 %1273  ;;  %v1266_v10 = vpop.permute.xlu0 %1265 }
 0x330   : > { %1297 = vrot.lane.b32.xlu0 %v1266_v10, %s6054_s22 }
 0x333   : > { %v1268_v11 = vpop.permute.xlu1 %1267  ;;  %v1282_v12 = vpop.permute.xlu0 %1281 }
 0x334   : > { %1299 = vrot.lane.b32.xlu1 %v1268_v11, %s6054_s22  ;;  %1305 = vrot.lane.b32.xlu0 %v1274_v9, %s6054_s22 }
 0x337   : > { %v1276_v13 = vpop.permute.xlu1 %1275  ;;  %v1290_v18 = vpop.permute.xlu0 %1289 }
 0x338   : > { %1307 = vrot.lane.b32.xlu1 %v1276_v13, %s6054_s22  ;;  %1313 = vrot.lane.b32.xlu0 %v1282_v12, %s6054_s22 }
 0x33b   : > { %v1284_v14 = vpop.permute.xlu1 %1283  ;;  %v674_v20 = vpop.permute.xlu0 %673 }
 0x33c   : > { %1315 = vrot.lane.b32.xlu1 %v1284_v14, %s6054_s22  ;;  %685 = vrot.lane.b32.xlu0 %v6367_v7, %s6051_s30 }
 0x33f   : > { %v1292_v19 = vpop.permute.xlu1 %1291 }
 0x340   : > { %687 = vrot.lane.b32.xlu1 %v6373_v8, %s6051_s30  ;;  %697 = vrot.lane.b32.xlu0 %v6367_v7, %s6053_s16 }
 0x343   : > { %v6419_v21 = vpop.permute.xlu1 %675 }
 0x344   : > { %699 = vrot.lane.b32.xlu1 %v6373_v8, %s6053_s16  ;;  %1889 = vrot.lane.b32.xlu0 %v651_v2, %s6055_s25 }
 0x348   : > { %1891 = vrot.lane.b32.xlu1 %v654_v6, %s6055_s25  ;;  %1905 = vrot.lane.b32.xlu0 %v1274_v9, %s6055_s25 }
 0x34c   : > { %1897 = vrot.lane.b32.xlu1 %v1266_v10, %s6055_s25  ;;  %1913 = vrot.lane.b32.xlu0 %v1282_v12, %s6055_s25 }
 0x350   : > { %679 = vrot.lane.b32.xlu1 %v6399_v16, %s6052_s28  ;;  %677 = vrot.lane.b32.xlu0 %v6402_v17, %s6052_s28 }
 0x354   : > { %691 = vrot.lane.b32.xlu1 %v6399_v16, %s6051_s30  ;;  %689 = vrot.lane.b32.xlu0 %v6402_v17, %s6051_s30 }
 0x358   : > { %1899 = vrot.lane.b32.xlu1 %v1268_v11, %s6055_s25 }
 0x35c   : > { %1907 = vrot.lane.b32.xlu1 %v1276_v13, %s6055_s25 }
 0x360   : > { %1915 = vrot.lane.b32.xlu1 %v1284_v14, %s6055_s25 }
 0x3a2   : > { %v1298_v22 = vpop.permute.xlu0 %1297 }
 0x3a6   : > { %v1300_v26 = vpop.permute.xlu1 %1299  ;;  %v1306_v29 = vpop.permute.xlu0 %1305 }
 0x3a7   : > { %v1337_v33 = vcombine.low %v1290_v18, %v1306_v29  ;;  %v1338_v36 = vcombine.high %v1290_v18, %v1306_v29 }
 0x3a9   : > { %v1345_v41 = vrot.slane %v1337_v33, %v6425_v32  ;;  %v1352_v45 = vrot.slane %v1338_v36, %v6425_v32 }
 0x3aa   : > { %v1308_v34 = vpop.permute.xlu1 %1307  ;;  %v1314_v35 = vpop.permute.xlu0 %1313 }
 0x3ab   : > { %v1353_v38 = vcombine.low %v1298_v22, %v1314_v35  ;;  %v1354_v39 = vcombine.high %v1298_v22, %v1314_v35  ;;  %v1405_v46 = vcombine.low %v1292_v19, %v1308_v34  ;;  %v1406_v52 = vcombine.high %v1292_v19, %v1308_v34 }
 0x3ad   : > { %v1361_v40 = vrot.slane %v1353_v38, %v6425_v32  ;;  %v1368_v42 = vrot.slane %v1354_v39, %v6425_v32  ;;  %v1413_v58 = vrot.slane %v1405_v46, %v6425_v32  ;;  %v1420_v6 = vrot.slane %v1406_v52, %v6425_v32 }
 0x3ae   : > { %v1316_v43 = vpop.permute.xlu1 %1315  ;;  %v686_v44 = vpop.permute.xlu0 %685 }
 0x3af   : > { %v1369_v48 = vcombine.low %v1345_v41, %v1361_v40  ;;  %v1370_v49 = vcombine.high %v1345_v41, %v1361_v40  ;;  %v1421_v50 = vcombine.low %v1300_v26, %v1316_v43  ;;  %v1422_v51 = vcombine.high %v1300_v26, %v1316_v43 }
 0x3b0   : > { %v1385_v53 = vcombine.low %v1352_v45, %v1368_v42  ;;  %v1386_v54 = vcombine.high %v1352_v45, %v1368_v42  ;;  %v709_v59 = vcombine.low %v6367_v7, %v686_v44  ;;  %v710_v60 = vcombine.high %v6367_v7, %v686_v44 }
 0x3b1   : > { %v1429_v55 = vrot.slane %v1421_v50, %v6425_v32  ;;  %v6439_v61 = vrot.slane %v1369_v48, %v6432_v47  ;;  %v6442_v62 = vrot.slane %v1370_v49, %v6432_v47  ;;  %v1436_v63 = vrot.slane %v1422_v51, %v6425_v32 }
 0x3b2   : > { %v688_v56 = vpop.permute.xlu1 %687  ;;  %v698_v57 = vpop.permute.xlu0 %697  ;;  %v1393_v9 = vrot.slane %v1385_v53, %v6432_v47  ;;  %v1400_v10 = vrot.slane %v1386_v54, %v6432_v47  ;;  %v717_v12 = vrot.slane %v709_v59, %v6425_v32  ;;  %v724_v13 = vrot.slane %v710_v60, %v6425_v32 }
 0x3b3   : > { %v1437_v1 = vcombine.low %v1413_v58, %v1429_v55  ;;  %v1438_v2 = vcombine.high %v1413_v58, %v1429_v55  ;;  %v725_v3 = vcombine.low %v674_v20, %v698_v57  ;;  %v726_v5 = vcombine.high %v674_v20, %v698_v57 }
 0x3b4   : > { %v1609_v19 = vcombine.low %v6439_v61, %v6442_v62  ;;  %v5189_v20 = vcombine.high %v6439_v61, %v6442_v62  ;;  %v777_v22 = vcombine.low %v6373_v8, %v688_v56  ;;  %v778_v23 = vcombine.high %v6373_v8, %v688_v56 }
 0x3b5   : > { %v733_v14 = vrot.slane %v725_v3, %v6425_v32  ;;  %v740_v18 = vrot.slane %v726_v5, %v6425_v32  ;;  %v1445_v24 = vrot.slane %v1437_v1, %v6432_v47  ;;  %v1452_v26 = vrot.slane %v1438_v2, %v6432_v47 }
 0x3b6   : > { %v700_v11 = vpop.permute.xlu1 %699  ;;  %v6448_v7 = vpop.permute.xlu0 %1889  ;;  %v1453_v27 = vcombine.low %v1420_v6, %v1436_v63  ;;  %v1454_v29 = vcombine.high %v1420_v6, %v1436_v63  ;;  %v1625_v30 = vcombine.low %v1393_v9, %v1400_v10  ;;  %v5190_v31 = vcombine.high %v1393_v9, %v1400_v10 }
 0x3b7   : > { %v793_v33 = vcombine.low %v6419_v21, %v700_v11  ;;  %v794_v34 = vcombine.high %v6419_v21, %v700_v11  ;;  %v741_v37 = vcombine.low %v717_v12, %v733_v14  ;;  %v742_v38 = vcombine.high %v717_v12, %v733_v14 }
 0x3b8   : > { %v757_v39 = vcombine.low %v724_v13, %v740_v18  ;;  %v758_v8 = vcombine.high %v724_v13, %v740_v18  ;;  %v785_v40 = vrot.slane %v777_v22, %v6425_v32  ;;  %v792_v41 = vrot.slane %v778_v23, %v6425_v32 }
 0x3b9   : > { %v801_v42 = vrot.slane %v793_v33, %v6425_v32  ;;  %v808_v43 = vrot.slane %v794_v34, %v6425_v32  ;;  %v1461_v44 = vrot.slane %v1453_v27, %v6432_v47  ;;  %v1468_v21 = vrot.slane %v1454_v29, %v6432_v47 }
 0x3ba   : > { %v6464_v35 = vpop.permute.xlu1 %1891  ;;  %v6466_v36 = vpop.permute.xlu0 %1905  ;;  %v1677_v45 = vcombine.low %v1445_v24, %v1452_v26  ;;  %v5191_v46 = vcombine.high %v1445_v24, %v1452_v26  ;;  %v749_v53 = vrot.slane %v741_v37, %v6432_v47  ;;  %v756_v54 = vrot.slane %v742_v38, %v6432_v47 }
 0x3bb   : > { %v809_v48 = vcombine.low %v785_v40, %v801_v42  ;;  %v810_v49 = vcombine.high %v785_v40, %v801_v42  ;;  %v825_v50 = vcombine.low %v792_v41, %v808_v43  ;;  %v826_v51 = vcombine.high %v792_v41, %v808_v43 }
 0x3bc   : > { %v765_v55 = vrot.slane %v757_v39, %v6432_v47  ;;  %v772_v56 = vrot.slane %v758_v8, %v6432_v47  ;;  %v1693_v62 = vcombine.low %v1461_v44, %v1468_v21  ;;  %v5192_v63 = vcombine.high %v1461_v44, %v1468_v21 }
 0x3bd   : > { %v817_v57 = vrot.slane %v809_v48, %v6432_v47  ;;  %v824_v58 = vrot.slane %v810_v49, %v6432_v47  ;;  %v833_v59 = vrot.slane %v825_v50, %v6432_v47  ;;  %v840_v60 = vrot.slane %v826_v51, %v6432_v47 }
 0x3be   : > { %v1898_v52 = vpop.permute.xlu1 %1897  ;;  %v1914_v61 = vpop.permute.xlu0 %1913  ;;  %v1937_v1 = vcombine.low %v6448_v7, %v6466_v36  ;;  %v1616_v2 = vrot.slane %v1609_v19, %v6425_v32  ;;  %v1624_v10 = vrot.slane %v5189_v20, %v6425_v32  ;;  %v1632_v13 = vrot.slane %v1625_v30, %v6425_v32 }
 0x3bf   : > { %v1049_v3 = vcombine.low %v817_v57, %v824_v58  ;;  %v5183_v5 = vcombine.high %v817_v57, %v824_v58  ;;  %v1065_v6 = vcombine.low %v833_v59, %v840_v60  ;;  %v5184_v11 = vcombine.high %v833_v59, %v840_v60 }
 0x3c0   : > { %v1953_v12 = vcombine.low %v1898_v52, %v1914_v61  ;;  %v1640_v14 = vrot.slane %v5190_v31, %v6425_v32  ;;  %v981_v18 = vcombine.low %v749_v53, %v756_v54  ;;  %v5181_v22 = vcombine.high %v749_v53, %v756_v54 }
 0x3c1   : > { %v997_v23 = vcombine.low %v765_v55, %v772_v56  ;;  %v1938_v24 = vcombine.high %v6448_v7, %v6466_v36  ;;  %v5182_v19 = vcombine.high %v765_v55, %v772_v56  ;;  %v1945_v26 = vrot.slane %v1937_v1, %v6425_v32 }
 0x3c2   : > { %v6485_v9 = vpop.permute.xlu1 %679  ;;  %v1954_v27 = vcombine.high %v1898_v52, %v1914_v61  ;;  %v1961_v29 = vrot.slane %v1953_v12, %v6425_v32  ;;  %v6495_v20 = vrot.slane %v1049_v3, %v6425_v32  ;;  %v6498_v33 = vrot.slane %v5183_v5, %v6425_v32 }
 0x3c3   : > { %v1684_v30 = vrot.slane %v1677_v45, %v6425_v32  ;;  %v1692_v31 = vrot.slane %v5191_v46, %v6425_v32  ;;  %v6505_v7 = vrot.slane %v1065_v6, %v6425_v32  ;;  %v6508_v36 = vrot.slane %v5184_v11, %v6425_v32 }
 0x3c4   : > { %v1641_v37 = vcombine.low %v1616_v2, %v1624_v10  ;;  %v1657_v38 = vcombine.low %v1632_v13, %v1640_v14  ;;  %v988_v39 = vrot.slane %v981_v18, %v6425_v32  ;;  %v996_v8 = vrot.slane %v5181_v22, %v6425_v32 }
 0x3c5   : > { %v1004_v40 = vrot.slane %v997_v23, %v6425_v32  ;;  %v1012_v41 = vrot.slane %v5182_v19, %v6425_v32  ;;  %v1968_v42 = vrot.slane %v1954_v27, %v6425_v32  ;;  %v1969_v43 = vcombine.low %v1945_v26, %v1961_v29 }
 0x3c6   : > { %v6502_v34 = vpop.permute.xlu1 %691  ;;  %v1970_v44 = vcombine.high %v1945_v26, %v1961_v29  ;;  %v1952_v21 = vrot.slane %v1938_v24, %v6425_v32  ;;  %v1700_v45 = vrot.slane %v1693_v62, %v6425_v32  ;;  %v1708_v46 = vrot.slane %v5192_v63, %v6425_v32 }
 0x3c7   : > { %v1709_v48 = vcombine.low %v1684_v30, %v1692_v31  ;;  %v1081_v50 = vcombine.low %v6495_v20, %v6498_v33  ;;  %v1097_v51 = vcombine.low %v6505_v7, %v6508_v36  ;;  %v1649_v52 = vrot.slane %v1641_v37, %v6432_v47 }
 0x3c8   : > { %v1665_v53 = vrot.slane %v1657_v38, %v6432_v47  ;;  %v1725_v55 = vcombine.low %v1700_v45, %v1708_v46  ;;  %v1642_v56 = vcombine.high %v1616_v2, %v1624_v10  ;;  %v1658_v57 = vcombine.high %v1632_v13, %v1640_v14 }
 0x3c9   : > { %v1717_v54 = vrot.slane %v1709_v48, %v6432_v47  ;;  %v1977_v58 = vrot.slane %v1969_v43, %v6432_v47  ;;  %v1984_v59 = vrot.slane %v1970_v44, %v6432_v47  ;;  %v1985_v60 = vcombine.low %v1952_v21, %v1968_v42 }
 0x3ca   : > { %v6518_v49 = vpop.permute.xlu1 %1899  ;;  %v1986_v61 = vcombine.high %v1952_v21, %v1968_v42  ;;  %v1013_v62 = vcombine.low %v988_v39, %v996_v8  ;;  %v1029_v63 = vcombine.low %v1004_v40, %v1012_v41  ;;  %v1733_v1 = vrot.slane %v1725_v55, %v6432_v47 }
 0x3cb   : > { %v1710_v3 = vcombine.high %v1684_v30, %v1692_v31  ;;  %v6531_v5 = vrot.slane %v1081_v50, %v6432_v47  ;;  %v6534_v6 = vrot.slane %v1642_v56, %v6432_v47  ;;  %v6537_v2 = vrot.slane %v1658_v57, %v6432_v47 }
 0x3cc   : > { %v1726_v10 = vcombine.high %v1700_v45, %v1708_v46  ;;  %v6540_v11 = vrot.slane %v1097_v51, %v6432_v47  ;;  %v1673_v12 = vcombine.low %v1649_v52, %v1665_v53  ;;  %v1741_v13 = vcombine.low %v1717_v54, %v1733_v1 }
 0x3cd   : > { %v6543_v14 = vrot.slane %v1710_v3, %v6432_v47  ;;  %v1993_v22 = vrot.slane %v1985_v60, %v6432_v47  ;;  %v2000_v23 = vrot.slane %v1986_v61, %v6432_v47  ;;  %v2209_v24 = vcombine.low %v1977_v58, %v1984_v59 }
 0x3ce   : > { %v1908_v18 = vpop.permute.xlu1 %1907  ;;  %v6548_v19 = vrot.slane %v1726_v10, %v6432_v47  ;;  %v5197_v26 = vcombine.high %v1977_v58, %v1984_v59  ;;  %v1881_v27 = vpack.c.bf16 %v1741_v13, %v1673_v12  ;;  %v6551_v29 = vrot.slane %v1013_v62, %v6432_v47 }
 0x3cf   : > { %v6554_v30 = vrot.slane %v1029_v63, %v6432_v47  ;;  %v1675_v31 = vcombine.low %v6534_v6, %v6537_v2  ;;  %v1014_v38 = vcombine.high %v988_v39, %v996_v8  ;;  %v1030_v42 = vcombine.high %v1004_v40, %v1012_v41 }
 0x3d0   : > { %v1743_v37 = vcombine.low %v6543_v14, %v6548_v19  ;;  %v6561_v43 = vsel %vm2496_vm2, %v1881_v27, 0  ;;  %v1113_v44 = vcombine.low %v6531_v5, %v6540_v11  ;;  %v1082_v21 = vcombine.high %v6495_v20, %v6498_v33 }
 0x3d1   : > { %v1098_v45 = vcombine.high %v6505_v7, %v6508_v36  ;;  %5344 = vmatpush3.bf16.xpose.msra.mxu0 %v6561_v43  ;;  %v1045_v48 = vcombine.low %v6551_v29, %v6554_v30  ;;  %v6573_v39 = vrot.slane %v1014_v38, %v6432_v47  ;;  %v6576_v8 = vrot.slane %v1030_v42, %v6432_v47 }
 0x3d2   : > { %v1885_v46 = vpack.c.bf16 %v1743_v37, %v1675_v31  ;;  %5349 = vmatprep.subr.bf16.mxu0 %v7763_v15  ;;  %v6580_v40 = vrot.slane %v1082_v21, %v6432_v47  ;;  %v1674_v33 = vcombine.high %v1649_v52, %v1665_v53  ;;  %v1742_v7 = vcombine.high %v1717_v54, %v1733_v1  ;;  %v1916_v36 = vpop.permute.xlu1 %1915 }
 0x3d3   : > { %v6583_v20 = vrot.slane %v1098_v45, %v6432_v47  ;;  %v2225_v41 = vcombine.low %v1993_v22, %v2000_v23  ;;  %v5198_v50 = vcombine.high %v1993_v22, %v2000_v23  ;;  %v2005_v55 = vcombine.low %v6464_v35, %v1908_v18 }
 0x3d4   : > { %v6586_v51 = vsel %vm2496_vm2, %v1885_v46, 0  ;;  %v1253_v56 = vpack.c.bf16 %v1113_v44, %v1045_v48  ;;  %v1883_v58 = vpack.c.bf16 %v1742_v7, %v1674_v33  ;;  %v2006_v59 = vcombine.high %v6464_v35, %v1908_v18 }
 0x3d5   : > { %5356 = vmatpush3.bf16.xpose.msra.mxu1 %v6586_v51  ;;  %v1115_v57 = vcombine.low %v6580_v40, %v6583_v20  ;;  %v1047_v52 = vcombine.low %v6573_v39, %v6576_v8  ;;  %v2021_v53 = vcombine.low %v6518_v49, %v1916_v36  ;;  %v2022_v54 = vcombine.high %v6518_v49, %v1916_v36 }
 0x3d6   : > { %5367 = vmatprep.subr.bf16.mxu1 %v7763_v15  ;;  %v2216_v60 = vrot.slane %v2209_v24, %v6425_v32  ;;  %v2224_v61 = vrot.slane %v5197_v26, %v6425_v32  ;;  %v2013_v62 = vrot.slane %v2005_v55, %v6425_v32  ;;  %v2020_v1 = vrot.slane %v2006_v59, %v6425_v32 }
 0x3d7   : > { %v1257_v63 = vpack.c.bf16 %v1115_v57, %v1047_v52  ;;  %v2029_v35 = vrot.slane %v2021_v53, %v6425_v32  ;;  %v2036_v3 = vrot.slane %v2022_v54, %v6425_v32  ;;  %v2232_v10 = vrot.slane %v2225_v41, %v6425_v32 }
 0x3d8   : > { %v2240_v12 = vrot.slane %v5198_v50, %v6425_v32  ;;  %5346 = vmatmul.mubr.msk.bf16.vlgmr.msra.gmra.mrb[4].mxu0 %vm2496_vm2, %v1253_v56  ;;  %v6608_v49 = vsel %vm2496_vm2, %v1883_v58, 0  ;;  %v1744_v13 = vcombine.high %v6543_v14, %v6548_v19  ;;  %v1046_v26 = vcombine.high %v6551_v29, %v6554_v30 }
 0x3d9   : > { %5350 = vmatpush3.bf16.xpose.msra.mxu0 %v6608_v49  ;;  %v2037_v18 = vcombine.low %v2013_v62, %v2029_v35  ;;  %v2038_v22 = vcombine.high %v2013_v62, %v2029_v35  ;;  %v2053_v23 = vcombine.low %v2020_v1, %v2036_v3  ;;  %v2054_v24 = vcombine.high %v2020_v1, %v2036_v3 }
 0x3da   : > { %5351 = vmatprep.mubr.msk.bf16.mxu0 %vm6057_vm1, %v7763_v15  ;;  %v1114_v27 = vcombine.high %v6531_v5, %v6540_v11  ;;  %5361 = vmatprep.subr.bf16.mxu0 %v7763_v15  ;;  %v1676_v14 = vcombine.high %v6534_v6, %v6537_v2  ;;  %v2241_v29 = vcombine.low %v2216_v60, %v2224_v61 }
 0x3db   : > { %v2045_v19 = vrot.slane %v2037_v18, %v6432_v47  ;;  %v2052_v31 = vrot.slane %v2038_v22, %v6432_v47  ;;  %v2061_v37 = vrot.slane %v2053_v23, %v6432_v47  ;;  %v2068_v38 = vrot.slane %v2054_v24, %v6432_v47 }
 0x3dc   : > { %5358 = vmatmul.mubr.msk.bf16.vlgmr.msra.gmra.mrb[0].mxu1 %vm2496_vm2, %v1257_v63  ;;  %v1887_v42 = vpack.c.bf16 %v1744_v13, %v1676_v14  ;;  %v2257_v30 = vcombine.low %v2232_v10, %v2240_v12  ;;  %v2242_v5 = vcombine.high %v2216_v60, %v2224_v61  ;;  %v1255_v21 = vpack.c.bf16 %v1114_v27, %v1046_v26 }
 0x3dd   : > { %5369 = vmatprep.mubr.msk.bf16.mxu1 %vm6057_vm1, %v7763_v15  ;;  %v2277_v11 = vcombine.low %v2045_v19, %v2052_v31  ;;  %v5199_v44 = vcombine.high %v2045_v19, %v2052_v31  ;;  %v2293_v6 = vcombine.low %v2061_v37, %v2068_v38  ;;  %v5200_v2 = vcombine.high %v2061_v37, %v2068_v38 }
 0x3de   : > { %v2256_v45 = vrot.slane %v2242_v5, %v6432_v47  ;;  %v2258_v46 = vcombine.high %v2232_v10, %v2240_v12  ;;  %v6636_v41 = vsel %vm2496_vm2, %v1887_v42, 0  ;;  %v2249_v50 = vrot.slane %v2241_v29, %v6432_v47 }
 0x3df   : > { %v2284_v48 = vrot.slane %v2277_v11, %v6425_v32  ;;  %v2292_v33 = vrot.slane %v5199_v44, %v6425_v32  ;;  %v2300_v7 = vrot.slane %v2293_v6, %v6425_v32  ;;  %v2308_v36 = vrot.slane %v5200_v2, %v6425_v32 }
 0x3e0   : > { %5352 = vmatmul.mubr.msk.bf16.vlgmr.msra.gmra.mrb[8].mxu0 %vm2496_vm2, %v1255_v21  ;;  %v2265_v55 = vrot.slane %v2257_v30, %v6432_v47  ;;  %v2272_v56 = vrot.slane %v2258_v46, %v6432_v47  ;;  %v1116_v52 = vcombine.high %v6580_v40, %v6583_v20  ;;  %v1048_v1 = vcombine.high %v6573_v39, %v6576_v8 }
 0x3e1   : > { %5362 = vmatpush3.bf16.xpose.msra.mxu0 %v6636_v41  ;;  %5363 = vmatprep.mubr.msk.bf16.mxu0 %vm6057_vm1, %v7763_v15  ;;  %v2309_v57 = vcombine.low %v2284_v48, %v2292_v33  ;;  %v2325_v58 = vcombine.low %v2300_v7, %v2308_v36  ;;  %v2310_v59 = vcombine.high %v2284_v48, %v2292_v33  ;;  %v2493_v39 = vand.u32 127, %v714_v25 }
 0x3e2   : > { %5373 = vmatprep.subr.bf16.mxu0 %v7763_v15  ;;  %v2275_v53 = vcombine.low %v2256_v45, %v2272_v56  ;;  %v2326_v54 = vcombine.high %v2300_v7, %v2308_v36  ;;  %v2276_v60 = vcombine.high %v2256_v45, %v2272_v56  ;;  %v2273_v3 = vcombine.low %v2249_v50, %v2265_v55 }
 0x3e3   : > { %v2317_v61 = vrot.slane %v2309_v57, %v6432_v47  ;;  %v2333_v62 = vrot.slane %v2325_v58, %v6432_v47  ;;  %v2324_v63 = vrot.slane %v2310_v59, %v6432_v47  ;;  %v2274_v12 = vcombine.high %v2249_v50, %v2265_v55 }
 0x3e4   : > { %v2340_v35 = vrot.slane %v2326_v54, %v6432_v47  ;;  %v1259_v20 = vpack.c.bf16 %v1116_v52, %v1048_v1  ;;  %v2491_v8 = vadd.s32 8, %v6422_v28  ;;  %vm6671_vm3 = vcmp.ge.s32.totalorder %v6422_v28, %v2493_v39 }
 0x3e5   : > { %v2341_v10 = vcombine.low %v2317_v61, %v2333_v62  ;;  %v2342_v40 = vcombine.high %v2317_v61, %v2333_v62  ;;  %v678_v62 = vpop.permute.xlu0 %677 }
 0x3e6   : > { %v2343_v13 = vcombine.low %v2324_v63, %v2340_v35  ;;  %v2344_v18 = vcombine.high %v2324_v63, %v2340_v35  ;;  %vm6675_vm5 = vcmp.ge.s32.totalorder %v2491_v8, %v2493_v39 }
 0x3e7   : > { %v6653_v22 = vpack.c.bf16 %v2341_v10, %v2273_v3  ;;  %v6655_v23 = vpack.c.bf16 %v2342_v40, %v2274_v12 }
 0x3e8   : > { %5364 = vmatmul.mubr.msk.bf16.vlgmr.msra.gmra.mrb[12].mxu0 %vm2496_vm2, %v1259_v20  ;;  %v6658_v24 = vpack.c.bf16 %v2343_v13, %v2275_v53  ;;  %v6660_v26 = vpack.c.bf16 %v2344_v18, %v2276_v60 }
 0x3e9   : > { %5368 = vmatpush3.bf16.msra.mxu1 %v6653_v22  ;;  %5374 = vmatpush3.bf16.msra.mxu0 %v6655_v23  ;;  %v690_v63 = vpop.permute.xlu0 %689 }
 0x3ea   : > { %5379 = vmatprep.subr.bf16.mxu1 %v7763_v15  ;;  %5375 = vmatprep.mubr.msk.bf16.mxu0 %vm6057_vm1, %v7763_v15 }
 0x3eb   : > { %5385 = vmatprep.subr.bf16.mxu0 %v7763_v15 }
 0x4ab   : > { %v2537_v14 = vpop.f32.mrb[4].mxu0 }
 0x4ac   : > { %v2689_v31 = vsel %vm6671_vm3, %v2537_v14, -1e+30  ;;  %v5347_v37 = vpop.f32.mrb[5].mxu0 }
 0x4ad   : > { %v2540_v38 = vpop.f32.mrb[6].mxu0  ;;  %v2698_v25 = vsel %vm2697_vm4, %v2689_v31, -inf }
 0x4ae   : > { %v2690_v28 = vsel %vm6675_vm5, %v2540_v38, -1e+30  ;;  %2699 = vmax.xlane.f32.xlu0 %v2698_v25  ;;  %v5348_v29 = vpop.f32.mrb[7].mxu0 }
 0x4af   : > { %v2631_v42 = vpop.f32.mrb[0].mxu1  ;;  %v2701_v11 = vsel %vm2697_vm4, %v2690_v28, -inf }
 0x4b0   : > { %v2693_v30 = vsel %vm6671_vm3, %v2631_v42, -1e+30  ;;  %v5359_v5 = vpop.f32.mrb[1].mxu1  ;;  %2702 = vmax.xlane.f32.xlu1 %v2701_v11 }
 0x4b1   : > { %v2634_v44 = vpop.f32.mrb[2].mxu1  ;;  %v2710_v21 = vsel %vm2697_vm4, %v2693_v30, -inf }
 0x4b2   : > { %v2694_v6 = vsel %vm6675_vm5, %v2634_v44, -1e+30  ;;  %v5360_v2 = vpop.f32.mrb[3].mxu1  ;;  %2711 = vmax.xlane.f32.xlu0 %v2710_v21 }
 0x4b3   : > { %v2584_v45 = vpop.f32.mrb[8].mxu0  ;;  %v2713_v46 = vsel %vm2697_vm4, %v2694_v6, -inf }
 0x4b4   : > { %v2691_v48 = vsel %vm6671_vm3, %v2584_v45, -1e+30  ;;  %2714 = vmax.xlane.f32.xlu1 %v2713_v46  ;;  %v5353_v33 = vpop.f32.mrb[9].mxu0 }
 0x4b5   : > { %v2587_v7 = vpop.f32.mrb[10].mxu0  ;;  %v2704_v36 = vsel %vm2697_vm4, %v2691_v48, -inf  ;;  %v846_v33 = vcombine.high %v6402_v17, %v690_v63 }
 0x4b6   : > { %v2692_v50 = vsel %vm6675_vm5, %v2587_v7, -1e+30  ;;  %2705 = vmax.xlane.f32.xlu0 %v2704_v36  ;;  %v5354_v55 = vpop.f32.mrb[11].mxu0 }
 0x4b7   : > { %v2707_v56 = vsel %vm2697_vm4, %v2692_v50, -inf }
 0x4ba   : > { %2708 = vmax.xlane.f32.xlu0 %v2707_v56  ;;  %v913_v56 = vcombine.low %v6399_v16, %v6502_v34 }
 0x4bb   : > { %v2678_v57 = vpop.f32.mrb[12].mxu0 }
 0x4bc   : > { %v2695_v58 = vsel %vm6671_vm3, %v2678_v57, -1e+30  ;;  %v5365_v59 = vpop.f32.mrb[13].mxu0  ;;  %v914_v57 = vcombine.high %v6399_v16, %v6502_v34 }
 0x4bd   : > { %v2681_v52 = vpop.f32.mrb[14].mxu0  ;;  %v2716_v53 = vsel %vm2697_vm4, %v2695_v58, -inf }
 0x4be   : > { %v2696_v54 = vsel %vm6675_vm5, %v2681_v52, -1e+30  ;;  %2717 = vmax.xlane.f32.xlu0 %v2716_v53  ;;  %v5366_v60 = vpop.f32.mrb[15].mxu0 }
 0x4bf   : > { %v2719_v61 = vsel %vm2697_vm4, %v2696_v54, -inf }
 0x4c0   : > { %2720 = vmax.xlane.f32.xlu1 %v2719_v61 }
 0x4d1   : > { %703 = vrot.lane.b32.xlu1 %v6399_v16, %s6053_s16 }
 0x4d4   : > { %701 = vrot.lane.b32.xlu0 %v6402_v17, %s6053_s16 }
 0x4d5   : > { %1271 = vrot.lane.b32.xlu1 %v6359_v4, %s6052_s28 }
 0x4d8   : > { %1269 = vrot.lane.b32.xlu0 %v6357_v0, %s6052_s28  ;;  %s7826_s28 = sld [smem:[#allocation37_spill]] }
 0x4d9   : > { %1279 = vrot.lane.b32.xlu1 %v6359_v4, %s6051_s30 }
 0x4dc   : > { %1277 = vrot.lane.b32.xlu0 %v6357_v0, %s6051_s30 }
 0x4dd   : > { %1287 = vrot.lane.b32.xlu1 %v6359_v4, %s6053_s16 }
 0x4e0   : > { %1285 = vrot.lane.b32.xlu0 %v6357_v0, %s6053_s16  ;;  %s498_s16 = scalar_lea.vmem [#allocation11], %s5171_s15  ;;  %s5974_s15 = scalar_lea.vmem %s5973_s21, 1024 }
 0x4e1   : > { %1295 = vrot.lane.b32.xlu1 %v6359_v4, %s6054_s22 }
 0x4e4   : > { %1293 = vrot.lane.b32.xlu0 %v6357_v0, %s6054_s22 }
 0x53b   : > { %v6723_v1 = vpop.xlane.xlu0 %2699 }
 0x53c   : > { %v2722_v35 = vmax.f32 %v6723_v1, -1e+30 }
 0x53d   : > { %v6726_v3 = vpop.xlane.xlu1 %2702 }
 0x53e   : > { %v2754_v10 = vsub.f32 %v2689_v31, %v2722_v35  ;;  %v2723_v12 = vmax.f32 %v6726_v3, -1e+30 }
 0x53f   : > { %v6731_v40 = vpop.xlane.xlu0 %2711 }
 0x540   : > { %v2755_v20 = vsub.f32 %v2690_v28, %v2723_v12  ;;  %v2762_v13 = vmul.f32 1.442695, %v2754_v10  ;;  %v2726_v8 = vmax.f32 %v6731_v40, -1e+30 }
 0x541   : > { %v6735_v18 = vpop.xlane.xlu1 %2714 }
 0x542   : > { %v2764_v39 = vmul.f32 1.442695, %v2755_v20  ;;  %v2727_v14 = vmax.f32 %v6735_v18, -1e+30  ;;  %v2758_v25 = vsub.f32 %v2693_v30, %v2726_v8  ;;  %v845_v30 = vcombine.low %v6402_v17, %v690_v63 }
 0x543   : > { %v6739_v37 = vpop.xlane.xlu0 %2705  ;;  %v860_v63 = vrot.slane %v846_v33, %v6425_v32 }
 0x544   : > { %v2759_v31 = vsub.f32 %v2694_v6, %v2727_v14  ;;  %v2724_v38 = vmax.f32 %v6739_v37, -1e+30  ;;  %5680 = vpow2.f32 %v2764_v39  ;;  %v2770_v11 = vmul.f32 1.442695, %v2758_v25 }
 0x545   : > { %5682 = vpow2.f32 %v2762_v13  ;;  %v853_v61 = vrot.slane %v845_v30, %v6425_v32  ;;  %v921_v13 = vrot.slane %v913_v56, %v6425_v32  ;;  %v928_v39 = vrot.slane %v914_v57, %v6425_v32 }
 0x546   : > { %v2772_v28 = vmul.f32 1.442695, %v2759_v31  ;;  %v2756_v29 = vsub.f32 %v2691_v48, %v2724_v38 }
 0x547   : > { %v6746_v42 = vpop.xlane.xlu0 %2708 }
 0x548   : > { %v2725_v5 = vmax.f32 %v6746_v42, -1e+30  ;;  %5684 = vpow2.f32 %v2772_v28  ;;  %v2766_v2 = vmul.f32 1.442695, %v2756_v29 }
 0x549   : > { %5686 = vpow2.f32 %v2770_v11 }
 0x54a   : > { %v2757_v44 = vsub.f32 %v2692_v50, %v2725_v5  ;;  %v2733_v1 = vsub.f32 -1e+30, %v2725_v5 }
 0x54b   : > { %v6753_v6 = vpop.xlane.xlu0 %2717 }
 0x54c   : > { %v2768_v21 = vmul.f32 1.442695, %v2757_v44  ;;  %v2728_v45 = vmax.f32 %v6753_v6, -1e+30 }
 0x54d   : > { %v6757_v46 = vpop.xlane.xlu1 %2720 }
 0x54e   : > { %v2760_v48 = vsub.f32 %v2695_v58, %v2728_v45  ;;  %v7762_v7 = vmax.f32 %v6757_v46, -1e+30  ;;  %v6763_v36 = vpop.eup %5680  ;;  %5688 = vpow2.f32 %v2768_v21  ;;  %v2736_v40 = vsub.f32 -1e+30, %v2728_v45 }
 0x54f   : > { %v702_v50 = vpop.permute.xlu0 %701  ;;  %v6765_v55 = vpop.eup %5682  ;;  %5690 = vpow2.f32 %v2766_v2  ;;  %v7796_v18 = vmax.f32 %v6757_v46, -1e+30 }
 0x550   : > { %v2761_v17 = vsub.f32 %v2696_v54, %v7762_v7  ;;  %v2774_v59 = vmul.f32 1.442695, %v2760_v48  ;;  %v861_v58 = vcombine.low %v678_v62, %v702_v50  ;;  %v862_v52 = vcombine.high %v678_v62, %v702_v50 }
 0x551   : > { %v704_v53 = vpop.permute.xlu1 %703  ;;  %v2818_v60 = vpack.c.bf16 %v6763_v36, %v6765_v55  ;;  %v2750_v42 = vmul.f32 1.442695, %v2736_v40 }
 0x552   : > { %v929_v10 = vcombine.low %v6485_v9, %v704_v53  ;;  %v2776_v20 = vmul.f32 1.442695, %v2761_v17  ;;  %v869_v16 = vrot.slane %v861_v58, %v6425_v32  ;;  %v876_v34 = vrot.slane %v862_v52, %v6425_v32  ;;  %v6795_v11 = vpop.eup %5684 }
 0x553   : > { %v930_v54 = vcombine.high %v6485_v9, %v704_v53  ;;  %5370 = vmatmul.mubr.msk.bf16.vlgmr.msra.gmra.mrb[4].mxu1 %vm2697_vm4, %v2818_v60  ;;  %v6782_v62 = vpop.permute.xlu0 %1269  ;;  %5692 = vpow2.f32 %v2774_v59  ;;  %v6803_v57 = vpop.eup %5686 }
 0x554   : > { %v937_v31 = vrot.slane %v929_v10, %v6425_v32  ;;  %5380 = vmatpush3.bf16.msra.mxu1 %v6658_v24  ;;  %1301 = vrot.lane.b32.xlu1 %v6782_v62, %s6054_s22  ;;  %v877_v25 = vcombine.low %v853_v61, %v869_v16  ;;  %v878_v28 = vcombine.high %v853_v61, %v869_v16  ;;  %5694 = vpow2.f32 %v2776_v20 }
 0x555   : > { %v893_v29 = vcombine.low %v860_v63, %v876_v34  ;;  %v6790_v9 = vpop.permute.xlu1 %1271  ;;  %5381 = vmatprep.mubr.msk.bf16.mxu1 %vm6057_vm1, %v7763_v15  ;;  %5391 = vmatprep.subr.bf16.mxu1 %v7763_v15  ;;  %v894_v44 = vcombine.high %v860_v63, %v876_v34  ;;  %v944_v2 = vrot.slane %v930_v54, %v6425_v32 }
 0x556   : > { %v945_v21 = vcombine.low %v921_v13, %v937_v31  ;;  %v946_v30 = vcombine.high %v921_v13, %v937_v31  ;;  %v885_v33 = vrot.slane %v877_v25, %v6432_v47  ;;  %v892_v48 = vrot.slane %v878_v28, %v6432_v47 }
 0x557   : > { %v901_v50 = vrot.slane %v893_v29, %v6432_v47  ;;  %v6801_v56 = vpop.permute.xlu0 %1277  ;;  %v908_v17 = vrot.slane %v894_v44, %v6432_v47  ;;  %v961_v52 = vcombine.low %v928_v39, %v944_v2  ;;  %v962_v63 = vcombine.high %v928_v39, %v944_v2 }
 0x558   : > { %v953_v59 = vrot.slane %v945_v21, %v6432_v47  ;;  %v960_v58 = vrot.slane %v946_v30, %v6432_v47  ;;  %1303 = vrot.lane.b32.xlu1 %v6790_v9, %s6054_s22  ;;  %v6810_v53 = vpop.eup %5688  ;;  %v1117_v60 = vcombine.low %v885_v33, %v892_v48  ;;  %v5185_v61 = vcombine.high %v885_v33, %v892_v48 }
 0x559   : > { %1309 = vrot.lane.b32.xlu0 %v6801_v56, %s6054_s22  ;;  %v2820_v10 = vpack.c.bf16 %v6795_v11, %v6803_v57  ;;  %v6816_v20 = vpop.eup %5690  ;;  %v1133_v16 = vcombine.low %v901_v50, %v908_v17  ;;  %v5186_v34 = vcombine.high %v901_v50, %v908_v17  ;;  %v969_v54 = vrot.slane %v961_v52, %v6432_v47  ;;  %v6822_v29 = vpop.permute.xlu1 %1279 }
 0x55a   : > { %v1185_v13 = vcombine.low %v953_v59, %v960_v58  ;;  %v1124_v31 = vrot.slane %v1117_v60, %v6425_v32  ;;  %v1132_v25 = vrot.slane %v5185_v61, %v6425_v32  ;;  %v976_v28 = vrot.slane %v962_v63, %v6432_v47 }
 0x55b   : > { %v5187_v39 = vcombine.high %v953_v59, %v960_v58  ;;  %5382 = vmatmul.mubr.msk.bf16.vlgmr.msra.gmra.mrb[8].mxu1 %vm2697_vm4, %v2820_v10  ;;  %v1140_v44 = vrot.slane %v1133_v16, %v6425_v32  ;;  %v1148_v2 = vrot.slane %v5186_v34, %v6425_v32  ;;  %v2819_v30 = vpack.c.bf16 %v6810_v53, %v6816_v20 }
 0x55c   : > { %v1192_v21 = vrot.slane %v1185_v13, %v6425_v32  ;;  %1311 = vrot.lane.b32.xlu1 %v6822_v29, %s6054_s22  ;;  %v1201_v48 = vcombine.low %v969_v54, %v976_v28  ;;  %v1149_v50 = vcombine.low %v1124_v31, %v1132_v25  ;;  %v5188_v59 = vcombine.high %v969_v54, %v976_v28 }
 0x55d   : > { %v1200_v33 = vrot.slane %v5187_v39, %v6425_v32  ;;  %5392 = vmatpush3.bf16.xpose.msra.mxu1 %v6561_v43  ;;  %v1165_v17 = vcombine.low %v1140_v44, %v1148_v2  ;;  %5376 = vmatmul.mubr.msk.bf16.vlgmr.msra.gmra.mrb[16].mxu0 %vm2697_vm4, %v2819_v30  ;;  %v6837_v58 = vpop.eup %5692  ;;  %v1150_v30 = vcombine.high %v1124_v31, %v1132_v25 }
 0x55e   : > { %5393 = vmatprep.mubr.msk.bf16.mxu1 %vm6057_vm1, %v7763_v15  ;;  %v1208_v52 = vrot.slane %v1201_v48, %v6425_v32  ;;  %5386 = vmatpush3.bf16.msra.mxu0 %v6660_v26  ;;  %v1216_v61 = vrot.slane %v5188_v59, %v6425_v32  ;;  %v6844_v43 = vpop.eup %5694  ;;  %v1157_v63 = vrot.slane %v1149_v50, %v6432_v47 }
 0x55f   : > { %v1217_v60 = vcombine.low %v1192_v21, %v1200_v33  ;;  %5387 = vmatprep.mubr.msk.bf16.mxu0 %vm6057_vm1, %v7763_v15  ;;  %5397 = vmatprep.subr.bf16.mxu0 %v7763_v15  ;;  %v1173_v10 = vrot.slane %v1165_v17, %v6432_v47  ;;  %v1218_v54 = vcombine.high %v1192_v21, %v1200_v33 }
 0x560   : > { %5403 = vmatprep.subr.bf16.mxu1 %v7763_v15  ;;  %v1233_v34 = vcombine.low %v1208_v52, %v1216_v61  ;;  %v1234_v13 = vcombine.high %v1208_v52, %v1216_v61  ;;  %v2821_v39 = vpack.c.bf16 %v6844_v43, %v6837_v58  ;;  %v1166_v48 = vcombine.high %v1140_v44, %v1148_v2 }
 0x561   : > { %v1225_v16 = vrot.slane %v1217_v60, %v6432_v47  ;;  %v1181_v59 = vcombine.low %v1157_v63, %v1173_v10  ;;  %v1232_v50 = vrot.slane %v1218_v54, %v6432_v47  ;;  %v1164_v31 = vrot.slane %v1150_v30, %v6432_v47 }
 0x562   : > { %v1241_v28 = vrot.slane %v1233_v34, %v6432_v47  ;;  %v1248_v17 = vrot.slane %v1234_v13, %v6432_v47  ;;  %v1180_v25 = vrot.slane %v1166_v48, %v6432_v47  ;;  %v1182_v44 = vcombine.high %v1157_v63, %v1173_v10 }
 0x563   : > { %v2731_v61 = vsub.f32 -1e+30, %v2723_v12  ;;  %v2732_v34 = vsub.f32 -1e+30, %v2724_v38  ;;  %v2744_v12 = vmul.f32 1.442695, %v2733_v1 }
 0x564   : > { %v1249_v7 = vcombine.low %v1225_v16, %v1241_v28  ;;  %v1250_v33 = vcombine.high %v1225_v16, %v1241_v28  ;;  %v1183_v2 = vcombine.low %v1164_v31, %v1180_v25  ;;  %v1184_v60 = vcombine.high %v1164_v31, %v1180_v25 }
 0x565   : > { %5388 = vmatmul.mubr.msk.bf16.vlgmr.msra.gmra.mrb[20].mxu0 %vm2697_vm4, %v2821_v39  ;;  %v2740_v10 = vmul.f32 1.442695, %v2731_v61  ;;  %v2734_v16 = vsub.f32 -1e+30, %v2726_v8  ;;  %v2742_v3 = vmul.f32 1.442695, %v2732_v34 }
 0x566   : > { %5399 = vmatprep.mubr.msk.bf16.mxu0 %vm6057_vm1, %v7763_v15  ;;  %v6860_v21 = vpack.c.bf16 %v1249_v7, %v1181_v59  ;;  %v6871_v7 = vpack.c.bf16 %v1250_v33, %v1182_v44 }
 0x567   : > { %5398 = vmatpush3.bf16.xpose.msra.mxu0 %v6608_v49  ;;  %v1251_v49 = vcombine.low %v1232_v50, %v1248_v17  ;;  %v2746_v54 = vmul.f32 1.442695, %v2734_v16 }
 0x568   : > { %5409 = vmatprep.subr.bf16.mxu0 %v7763_v15  ;;  %5394 = vmatmul.mubr.msk.bf16.vlgmr.msra.gmra.mrb[12].mxu1 %vm2496_vm2, %v6860_v21 }
 0x569   : > { %5404 = vmatpush3.bf16.xpose.msra.mxu1 %v6586_v51  ;;  %5405 = vmatprep.mubr.msk.bf16.mxu1 %vm6057_vm1, %v7763_v15  ;;  %v6876_v52 = vpack.c.bf16 %v1251_v49, %v1183_v2  ;;  %v1252_v51 = vcombine.high %v1232_v50, %v1248_v17 }
 0x56a   : > { %5415 = vmatprep.subr.bf16.mxu1 %v7763_v15 }
 0x56e   : > { %5400 = vmatmul.mubr.msk.bf16.vlgmr.msra.gmra.mrb[24].mxu0 %vm2496_vm2, %v6871_v7 }
 0x56f   : > { %5410 = vmatpush3.bf16.xpose.msra.mxu0 %v6636_v41  ;;  %5411 = vmatprep.mubr.msk.bf16.mxu0 %vm6057_vm1, %v7763_v15  ;;  %v6887_v41 = vpack.c.bf16 %v1252_v51, %v1184_v60 }
 0x570   : > { %5421 = vmatprep.subr.bf16.mxu0 %v7763_v15  ;;  %5406 = vmatmul.mubr.msk.bf16.vlgmr.msra.gmra.mrb[16].mxu1 %vm2496_vm2, %v6876_v52 }
 0x571   : > { %5416 = vmatpush3.bf16.msra.mxu1 %v6653_v22  ;;  %5417 = vmatprep.mubr.msk.bf16.mxu1 %vm6057_vm1, %v7763_v15  ;;  %v2730_v22 = vsub.f32 -1e+30, %v2722_v35 }
 0x572   : > { %5427 = vmatprep.subr.bf16.mxu1 %v7763_v15 }
 0x573   : > { %v2738_v63 = vmul.f32 1.442695, %v2730_v22 }
 0x575   : > { %5696 = vpow2.f32 %v2738_v63 }
 0x576   : > { %5412 = vmatmul.mubr.msk.bf16.vlgmr.msra.gmra.mrb[28].mxu0 %vm2496_vm2, %v6887_v41  ;;  %5698 = vpow2.f32 %v2740_v10 }
 0x577   : > { %5422 = vmatpush3.bf16.msra.mxu0 %v6655_v23  ;;  %5423 = vmatprep.mubr.msk.bf16.mxu0 %vm6057_vm1, %v7763_v15  ;;  %v2735_v23 = vsub.f32 -1e+30, %v2727_v14  ;;  %5700 = vpow2.f32 %v2746_v54  ;;  %v2737_v14 = vsub.f32 -1e+30, %v7796_v18 }
 0x578   : > { %5433 = vmatprep.subr.bf16.mxu0 %v7763_v15 }
 0x579   : > { %v2748_v35 = vmul.f32 1.442695, %v2735_v23  ;;  %v2752_v48 = vmul.f32 1.442695, %v2737_v14 }
 0x57b   : > { %5702 = vpow2.f32 %v2748_v35 }
 0x57c   : > { %5704 = vpow2.f32 %v2742_v3 }
 0x57d   : > { %5706 = vpow2.f32 %v2744_v12 }
 0x57e   : > { %5708 = vpow2.f32 %v2750_v42 }
 0x57f   : > { %v5697_v13 = vpop.eup %5696  ;;  %5710 = vpow2.f32 %v2752_v48 }
 0x580   : > { %v5699_v8 = vpop.eup %5698  ;;  %v6911_v37 = vmul.f32 0.0, %v5697_v13 }
 0x581   : > { %v6916_v39 = vmul.f32 0.0, %v5699_v8  ;;  %v5701_v59 = vpop.eup %5700 }
 0x582   : > { %7797 = vst [vmem:[#allocation23_spill] sm:$0xff] %v6911_v37  ;;  %v6921_v17 = vmul.f32 0.0, %v5701_v59 }
 0x584   : > { %7800 = vst [vmem:[#allocation26_spill] sm:$0xff] %v6921_v17 }
 0x585   : > { %v5703_v46 = vpop.eup %5702 }
 0x586   : > { %v5705_v50 = vpop.eup %5704  ;;  %v6926_v49 = vmul.f32 0.0, %v5703_v46 }
 0x587   : > { %v5707_v31 = vpop.eup %5706  ;;  %v6928_v2 = vmul.f32 0.0, %v5705_v50 }
 0x588   : > { %7802 = vst [vmem:[#allocation28_spill] sm:$0xff] %v6926_v49  ;;  %v6936_v16 = vmul.f32 0.0, %v5707_v31  ;;  %v5709_v1 = vpop.eup %5708 }
 0x589   : > { %7803 = vst [vmem:[#allocation29_spill] sm:$0xff] %v6928_v2  ;;  %v5711_v35 = vpop.eup %5710  ;;  %v6941_v3 = vmul.f32 0.0, %v5709_v1 }
 0x58a   : > { %v6946_v8 = vmul.f32 0.0, %v5711_v35 }
 0x58b   : > { %7807 = vst [vmem:[#allocation33_spill] sm:$0xff] %v6941_v3 }
 0x58c   : > { %7809 = vst [vmem:[#allocation35_spill] sm:$0xff] %v6946_v8 }
 0x626   : > { %v2859_v38 = vpop.f32.mrb[4].mxu1 }
 0x627   : > { %v6914_v5 = vadd.f32 %v2859_v38, %v6911_v37  ;;  %v5371_v28 = vpop.f32.mrb[5].mxu1 }
 0x628   : > { %v2862_v30 = vpop.f32.mrb[6].mxu1 }
 0x629   : > { %7798 = vst [vmem:[#allocation24_spill] sm:$0xff] %v6914_v5  ;;  %v6919_v6 = vadd.f32 %v2862_v30, %v6916_v39  ;;  %v5372_v45 = vpop.f32.mrb[7].mxu1 }
 0x62b   : > { %7799 = vst [vmem:[#allocation25_spill] sm:$0xff] %v6919_v6 }
 0x62e   : > { %v2947_v33 = vpop.f32.mrb[8].mxu1 }
 0x62f   : > { %v6924_v25 = vadd.f32 %v2947_v33, %v6921_v17  ;;  %v5383_v44 = vpop.f32.mrb[9].mxu1 }
 0x630   : > { %v2950_v51 = vpop.f32.mrb[10].mxu1  ;;  %v2903_v60 = vpop.f32.mrb[16].mxu0 }
 0x631   : > { %7801 = vst [vmem:[#allocation27_spill] sm:$0xff] %v6924_v25  ;;  %v6931_v22 = vadd.f32 %v2950_v51, %v6926_v49  ;;  %v5384_v61 = vpop.f32.mrb[11].mxu1  ;;  %v6934_v63 = vadd.f32 %v2903_v60, %v6928_v2  ;;  %v5377_v10 = vpop.f32.mrb[17].mxu0 }
 0x632   : > { %v2906_v23 = vpop.f32.mrb[18].mxu0 }
 0x633   : > { %7804 = vst [vmem:[#allocation30_spill] sm:$0xff] %v6931_v22  ;;  %7805 = vst [vmem:[#allocation31_spill] sm:$0xff] %v6934_v63  ;;  %v6939_v34 = vadd.f32 %v2906_v23, %v6936_v16  ;;  %v5378_v54 = vpop.f32.mrb[19].mxu0 }
 0x635   : > { %7806 = vst [vmem:[#allocation32_spill] sm:$0xff] %v6939_v34 }
 0x638   : > { %v2991_v12 = vpop.f32.mrb[20].mxu0 }
 0x639   : > { %v6944_v13 = vadd.f32 %v2991_v12, %v6941_v3  ;;  %v5389_v40 = vpop.f32.mrb[21].mxu0 }
 0x63a   : > { %v2994_v18 = vpop.f32.mrb[22].mxu0 }
 0x63b   : > { %7808 = vst [vmem:[#allocation34_spill] sm:$0xff] %v6944_v13  ;;  %v6949_v14 = vadd.f32 %v2994_v18, %v6946_v8  ;;  %v5390_v38 = vpop.f32.mrb[23].mxu0  ;;  %v3362_v42 = vpop.f32.mrb[12].mxu1 }
 0x63c   : > { %v5395_v28 = vpop.f32.mrb[13].mxu1  ;;  %v3501_v30 = vsel %vm2697_vm4, %v3362_v42, -inf }
 0x63d   : > { %7810 = vst [vmem:[#allocation36_spill] sm:$0xff] %v6949_v14  ;;  %v3365_v48 = vpop.f32.mrb[14].mxu1  ;;  %3502 = vmax.xlane.f32.xlu0 %v3501_v30  ;;  %v6971_v30 = vpop.permute.xlu1 %1287 }
 0x63e   : > { %v5396_v45 = vpop.f32.mrb[15].mxu1  ;;  %v3504_v59 = vsel %vm2697_vm4, %v3365_v48, -inf }
 0x63f   : > { %3505 = vmax.xlane.f32.xlu1 %v3504_v59  ;;  %v6977_v45 = vpop.permute.xlu0 %1285 }
 0x641   : > { %v6953_v46 = vpop.f32.mrb[24].mxu0 }
 0x642   : > { %v5401_v50 = vpop.f32.mrb[25].mxu0  ;;  %v3507_v33 = vsel %vm2697_vm4, %v6953_v46, -inf }
 0x643   : > { %v6957_v31 = vpop.f32.mrb[26].mxu0  ;;  %3508 = vmax.xlane.f32.xlu0 %v3507_v33  ;;  %v3450_v51 = vpop.f32.mrb[16].mxu1 }
 0x644   : > { %v5402_v44 = vpop.f32.mrb[27].mxu0  ;;  %v5407_v60 = vpop.f32.mrb[17].mxu1  ;;  %v3513_v61 = vsel %vm2697_vm4, %v3450_v51, -inf  ;;  %v3510_v12 = vsel %vm2697_vm4, %v6957_v31, -inf }
 0x645   : > { %v3453_v10 = vpop.f32.mrb[18].mxu1  ;;  %v6993_v50 = vpop.permute.xlu0 %1293 }
 0x646   : > { %v5408_v23 = vpop.f32.mrb[19].mxu1  ;;  %v3516_v54 = vsel %vm2697_vm4, %v3453_v10, -inf }
 0x647   : > { %3514 = vmax.xlane.f32.xlu0 %v3513_v61  ;;  %3517 = vmax.xlane.f32.xlu1 %v3516_v54 }
 0x649   : > { %v6961_v1 = vpop.f32.mrb[28].mxu0  ;;  %v6995_v44 = vpop.permute.xlu0 %1309 }
 0x64a   : > { %v5413_v35 = vpop.f32.mrb[29].mxu0  ;;  %v3519_v28 = vsel %vm2697_vm4, %v6961_v1, -inf }
 0x64b   : > { %v6965_v40 = vpop.f32.mrb[30].mxu0  ;;  %3511 = vmax.xlane.f32.xlu0 %v3510_v12 }
 0x64c   : > { %v5414_v18 = vpop.f32.mrb[31].mxu0  ;;  %v3522_v38 = vsel %vm2697_vm4, %v6965_v40, -inf }
 0x64d   : > { %3523 = vmax.xlane.f32.xlu1 %v3522_v38 }
 0x64f   : > { %3520 = vmax.xlane.f32.xlu0 %v3519_v28 }
 0x65e   : > { %1319 = vrot.lane.b32.xlu1 %v6971_v30, %s6054_s22 }
 0x662   : > { %1895 = vrot.lane.b32.xlu1 %v6359_v4, %s6055_s25  ;;  %v1296_v4 = vpop.permute.xlu1 %1295 }
 0x665   : > { %1317 = vrot.lane.b32.xlu0 %v6977_v45, %s6054_s22  ;;  %s5045_s22 = sshll.u32 %s498_s16, 4  ;;  %s7682_s22 = int_to_ptr.vmem [resolvable:$true] %s5045_s22 }
 0x666   : > { %1901 = vrot.lane.b32.xlu1 %v6782_v62, %s6055_s25  ;;  %v6991_v59 = vpop.permute.xlu1 %1301  ;;  %s5968_s17 = scalar_lea.vmem %s7682_s22, 512  ;;  %p5975_p6 = scmp.lt.s32.totalorder %s7682_s22, %s5973_s21 }
 0x667   : > { %p5969_p8 = scmp.ne.s32.totalorder %s7682_s22, %s5968_s17  ;;  %p5976_p9 = scmp.lt.s32.totalorder %s5974_s15, %s5968_s17 }
 0x669   : > { %1893 = vrot.lane.b32.xlu0 %v6357_v0, %s6055_s25  ;;  %p5977_p5 = por %p5976_p9, %p5975_p6 }
 0x66a   : > { %1903 = vrot.lane.b32.xlu1 %v6790_v9, %s6055_s25  ;;  %v1304_v33 = vpop.permute.xlu1 %1303 }
 0x66d   : > { %1909 = vrot.lane.b32.xlu0 %v6801_v56, %s6055_s25 }
 0x66e   : > { %1911 = vrot.lane.b32.xlu1 %v6822_v29, %s6055_s25  ;;  %v1312_v62 = vpop.permute.xlu1 %1311 }
 0x6ca   : > { %v3503_v60 = vpop.xlane.xlu0 %3502 }
 0x6cb   : > { %v6997_v0 = vmax.f32 %v3503_v60, -1e+30 }
 0x6cc   : > { %v3506_v61 = vpop.xlane.xlu1 %3505 }
 0x6cd   : > { %v3557_v9 = vsub.f32 %v3362_v42, %v6997_v0  ;;  %v7000_v23 = vmax.f32 %v3506_v61, -1e+30 }
 0x6cf   : > { %v3558_v56 = vsub.f32 %v3365_v48, %v7000_v23  ;;  %v3565_v54 = vmul.f32 1.442695, %v3557_v9 }
 0x6d0   : > { %v3509_v29 = vpop.xlane.xlu0 %3508 }
 0x6d1   : > { %v3567_v35 = vmul.f32 1.442695, %v3558_v56  ;;  %v7003_v12 = vmax.f32 %v3509_v29, -1e+30 }
 0x6d3   : > { %5712 = vpow2.f32 %v3567_v35  ;;  %v3559_v42 = vsub.f32 %v6953_v46, %v7003_v12 }
 0x6d4   : > { %v3515_v18 = vpop.xlane.xlu0 %3514  ;;  %5714 = vpow2.f32 %v3565_v54  ;;  %v3518_v28 = vpop.xlane.xlu1 %3517 }
 0x6d5   : > { %v7005_v38 = vmax.f32 %v3515_v18, -1e+30  ;;  %v7007_v60 = vmax.f32 %v3518_v28, -1e+30  ;;  %v1473_v28 = vcombine.low %v6993_v50, %v6995_v44  ;;  %v3569_v13 = vmul.f32 1.442695, %v3559_v42 }
 0x6d7   : > { %v3561_v15 = vsub.f32 %v3450_v51, %v7005_v38  ;;  %v3562_v48 = vsub.f32 %v3453_v10, %v7007_v60  ;;  %v1541_v51 = vcombine.low %v1296_v4, %v1312_v62 }
 0x6d8   : > { %v3512_v61 = vpop.xlane.xlu0 %3511 }
 0x6d9   : > { %v3573_v9 = vmul.f32 1.442695, %v3561_v15  ;;  %v7013_v56 = vmax.f32 %v3512_v61, -1e+30  ;;  %v3575_v29 = vmul.f32 1.442695, %v3562_v48  ;;  %v1542_v61 = vcombine.high %v1296_v4, %v1312_v62 }
 0x6da   : > { %v3524_v35 = vpop.xlane.xlu1 %3523 }
 0x6db   : > { %v3560_v54 = vsub.f32 %v6957_v31, %v7013_v56  ;;  %v7017_v18 = vmax.f32 %v3524_v35, -1e+30  ;;  %5716 = vpow2.f32 %v3573_v9  ;;  %v1474_v31 = vcombine.high %v6993_v50, %v6995_v44 }
 0x6dc   : > { %v3521_v25 = vpop.xlane.xlu0 %3520  ;;  %5718 = vpow2.f32 %v3575_v29  ;;  %v1556_v29 = vrot.slane %v1542_v61, %v6425_v32 }
 0x6dd   : > { %v3571_v46 = vmul.f32 1.442695, %v3560_v54  ;;  %v3564_v15 = vsub.f32 %v6965_v40, %v7017_v18  ;;  %v7023_v10 = vmax.f32 %v3521_v25, -1e+30  ;;  %v7025_v48 = vpop.eup %5712  ;;  %v1481_v40 = vrot.slane %v1473_v28, %v6425_v32 }
 0x6de   : > { %v1320_v35 = vpop.permute.xlu1 %1319  ;;  %v7029_v63 = vpop.eup %5714  ;;  %v1549_v25 = vrot.slane %v1541_v51, %v6425_v32  ;;  %v3592_v27 = vsel %vm2697_vm4, %v7025_v48, 0.0 }
 0x6df   : > { %5720 = vpow2.f32 %v3571_v46  ;;  %v3579_v42 = vmul.f32 1.442695, %v3564_v15  ;;  %v3563_v9 = vsub.f32 %v6961_v1, %v7023_v10  ;;  %v1557_v54 = vcombine.low %v1304_v33, %v1320_v35 }
 0x6e0   : > { %v1558_v14 = vcombine.high %v1304_v33, %v1320_v35  ;;  %v1318_v5 = vpop.permute.xlu0 %1317  ;;  %v3621_v50 = vpack.c.bf16 %v7025_v48, %v7029_v63  ;;  %5722 = vpow2.f32 %v3569_v13  ;;  %v7811_v13 = vmov 0.0  }
 0x6e1   : > { %v3577_v4 = vmul.f32 1.442695, %v3563_v9  ;;  %v1565_v44 = vrot.slane %v1557_v54, %v6425_v32  ;;  %v1489_v62 = vcombine.low %v6991_v59, %v1318_v5  ;;  %5724 = vpow2.f32 %v3579_v42 }
 0x6e2   : > { %v1572_v1 = vrot.slane %v1558_v14, %v6425_v32  ;;  %v1490_v28 = vcombine.high %v6991_v59, %v1318_v5  ;;  %5418 = vmatmul.mubr.msk.bf16.vlgmr.msra.gmra.mrb[20].mxu1 %vm2697_vm4, %v3621_v50  ;;  %v1488_v15 = vrot.slane %v1474_v31, %v6425_v32  ;;  %v3589_v19 = vsel %vm2697_vm4, %v7029_v63, 0.0 }
 0x6e3   : > { %5726 = vpow2.f32 %v3577_v4  ;;  %v1573_v33 = vcombine.low %v1549_v25, %v1565_v44  ;;  %v1574_v51 = vcombine.high %v1549_v25, %v1565_v44  ;;  %v1497_v46 = vrot.slane %v1489_v62, %v6425_v32  ;;  %5428 = vmatpush3.bf16.msra.mxu1 %v6658_v24  ;;  %5429 = vmatprep.mubr.msk.bf16.mxu1 %vm6057_vm1, %v7811_v13 }
 0x6e4   : > { %v1589_v61 = vcombine.low %v1556_v29, %v1572_v1  ;;  %v1590_v35 = vcombine.high %v1556_v29, %v1572_v1  ;;  %v1504_v14 = vrot.slane %v1490_v28, %v6425_v32  ;;  %5439 = vmatprep.subr.bf16.mxu1 %v7811_v13  ;;  %v2789_v63 = vsel %vm2697_vm4, %v6763_v36, 0.0 }
 0x6e5   : > { %v1581_v5 = vrot.slane %v1573_v33, %v6432_v47  ;;  %v1588_v59 = vrot.slane %v1574_v51, %v6432_v47  ;;  %v1505_v42 = vcombine.low %v1481_v40, %v1497_v46  ;;  %v1506_v9 = vcombine.high %v1481_v40, %v1497_v46  ;;  %v7054_v4 = vpop.eup %5716 }
 0x6e6   : > { %v1597_v54 = vrot.slane %v1589_v61, %v6432_v47  ;;  %v1604_v24 = vrot.slane %v1590_v35, %v6432_v47  ;;  %v1521_v25 = vcombine.low %v1488_v15, %v1504_v14  ;;  %v1522_v50 = vcombine.high %v1488_v15, %v1504_v14  ;;  %v7058_v1 = vpop.eup %5718 }
 0x6e7   : > { %v1813_v31 = vcombine.low %v1581_v5, %v1588_v59  ;;  %v5195_v44 = vcombine.high %v1581_v5, %v1588_v59  ;;  %v1513_v62 = vrot.slane %v1505_v42, %v6432_v47  ;;  %v1520_v29 = vrot.slane %v1506_v9, %v6432_v47 }
 0x6e8   : > { %v1829_v28 = vcombine.low %v1597_v54, %v1604_v24  ;;  %v5196_v33 = vcombine.high %v1597_v54, %v1604_v24  ;;  %v1529_v40 = vrot.slane %v1521_v25, %v6432_v47  ;;  %v1536_v51 = vrot.slane %v1522_v50, %v6432_v47 }
 0x6e9   : > { %v7062_v46 = vpop.eup %5720  ;;  %v1820_v15 = vrot.slane %v1813_v31, %v6425_v32  ;;  %v1828_v61 = vrot.slane %v5195_v44, %v6425_v32  ;;  %v1745_v35 = vcombine.low %v1513_v62, %v1520_v29  ;;  %v5193_v14 = vcombine.high %v1513_v62, %v1520_v29 }
 0x6ea   : > { %v1836_v5 = vrot.slane %v1829_v28, %v6425_v32  ;;  %v1844_v59 = vrot.slane %v5196_v33, %v6425_v32  ;;  %v1761_v42 = vcombine.low %v1529_v40, %v1536_v51  ;;  %v5194_v9 = vcombine.high %v1529_v40, %v1536_v51  ;;  %v7068_v3 = vpop.eup %5722 }
 0x6eb   : > { %v1752_v54 = vrot.slane %v1745_v35, %v6425_v32  ;;  %v1760_v24 = vrot.slane %v5193_v14, %v6425_v32  ;;  %v7072_v25 = vpop.eup %5724  ;;  %v3623_v44 = vpack.c.bf16 %v7058_v1, %v7054_v4  ;;  %v3622_v62 = vpack.c.bf16 %v7062_v46, %v7068_v3 }
 0x6ec   : > { %v1768_v50 = vrot.slane %v1761_v42, %v6425_v32  ;;  %v1776_v31 = vrot.slane %v5194_v9, %v6425_v32  ;;  %v1845_v33 = vcombine.low %v1820_v15, %v1828_v61  ;;  %v1861_v35 = vcombine.low %v1836_v5, %v1844_v59 }
 0x6ed   : > { %v7080_v29 = vpop.eup %5726  ;;  %v1777_v28 = vcombine.low %v1752_v54, %v1760_v24  ;;  %5430 = vmatmul.mubr.msk.bf16.vlgmr.msra.gmra.mrb[24].mxu1 %vm2697_vm4, %v3623_v44  ;;  %5424 = vmatmul.mubr.msk.bf16.vlgmr.msra.gmra.mrb[32].mxu0 %vm2697_vm4, %v3622_v62  ;;  %v1778_v62 = vcombine.high %v1752_v54, %v1760_v24  ;;  %v1846_v8 = vcombine.high %v1820_v15, %v1828_v61  ;;  %v3601_v48 = vsel %vm2697_vm4, %v7054_v4, 0.0 }
 0x6ee   : > { %v3624_v40 = vpack.c.bf16 %v7072_v25, %v7080_v29  ;;  %v1793_v51 = vcombine.low %v1768_v50, %v1776_v31  ;;  %5434 = vmatpush3.bf16.msra.mxu0 %v6660_v26  ;;  %5435 = vmatprep.mubr.msk.bf16.mxu0 %vm6057_vm1, %v7811_v13  ;;  %v1853_v9 = vrot.slane %v1845_v33, %v6432_v47  ;;  %v2786_v36 = vsel %vm2697_vm4, %v6765_v55, 0.0 }
 0x6ef   : > { %v1785_v14 = vrot.slane %v1777_v28, %v6432_v47  ;;  %5445 = vmatprep.subr.bf16.mxu0 %v7811_v13  ;;  %v1869_v44 = vrot.slane %v1861_v35, %v6432_v47  ;;  %5441 = vmatprep.mubr.msk.bf16.mxu1 %vm6057_vm1, %v7811_v13  ;;  %v1794_v22 = vcombine.high %v1768_v50, %v1776_v31  ;;  %v2807_v4 = vsel %vm2697_vm4, %v6844_v43, 0.0 }
 0x6f0   : > { %v1801_v42 = vrot.slane %v1793_v51, %v6432_v47  ;;  %v1792_v6 = vrot.slane %v1778_v62, %v6432_v47  ;;  %v1862_v37 = vcombine.high %v1836_v5, %v1844_v59  ;;  %v1860_v33 = vrot.slane %v1846_v8, %v6432_v47 }
 0x6f1   : > { %v1877_v26 = vcombine.low %v1853_v9, %v1869_v44  ;;  %v1878_v2 = vcombine.high %v1853_v9, %v1869_v44  ;;  %v1808_v28 = vrot.slane %v1794_v22, %v6432_v47  ;;  %v3533_v55 = vsub.f32 -1e+30, %v6997_v0 }
 0x6f2   : > { %v1809_v17 = vcombine.low %v1785_v14, %v1801_v42  ;;  %v1810_v34 = vcombine.high %v1785_v14, %v1801_v42  ;;  %v1876_v35 = vrot.slane %v1862_v37, %v6432_v47  ;;  %v3535_v43 = vsub.f32 -1e+30, %v7003_v12 }
 0x6f3   : > { %v1811_v50 = vcombine.low %v1792_v6, %v1808_v28  ;;  %v1812_v22 = vcombine.high %v1792_v6, %v1808_v28 }
 0x6f4   : > { %v1882_v51 = vpack.c.bf16 %v1877_v26, %v1809_v17  ;;  %v1884_v49 = vpack.c.bf16 %v1878_v2, %v1810_v34  ;;  %v1879_v17 = vcombine.low %v1860_v33, %v1876_v35  ;;  %v1880_v2 = vcombine.high %v1860_v33, %v1876_v35 }
 0x6f5   : > { %5436 = vmatmul.mubr.msk.bf16.vlgmr.msra.gmra.mrb[36].mxu0 %vm2697_vm4, %v3624_v40 }
 0x6f6   : > { %v3810_v54 = vsel %vm2496_vm2, %v1882_v51, 0  ;;  %v3854_v24 = vsel %vm2496_vm2, %v1884_v49, 0  ;;  %5447 = vmatprep.mubr.msk.bf16.mxu0 %vm6057_vm1, %v7811_v13  ;;  %v1886_v37 = vpack.c.bf16 %v1879_v17, %v1811_v50  ;;  %v1888_v34 = vpack.c.bf16 %v1880_v2, %v1812_v22 }
 0x6f7   : > { %5440 = vmatpush3.bf16.xpose.msra.mxu1 %v3810_v54  ;;  %5446 = vmatpush3.bf16.xpose.msra.mxu0 %v3854_v24 }
 0x6f8   : > { %5451 = vmatprep.subr.bf16.mxu1 %v7811_v13  ;;  %5457 = vmatprep.subr.bf16.mxu0 %v7811_v13  ;;  %v3898_v49 = vsel %vm2496_vm2, %v1886_v37, 0  ;;  %v3942_v6 = vsel %vm2496_vm2, %v1888_v34, 0 }
 0x6fe   : > { %5442 = vmatmul.mubr.msk.bf16.vlgmr.msra.gmra.mrb[28].mxu1 %vm2496_vm2, %v6860_v21  ;;  %5448 = vmatmul.mubr.msk.bf16.vlgmr.msra.gmra.mrb[40].mxu0 %vm2496_vm2, %v6871_v7 }
 0x6ff   : > { %5452 = vmatpush3.bf16.xpose.msra.mxu1 %v3898_v49  ;;  %5458 = vmatpush3.bf16.xpose.msra.mxu0 %v3942_v6 }
 0x700   : > { %5453 = vmatprep.mubr.msk.bf16.mxu1 %vm6057_vm1, %v7811_v13  ;;  %5459 = vmatprep.mubr.msk.bf16.mxu0 %vm6057_vm1, %v7811_v13 }
 0x701   : > { %5463 = vmatprep.subr.bf16.mxu1 %v7811_v13  ;;  %5469 = vmatprep.subr.bf16.mxu0 %v7811_v13 }
 0x706   : > { %5454 = vmatmul.mubr.msk.bf16.vlgmr.msra.gmra.mrb[32].mxu1 %vm2496_vm2, %v6876_v52  ;;  %5460 = vmatmul.mubr.msk.bf16.vlgmr.msra.gmra.mrb[44].mxu0 %vm2496_vm2, %v6887_v41 }
 0x707   : > { %5465 = vmatprep.mubr.msk.bf16.mxu1 %vm6057_vm1, %v7811_v13  ;;  %5471 = vmatprep.mubr.msk.bf16.mxu0 %vm6057_vm1, %v7811_v13 }
 0x7b5   : > { %v7127_v21 = vpop.f32.mrb[20].mxu1 }
 0x7b6   : > { %v5419_v7 = vpop.f32.mrb[21].mxu1 }
 0x7b7   : > { %v7129_v8 = vpop.f32.mrb[22].mxu1 }
 0x7b8   : > { %v5420_v15 = vpop.f32.mrb[23].mxu1 }
 0x7c0   : > { %v7131_v61 = vpop.f32.mrb[24].mxu1  ;;  %v7133_v5 = vpop.f32.mrb[32].mxu0 }
 0x7c1   : > { %v5431_v52 = vpop.f32.mrb[25].mxu1  ;;  %v5425_v59 = vpop.f32.mrb[33].mxu0 }
 0x7c2   : > { %v7135_v31 = vpop.f32.mrb[26].mxu1  ;;  %v7137_v41 = vpop.f32.mrb[34].mxu0 }
 0x7c3   : > { %v5432_v40 = vpop.f32.mrb[27].mxu1  ;;  %v5426_v14 = vpop.f32.mrb[35].mxu0 }
 0x7c8   : > { %v7139_v42 = vpop.f32.mrb[36].mxu0 }
 0x7c9   : > { %v5437_v9 = vpop.f32.mrb[37].mxu0 }
 0x7ca   : > { %v7141_v44 = vpop.f32.mrb[38].mxu0 }
 0x7cb   : > { %v5438_v62 = vpop.f32.mrb[39].mxu0 }
 0x7d1   : > { %v3846_v26 = vpop.f32.mrb[28].mxu1  ;;  %v3890_v51 = vpop.f32.mrb[40].mxu0 }
 0x7d2   : > { %v7145_v28 = vsel %vm6671_vm3, %v3846_v26, -1e+30  ;;  %v5443_v33 = vpop.f32.mrb[29].mxu1  ;;  %v5449_v35 = vpop.f32.mrb[41].mxu0  ;;  %v7151_v50 = vsel %vm6671_vm3, %v3890_v51, -1e+30 }
 0x7d3   : > { %v3849_v54 = vpop.f32.mrb[30].mxu1  ;;  %v3993_v24 = vsel %vm2697_vm4, %v7145_v28, -inf  ;;  %v3893_v17 = vpop.f32.mrb[42].mxu0  ;;  %v3999_v49 = vsel %vm2697_vm4, %v7151_v50, -inf }
 0x7d4   : > { %v7155_v22 = vsel %vm6675_vm5, %v3849_v54, -1e+30  ;;  %3994 = vmax.xlane.f32.xlu0 %v3993_v24  ;;  %v5444_v2 = vpop.f32.mrb[31].mxu1  ;;  %v5450_v37 = vpop.f32.mrb[43].mxu0  ;;  %v7169_v9 = vsel %vm6675_vm5, %v3893_v17, -1e+30 }
 0x7d5   : > { %v3996_v34 = vsel %vm2697_vm4, %v7155_v22, -inf  ;;  %v4002_v24 = vsel %vm2697_vm4, %v7169_v9, -inf }
 0x7d6   : > { %3997 = vmax.xlane.f32.xlu1 %v3996_v34  ;;  %v3604_v34 = vsel %vm2697_vm4, %v7058_v1, 0.0  ;;  %v3607_v1 = vsel %vm2697_vm4, %v7080_v29, 0.0  ;;  %v7227_v29 = vpop.permute.xlu1 %1895 }
 0x7d8   : > { %4000 = vmax.xlane.f32.xlu0 %v3999_v49  ;;  %v3595_v49 = vsel %vm2697_vm4, %v7068_v3, 0.0  ;;  %v2795_v3 = vsel %vm2697_vm4, %v6810_v53, 0.0  ;;  %v2792_v53 = vsel %vm2697_vm4, %v6816_v20, 0.0  ;;  %v3537_v20 = vsub.f32 -1e+30, %v7005_v38 }
 0x7d9   : > { %v3934_v6 = vpop.f32.mrb[32].mxu1  ;;  %v3978_v15 = vpop.f32.mrb[44].mxu0 }
 0x7da   : > { %v7163_v7 = vsel %vm6671_vm3, %v3934_v6, -1e+30  ;;  %v5455_v52 = vpop.f32.mrb[33].mxu1  ;;  %v5461_v59 = vpop.f32.mrb[45].mxu0  ;;  %v7185_v17 = vsel %vm6671_vm3, %v3978_v15, -1e+30 }
 0x7db   : > { %v3937_v40 = vpop.f32.mrb[34].mxu1  ;;  %v4005_v14 = vsel %vm2697_vm4, %v7163_v7, -inf  ;;  %v3981_v26 = vpop.f32.mrb[46].mxu0  ;;  %v4011_v37 = vsel %vm2697_vm4, %v7185_v17, -inf  ;;  %v3534_v6 = vsub.f32 -1e+30, %v7000_v23 }
 0x7dc   : > { %v7173_v62 = vsel %vm6675_vm5, %v3937_v40, -1e+30  ;;  %4006 = vmax.xlane.f32.xlu0 %v4005_v14  ;;  %v5456_v51 = vpop.f32.mrb[35].mxu1  ;;  %v5462_v33 = vpop.f32.mrb[47].mxu0  ;;  %v7179_v54 = vsel %vm6675_vm5, %v3981_v26, -1e+30 }
 0x7dd   : > { %v4008_v35 = vsel %vm2697_vm4, %v7173_v62, -inf  ;;  %v4014_v2 = vsel %vm2697_vm4, %v7179_v54, -inf  ;;  %v3541_v15 = vmul.f32 1.442695, %v3533_v55  ;;  %v7233_v52 = vpop.permute.xlu1 %1901  ;;  %v3543_v59 = vmul.f32 1.442695, %v3534_v6  ;;  %v1894_v26 = vpop.permute.xlu0 %1893 }
 0x7de   : > { %4009 = vmax.xlane.f32.xlu1 %v4008_v35  ;;  %v3545_v40 = vmul.f32 1.442695, %v3535_v43  ;;  %v3549_v14 = vmul.f32 1.442695, %v3537_v20  ;;  %v3539_v33 = vsub.f32 -1e+30, %v7023_v10 }
 0x7df   : > { %5728 = vpow2.f32 %v3541_v15 }
 0x7e0   : > { %4003 = vmax.xlane.f32.xlu0 %v4002_v24  ;;  %5730 = vpow2.f32 %v3543_v59 }
 0x7e1   : > { %5732 = vpow2.f32 %v3545_v40  ;;  %v7238_v35 = vpop.permute.xlu1 %1903 }
 0x7e2   : > { %4015 = vmax.xlane.f32.xlu1 %v4014_v2  ;;  %5734 = vpow2.f32 %v3549_v14  ;;  %v3553_v2 = vmul.f32 1.442695, %v3539_v33 }
 0x7e4   : > { %4012 = vmax.xlane.f32.xlu0 %v4011_v37  ;;  %v1910_v37 = vpop.permute.xlu0 %1909 }
 0x7f3   : > { %1919 = vrot.lane.b32.xlu1 %v6971_v30, %s6055_s25  ;;  %v3610_v30 = vsel %vm2697_vm4, %v7072_v25, 0.0  ;;  %v2798_v25 = vsel %vm2697_vm4, %v6803_v57, 0.0  ;;  %v3538_v57 = vsub.f32 -1e+30, %v7007_v60 }
 0x7f5   : > { %v3551_v51 = vmul.f32 1.442695, %v3538_v57 }
 0x7f7   : > { %5736 = vpow2.f32 %v3551_v51 }
 0x7fa   : > { %1917 = vrot.lane.b32.xlu0 %v6977_v45, %s6055_s25  ;;  %v3598_v45 = vsel %vm2697_vm4, %v7062_v46, 0.0  ;;  %v2801_v46 = vsel %vm2697_vm4, %v6795_v11, 0.0  ;;  %v2804_v11 = vsel %vm2697_vm4, %v6837_v58, 0.0  ;;  %v3536_v58 = vsub.f32 -1e+30, %v7013_v56  ;;  %s7827_s25 = sld [smem:[#allocation21_spill]] }
 0x7fc   : > { %v3547_v24 = vmul.f32 1.442695, %v3536_v58 }
 0x7fe   : > { %5738 = vpow2.f32 %v3547_v24 }
 0x7ff   : > { %5740 = vpow2.f32 %v3553_v2 }
 0x800   : > { %p7829_p11 = scmp.ne.s32.totalorder %s7827_s25, 0 }
 0x802   : > { %p5970_p13 = pnand %p5969_p8, %p7829_p11 }
 0x804   : > { %p5971_p1 = pneg %p5970_p13 }
 0x806   : > { %p5978_p10 = pnand %p5977_p5, %p5971_p1 }
 0x817   : > { %3593 = vadd.xlane.f32.xlu1 %v3592_v27  ;;  %v1912_v27 = vpop.permute.xlu1 %1911 }
 0x818   : > { %v2141_v55 = vcombine.low %v7227_v29, %v1912_v27 }
 0x819   : > { %3590 = vadd.xlane.f32.xlu0 %v3589_v19  ;;  %v5729_v19 = vpop.eup %5728 }
 0x81b   : > { %3605 = vadd.xlane.f32.xlu1 %v3604_v34  ;;  %v5731_v34 = vpop.eup %5730 }
 0x81c   : > { %v7248_v6 = vmul.f32 0.0, %v5731_v34 }
 0x81d   : > { %3596 = vadd.xlane.f32.xlu0 %v3595_v49  ;;  %v3540_v49 = vsub.f32 -1e+30, %v7017_v18 }
 0x81f   : > { %3611 = vadd.xlane.f32.xlu1 %v3610_v30  ;;  %v3555_v15 = vmul.f32 1.442695, %v3540_v49  ;;  %v7269_v49 = vrot.slane %v2141_v55, %v6425_v32 }
 0x821   : > { %3599 = vadd.xlane.f32.xlu0 %v3598_v45  ;;  %v5733_v45 = vpop.eup %5732 }
 0x822   : > { %v7250_v43 = vmul.f32 0.0, %v5733_v45 }
 0x823   : > { %2790 = vadd.xlane.f32.xlu1 %v2789_v63 }
 0x824   : > { %v7295_v55 = vadd.f32 %v7133_v5, %v7250_v43 }
 0x825   : > { %3602 = vadd.xlane.f32.xlu0 %v3601_v48  ;;  %v2073_v48 = vcombine.low %v1894_v26, %v1910_v37 }
 0x827   : > { %2796 = vadd.xlane.f32.xlu1 %v2795_v3  ;;  %v2074_v3 = vcombine.high %v1894_v26, %v1910_v37  ;;  %v2142_v26 = vcombine.high %v7227_v29, %v1912_v27 }
 0x829   : > { %3608 = vadd.xlane.f32.xlu0 %v3607_v1  ;;  %v7258_v14 = vrot.slane %v2074_v3, %v6425_v32 }
 0x82b   : > { %2802 = vadd.xlane.f32.xlu1 %v2801_v46  ;;  %v5735_v46 = vpop.eup %5734 }
 0x82c   : > { %v7262_v33 = vmul.f32 0.0, %v5735_v46 }
 0x82d   : > { %2787 = vadd.xlane.f32.xlu0 %v2786_v36  ;;  %v7242_v36 = vmul.f32 0.0, %v5729_v19 }
 0x82f   : > { %2808 = vadd.xlane.f32.xlu1 %v2807_v4  ;;  %v3801_v46 = vadd.f32 %v7127_v21, %v7242_v36 }
 0x831   : > { %2793 = vadd.xlane.f32.xlu0 %v2792_v53 }
 0x835   : > { %2799 = vadd.xlane.f32.xlu0 %v2798_v25 }
 0x839   : > { %2805 = vadd.xlane.f32.xlu0 %v2804_v11  ;;  %v5737_v11 = vpop.eup %5736 }
 0x83a   : > { %v7264_v24 = vmul.f32 0.0, %v5737_v11 }
 0x861   : > { %v3995_v30 = vpop.xlane.xlu0 %3994 }
 0x862   : > { %v4017_v63 = vmax.f32 %v6997_v0, %v3995_v30  ;;  %v7275_v30 = vrot.slane %v2142_v26, %v6425_v32 }
 0x863   : > { %v3998_v1 = vpop.xlane.xlu1 %3997 }
 0x864   : > { %v4025_v4 = vsub.f32 %v6997_v0, %v4017_v63  ;;  %v4049_v53 = vsub.f32 %v7145_v28, %v4017_v63  ;;  %v4018_v25 = vmax.f32 %v7000_v23, %v3998_v1  ;;  %v5739_v0 = vpop.eup %5738  ;;  %v7255_v28 = vrot.slane %v2073_v48, %v6425_v32 }
 0x865   : > { %v4001_v20 = vpop.xlane.xlu0 %4000  ;;  %v7271_v29 = vmul.f32 0.0, %v5739_v0 }
 0x866   : > { %v4033_v59 = vmul.f32 1.442695, %v4025_v4  ;;  %v4057_v57 = vmul.f32 1.442695, %v4049_v53  ;;  %v4026_v40 = vsub.f32 %v7000_v23, %v4018_v25  ;;  %v4050_v58 = vsub.f32 %v7155_v22, %v4018_v25  ;;  %v5741_v23 = vpop.eup %5740 }
 0x867   : > { %v4019_v51 = vmax.f32 %v7003_v12, %v4001_v20  ;;  %v7277_v3 = vmul.f32 0.0, %v5741_v23  ;;  %v7286_v4 = vadd.f32 %v7129_v8, %v7248_v6  ;;  %v7290_v53 = vadd.f32 %v7131_v61, %v7262_v33 }
 0x868   : > { %5742 = vpow2.f32 %v4033_v59  ;;  %v4059_v2 = vmul.f32 1.442695, %v4050_v58  ;;  %v4035_v22 = vmul.f32 1.442695, %v4026_v40  ;;  %v7301_v61 = vadd.f32 %v7135_v31, %v7264_v24 }
 0x869   : > { %5744 = vpow2.f32 %v4057_v57  ;;  %v4027_v37 = vsub.f32 %v7003_v12, %v4019_v51  ;;  %v4051_v19 = vsub.f32 %v7151_v50, %v4019_v51  ;;  %v4007_v34 = vpop.xlane.xlu0 %4006 }
 0x86a   : > { %5746 = vpow2.f32 %v3555_v15  ;;  %v4021_v27 = vmax.f32 %v7005_v38, %v4007_v34 }
 0x86b   : > { %5748 = vpow2.f32 %v4059_v2  ;;  %v4037_v45 = vmul.f32 1.442695, %v4027_v37  ;;  %v4061_v63 = vmul.f32 1.442695, %v4051_v19  ;;  %v4010_v48 = vpop.xlane.xlu1 %4009 }
 0x86c   : > { %v4029_v12 = vsub.f32 %v7005_v38, %v4021_v27  ;;  %v4053_v50 = vsub.f32 %v7163_v7, %v4021_v27  ;;  %v4022_v1 = vmax.f32 %v7007_v60, %v4010_v48  ;;  %5750 = vpow2.f32 %v4035_v22 }
 0x86d   : > { %v4004_v25 = vpop.xlane.xlu0 %4003  ;;  %5752 = vpow2.f32 %v4037_v45 }
 0x86e   : > { %v4041_v11 = vmul.f32 1.442695, %v4029_v12  ;;  %v4065_v38 = vmul.f32 1.442695, %v4053_v50  ;;  %v4030_v7 = vsub.f32 %v7007_v60, %v4022_v1  ;;  %5754 = vpow2.f32 %v4061_v63 }
 0x86f   : > { %v4054_v21 = vsub.f32 %v7173_v62, %v4022_v1  ;;  %v4020_v8 = vmax.f32 %v7013_v56, %v4004_v25  ;;  %v4016_v15 = vpop.xlane.xlu1 %4015  ;;  %v7336_v25 = vadd.f32 %v7137_v41, %v7271_v29 }
 0x870   : > { %5756 = vpow2.f32 %v4041_v11  ;;  %v4043_v20 = vmul.f32 1.442695, %v4030_v7  ;;  %v4024_v59 = vmax.f32 %v7017_v18, %v4016_v15 }
 0x871   : > { %5758 = vpow2.f32 %v4065_v38  ;;  %v4067_v60 = vmul.f32 1.442695, %v4054_v21  ;;  %v4028_v57 = vsub.f32 %v7013_v56, %v4020_v8  ;;  %v4052_v5 = vsub.f32 %v7169_v9, %v4020_v8  ;;  %v4013_v40 = vpop.xlane.xlu0 %4012 }
 0x872   : > { %v7306_v58 = vpop.eup %5742  ;;  %5760 = vpow2.f32 %v4043_v20  ;;  %v4032_v62 = vsub.f32 %v7017_v18, %v4024_v59  ;;  %v4056_v0 = vsub.f32 %v7179_v54, %v4024_v59  ;;  %v4023_v31 = vmax.f32 %v7023_v10, %v4013_v40 }
 0x873   : > { %v7311_v26 = vpop.eup %5744  ;;  %5762 = vpow2.f32 %v4067_v60  ;;  %v4039_v51 = vmul.f32 1.442695, %v4028_v57  ;;  %v4063_v2 = vmul.f32 1.442695, %v4052_v5  ;;  %v1920_v23 = vpop.permute.xlu1 %1919  ;;  %v7314_v56 = vmul.f32 %v7306_v58, %v3801_v46 }
 0x874   : > { %v7316_v9 = vpop.eup %5746  ;;  %v4047_v22 = vmul.f32 1.442695, %v4032_v62  ;;  %v4071_v37 = vmul.f32 1.442695, %v4056_v0  ;;  %v4031_v19 = vsub.f32 %v7023_v10, %v4023_v31  ;;  %v4055_v18 = vsub.f32 %v7185_v17, %v4023_v31 }
 0x875   : > { %v7320_v54 = vpop.eup %5748  ;;  %5764 = vpow2.f32 %v4039_v51  ;;  %v2157_v34 = vcombine.low %v7238_v35, %v1920_v23  ;;  %v2158_v27 = vcombine.high %v7238_v35, %v1920_v23  ;;  %v4081_v45 = vsel %vm2697_vm4, %v7311_v26, 0.0  ;;  %v1918_v63 = vpop.permute.xlu0 %1917 }
 0x876   : > { %5766 = vpow2.f32 %v4063_v2  ;;  %v4045_v48 = vmul.f32 1.442695, %v4031_v19  ;;  %v4069_v12 = vmul.f32 1.442695, %v4055_v18  ;;  %4082 = vadd.xlane.f32.xlu0 %v4081_v45  ;;  %v2089_v50 = vcombine.low %v7233_v52, %v1918_v63  ;;  %v7327_v10 = vpop.eup %5750 }
 0x877   : > { %5768 = vpow2.f32 %v4047_v22  ;;  %v2165_v17 = vrot.slane %v2157_v34, %v6425_v32  ;;  %v2172_v1 = vrot.slane %v2158_v27, %v6425_v32  ;;  %v2090_v46 = vcombine.high %v7233_v52, %v1918_v63  ;;  %v7332_v35 = vpop.eup %5752 }
 0x878   : > { %5770 = vpow2.f32 %v4071_v37  ;;  %v2097_v11 = vrot.slane %v2089_v50, %v6425_v32  ;;  %v4084_v38 = vsel %vm2697_vm4, %v7320_v54, 0.0  ;;  %v7341_v7 = vpop.eup %5754 }
 0x879   : > { %5772 = vpow2.f32 %v4045_v48  ;;  %v2173_v21 = vcombine.low %v7269_v49, %v2165_v17  ;;  %v2174_v8 = vcombine.high %v7269_v49, %v2165_v17  ;;  %v2189_v52 = vcombine.low %v7275_v30, %v2172_v1  ;;  %4085 = vadd.xlane.f32.xlu1 %v4084_v38 }
 0x87a   : > { %v7346_v15 = vpop.eup %5756  ;;  %5774 = vpow2.f32 %v4069_v12  ;;  %v2190_v41 = vcombine.high %v7275_v30, %v2172_v1  ;;  %v2104_v20 = vrot.slane %v2090_v46, %v6425_v32  ;;  %v2105_v59 = vcombine.low %v7255_v28, %v2097_v11 }
 0x87b   : > { %v7351_v60 = vpop.eup %5758  ;;  %v2181_v57 = vrot.slane %v2173_v21, %v6432_v47  ;;  %v2188_v5 = vrot.slane %v2174_v8, %v6432_v47  ;;  %v2197_v49 = vrot.slane %v2189_v52, %v6432_v47  ;;  %v2106_v40 = vcombine.high %v7255_v28, %v2097_v11 }
 0x87c   : > { %v7357_v62 = vpop.eup %5760  ;;  %v2204_v0 = vrot.slane %v2190_v41, %v6432_v47  ;;  %v2113_v30 = vrot.slane %v2105_v59, %v6432_v47  ;;  %v2121_v31 = vcombine.low %v7258_v14, %v2104_v20  ;;  %v2122_v51 = vcombine.high %v7258_v14, %v2104_v20 }
 0x87d   : > { %v7363_v2 = vpop.eup %5762  ;;  %v2413_v23 = vcombine.low %v2181_v57, %v2188_v5  ;;  %v5203_v22 = vcombine.high %v2181_v57, %v2188_v5  ;;  %v2120_v37 = vrot.slane %v2106_v40, %v6432_v47  ;;  %v4087_v19 = vsel %vm2697_vm4, %v7341_v7, 0.0 }
 0x87e   : > { %v2429_v28 = vcombine.low %v2197_v49, %v2204_v0  ;;  %v5204_v18 = vcombine.high %v2197_v49, %v2204_v0  ;;  %v2129_v34 = vrot.slane %v2121_v31, %v6432_v47  ;;  %v2136_v27 = vrot.slane %v2122_v51, %v6432_v47  ;;  %4088 = vadd.xlane.f32.xlu0 %v4087_v19 }
 0x87f   : > { %v7370_v45 = vpop.eup %5764  ;;  %v2420_v14 = vrot.slane %v2413_v23, %v6425_v32  ;;  %v2428_v63 = vrot.slane %v5203_v22, %v6425_v32  ;;  %v2345_v48 = vcombine.low %v2113_v30, %v2120_v37  ;;  %v5201_v12 = vcombine.high %v2113_v30, %v2120_v37 }
 0x880   : > { %v7374_v50 = vpop.eup %5766  ;;  %v2436_v17 = vrot.slane %v2429_v28, %v6425_v32  ;;  %v2444_v1 = vrot.slane %v5204_v18, %v6425_v32  ;;  %v2361_v46 = vcombine.low %v2129_v34, %v2136_v27  ;;  %v5202_v11 = vcombine.high %v2129_v34, %v2136_v27 }
 0x881   : > { %v7378_v38 = vpop.eup %5768  ;;  %v2352_v21 = vrot.slane %v2345_v48, %v6425_v32  ;;  %v2360_v8 = vrot.slane %v5201_v12, %v6425_v32  ;;  %v4093_v52 = vsel %vm2697_vm4, %v7351_v60, 0.0  ;;  %v4090_v41 = vsel %vm2697_vm4, %v7374_v50, 0.0 }
 0x882   : > { %v7386_v20 = vpop.eup %5770  ;;  %v7389_v59 = vmul.f32 0.0, %v7316_v9  ;;  %v2368_v57 = vrot.slane %v2361_v46, %v6425_v32  ;;  %v2376_v5 = vrot.slane %v5202_v11, %v6425_v32  ;;  %4094 = vadd.xlane.f32.xlu0 %v4093_v52  ;;  %4091 = vadd.xlane.f32.xlu1 %v4090_v41  ;;  %v2445_v49 = vcombine.low %v2420_v14, %v2428_v63 }
 0x883   : > { %v7393_v40 = vpop.eup %5772  ;;  %v3807_v0 = vadd.f32 %v7139_v42, %v7277_v3  ;;  %v4096_v30 = vsel %vm2697_vm4, %v7363_v2, 0.0  ;;  %v2377_v31 = vcombine.low %v2352_v21, %v2360_v8  ;;  %v2461_v51 = vcombine.low %v2436_v17, %v2444_v1 }
 0x884   : > { %v5775_v23 = vpop.eup %5774  ;;  %v2393_v9 = vcombine.low %v2368_v57, %v2376_v5  ;;  %v2453_v22 = vrot.slane %v2445_v49, %v6432_v47  ;;  %v2378_v37 = vcombine.high %v2352_v21, %v2360_v8  ;;  %v2394_v19 = vcombine.high %v2368_v57, %v2376_v5 }
 0x885   : > { %v4099_v28 = vsel %vm2697_vm4, %v5775_v23, 0.0  ;;  %v2385_v18 = vrot.slane %v2377_v31, %v6432_v47  ;;  %v2469_v34 = vrot.slane %v2461_v51, %v6432_v47  ;;  %v2446_v27 = vcombine.high %v2420_v14, %v2428_v63 }
 0x886   : > { %4097 = vadd.xlane.f32.xlu1 %v4096_v30  ;;  %4100 = vadd.xlane.f32.xlu0 %v4099_v28  ;;  %v2401_v42 = vrot.slane %v2393_v9, %v6432_v47  ;;  %v2392_v48 = vrot.slane %v2378_v37, %v6432_v47  ;;  %v2408_v12 = vrot.slane %v2394_v19, %v6432_v47  ;;  %v4102_v11 = vsel %vm2697_vm4, %v7386_v20, 0.0 }
 0x887   : > { %v3808_v46 = vadd.f32 %v7141_v44, %v7389_v59  ;;  %v2460_v21 = vrot.slane %v2446_v27, %v6432_v47  ;;  %v2462_v8 = vcombine.high %v2436_v17, %v2444_v1  ;;  %v2477_v41 = vcombine.low %v2453_v22, %v2469_v34 }
 0x888   : > { %v2409_v52 = vcombine.low %v2385_v18, %v2401_v42  ;;  %v2410_v14 = vcombine.high %v2385_v18, %v2401_v42  ;;  %v2478_v63 = vcombine.high %v2453_v22, %v2469_v34  ;;  %v2411_v57 = vcombine.low %v2392_v48, %v2408_v12 }
 0x889   : > { %v2476_v5 = vrot.slane %v2462_v8, %v6432_v47  ;;  %v2412_v49 = vcombine.high %v2392_v48, %v2408_v12  ;;  %v7414_v30 = vmul.f32 %v7332_v35, %v7295_v55  ;;  %v7418_v51 = vmul.f32 %v7327_v10, %v7286_v4 }
 0x88a   : > { %4103 = vadd.xlane.f32.xlu1 %v4102_v11  ;;  %v2482_v44 = vpack.c.bf16 %v2477_v41, %v2409_v52  ;;  %v2484_v31 = vpack.c.bf16 %v2478_v63, %v2410_v14  ;;  %v7422_v17 = vmul.f32 %v7370_v45, %v7336_v25  ;;  %v7426_v9 = vmul.f32 %v7346_v15, %v7290_v53  ;;  %v7813_v52 = vld [vmem:[#allocation23_spill] sm:$0xff]  ;;  %v7815_v63 = vld [vmem:[#allocation25_spill] sm:$0xff] }
 0x88b   : > { %v2479_v1 = vcombine.low %v2460_v21, %v2476_v5  ;;  %v7429_v22 = vmul.f32 %v7393_v40, %v3807_v0  ;;  %v2480_v55 = vcombine.high %v2460_v21, %v2476_v5  ;;  %v7433_v37 = vmul.f32 %v7357_v62, %v7301_v61  ;;  %v7812_v21 = vld [vmem:[#allocation28_spill] sm:$0xff] }
 0x88c   : > { %5464 = vmatpush3.bf16.msra.mxu1 %v2482_v44  ;;  %5470 = vmatpush3.bf16.msra.mxu0 %v2484_v31  ;;  %v7436_v4 = vmul.f32 %v7378_v38, %v3808_v46  ;;  %v4121_v25 = vpack.c.bf16 %v7320_v54, %v7311_v26  ;;  %v4122_v53 = vpack.c.bf16 %v7374_v50, %v7341_v7  ;;  %v7817_v31 = vld [vmem:[#allocation32_spill] sm:$0xff] }
 0x88d   : > { %5475 = vmatprep.subr.bf16.mxu1 %v7811_v13  ;;  %5481 = vmatprep.subr.bf16.mxu0 %v7811_v13  ;;  %v2486_v0 = vpack.c.bf16 %v2479_v1, %v2411_v57  ;;  %v2488_v19 = vpack.c.bf16 %v2480_v55, %v2412_v49  ;;  %v4123_v61 = vpack.c.bf16 %v7363_v2, %v7351_v60  ;;  %v7818_v55 = vld [vmem:[#allocation26_spill] sm:$0xff] }
 0x88e   : > { %v4124_v26 = vpack.c.bf16 %v7386_v20, %v5775_v23 }
 0x88f   : > { %5466 = vmatmul.mubr.msk.bf16.vlgmr.msra.gmra.mrb[36].mxu1 %vm2697_vm4, %v4121_v25  ;;  %5472 = vmatmul.mubr.msk.bf16.vlgmr.msra.gmra.mrb[48].mxu0 %vm2697_vm4, %v4122_v53 }
 0x890   : > { %5476 = vmatpush3.bf16.msra.mxu1 %v2486_v0  ;;  %5482 = vmatpush3.bf16.msra.mxu0 %v2488_v19  ;;  %v7819_v0 = vld [vmem:[#allocation30_spill] sm:$0xff] }
 0x891   : > { %5477 = vmatprep.mubr.msk.bf16.mxu1 %vm6057_vm1, %v7811_v13  ;;  %5483 = vmatprep.mubr.msk.bf16.mxu0 %vm6057_vm1, %v7811_v13 }
 0x897   : > { %5478 = vmatmul.mubr.msk.bf16.vlgmr.msra.gmra.mrb[40].mxu1 %vm2697_vm4, %v4123_v61  ;;  %5484 = vmatmul.mubr.msk.bf16.vlgmr.msra.gmra.mrb[52].mxu0 %vm2697_vm4, %v4124_v26 }
 0x8a4   : > { %v3594_v54 = vpop.xlane.xlu1 %3593 }
 0x8a5   : > { %v3614_v7 = vadd.f32 %v3594_v54, %v7248_v6  ;;  %v7820_v54 = vld [vmem:[#allocation33_spill] sm:$0xff] }
 0x8a6   : > { %v3591_v50 = vpop.xlane.xlu0 %3590 }
 0x8a7   : > { %v3613_v28 = vadd.f32 %v3591_v50, %v7242_v36  ;;  %v7458_v18 = vmul.f32 %v7327_v10, %v3614_v7 }
 0x8a8   : > { %v3606_v34 = vpop.xlane.xlu1 %3605 }
 0x8a9   : > { %v3618_v13 = vadd.f32 %v3606_v34, %v7264_v24  ;;  %v7462_v60 = vmul.f32 %v7306_v58, %v3613_v28  ;;  %v7821_v34 = vld [vmem:[#allocation24_spill] sm:$0xff] }
 0x8aa   : > { %v3597_v2 = vpop.xlane.xlu0 %3596 }
 0x8ab   : > { %v3615_v20 = vadd.f32 %v3597_v2, %v7250_v43  ;;  %v7466_v23 = vmul.f32 %v7357_v62, %v3618_v13 }
 0x8ac   : > { %v3612_v27 = vpop.xlane.xlu1 %3611 }
 0x8ad   : > { %v3620_v6 = vadd.f32 %v3612_v27, %v7389_v59  ;;  %v7470_v36 = vmul.f32 %v7332_v35, %v3615_v20  ;;  %v7822_v20 = vld [vmem:[#allocation36_spill] sm:$0xff] }
 0x8ae   : > { %v3600_v10 = vpop.xlane.xlu0 %3599 }
 0x8af   : > { %v3616_v42 = vadd.f32 %v3600_v10, %v7271_v29  ;;  %v7474_v24 = vmul.f32 %v7378_v38, %v3620_v6 }
 0x8b0   : > { %v2791_v58 = vpop.xlane.xlu1 %2790 }
 0x8b1   : > { %v2811_v48 = vadd.f32 %v2791_v58, %v6916_v39  ;;  %v7478_v43 = vmul.f32 %v7370_v45, %v3616_v42  ;;  %v7823_v58 = vld [vmem:[#allocation31_spill] sm:$0xff] }
 0x8b2   : > { %v3603_v62 = vpop.xlane.xlu0 %3602 }
 0x8b3   : > { %5776 = vrcp.f32 %v2811_v48  ;;  %v3617_v12 = vadd.f32 %v3603_v62, %v7262_v33 }
 0x8b4   : > { %v2797_v59 = vpop.xlane.xlu1 %2796 }
 0x8b5   : > { %v2813_v35 = vadd.f32 %v2797_v59, %v6936_v16  ;;  %v7483_v46 = vmul.f32 %v7346_v15, %v3617_v12  ;;  %v7814_v16 = vld [vmem:[#allocation35_spill] sm:$0xff] }
 0x8b6   : > { %v3609_v29 = vpop.xlane.xlu0 %3608 }
 0x8b7   : > { %5778 = vrcp.f32 %v2813_v35  ;;  %v3619_v38 = vadd.f32 %v3609_v29, %v7277_v3  ;;  %v7816_v3 = vld [vmem:[#allocation29_spill] sm:$0xff] }
 0x8b8   : > { %v2803_v11 = vpop.xlane.xlu1 %2802 }
 0x8b9   : > { %v2815_v39 = vadd.f32 %v2803_v11, %v7812_v21  ;;  %v7488_v45 = vmul.f32 %v7393_v40, %v3619_v38 }
 0x8ba   : > { %v2788_v8 = vpop.xlane.xlu0 %2787 }
 0x8bb   : > { %5780 = vrcp.f32 %v2815_v39  ;;  %v2810_v33 = vadd.f32 %v2788_v8, %v7813_v52  ;;  %v7824_v8 = vld [vmem:[#allocation27_spill] sm:$0xff] }
 0x8bc   : > { %v2809_v41 = vpop.xlane.xlu1 %2808 }
 0x8bd   : > { %v5777_v14 = vpop.eup %5776  ;;  %5782 = vrcp.f32 %v2810_v33  ;;  %v2817_v15 = vadd.f32 %v2809_v41, %v7814_v16 }
 0x8be   : > { %v3015_v57 = vmul.f32 %v5777_v14, %v7815_v63  ;;  %v2794_v5 = vpop.xlane.xlu0 %2793 }
 0x8bf   : > { %5784 = vrcp.f32 %v2817_v15  ;;  %v2812_v49 = vadd.f32 %v2794_v5, %v7816_v3  ;;  %v7825_v5 = vld [vmem:[#allocation34_spill] sm:$0xff] }
 0x8c1   : > { %v5779_v44 = vpop.eup %5778  ;;  %5786 = vrcp.f32 %v2812_v49 }
 0x8c2   : > { %v3017_v40 = vmul.f32 %v5779_v44, %v7817_v31  ;;  %v2800_v1 = vpop.xlane.xlu0 %2799 }
 0x8c3   : > { %v2814_v25 = vadd.f32 %v2800_v1, %v7818_v55 }
 0x8c5   : > { %v5781_v53 = vpop.eup %5780  ;;  %5788 = vrcp.f32 %v2814_v25 }
 0x8c6   : > { %v3019_v19 = vmul.f32 %v5781_v53, %v7819_v0  ;;  %v2806_v61 = vpop.xlane.xlu0 %2805 }
 0x8c7   : > { %v5783_v26 = vpop.eup %5782  ;;  %v2816_v7 = vadd.f32 %v2806_v61, %v7820_v54 }
 0x8c8   : > { %v3090_v50 = vcombine.low %v3015_v57, %v3019_v19  ;;  %v3091_v28 = vcombine.high %v3015_v57, %v3019_v19  ;;  %v3014_v13 = vmul.f32 %v5783_v26, %v7821_v34 }
 0x8c9   : > { %v5785_v2 = vpop.eup %5784  ;;  %5790 = vrcp.f32 %v2816_v7 }
 0x8ca   : > { %v3021_v27 = vmul.f32 %v5785_v2, %v7822_v20  ;;  %v3098_v62 = vrot.slane %v3090_v50, %v6425_v32  ;;  %v3105_v12 = vrot.slane %v3091_v28, %v6425_v32 }
 0x8cb   : > { %v5787_v6 = vpop.eup %5786 }
 0x8cc   : > { %v3106_v10 = vcombine.low %v3017_v40, %v3021_v27  ;;  %v3107_v42 = vcombine.high %v3017_v40, %v3021_v27  ;;  %v3016_v48 = vmul.f32 %v5787_v6, %v7823_v58 }
 0x8ce   : > { %v3114_v59 = vrot.slane %v3106_v10, %v6425_v32  ;;  %v3121_v35 = vrot.slane %v3107_v42, %v6425_v32 }
 0x8cf   : > { %v5789_v29 = vpop.eup %5788 }
 0x8d0   : > { %v3122_v38 = vcombine.low %v3098_v62, %v3114_v59  ;;  %v3123_v11 = vcombine.high %v3098_v62, %v3114_v59  ;;  %v3138_v21 = vcombine.low %v3105_v12, %v3121_v35  ;;  %v3139_v39 = vcombine.high %v3105_v12, %v3121_v35 }
 0x8d1   : > { %v3018_v52 = vmul.f32 %v5789_v29, %v7824_v8 }
 0x8d2   : > { %v3130_v33 = vrot.slane %v3122_v38, %v6432_v47  ;;  %v3137_v41 = vrot.slane %v3123_v11, %v6432_v47  ;;  %v3146_v14 = vrot.slane %v3138_v21, %v6432_v47  ;;  %v3153_v16 = vrot.slane %v3139_v39, %v6432_v47 }
 0x8d3   : > { %v5791_v15 = vpop.eup %5790  ;;  %v3022_v63 = vcombine.low %v3014_v13, %v3018_v52  ;;  %v3023_v57 = vcombine.high %v3014_v13, %v3018_v52 }
 0x8d4   : > { %v3020_v3 = vmul.f32 %v5791_v15, %v7825_v5  ;;  %v3226_v49 = vcombine.low %v3130_v33, %v3137_v41  ;;  %v5215_v44 = vcombine.high %v3130_v33, %v3137_v41  ;;  %v3242_v31 = vcombine.low %v3146_v14, %v3153_v16 }
 0x8d5   : > { %v5216_v40 = vcombine.high %v3146_v14, %v3153_v16  ;;  %v3030_v0 = vrot.slane %v3022_v63, %v6425_v32  ;;  %v3037_v19 = vrot.slane %v3023_v57, %v6425_v32 }
 0x8d6   : > { %v3038_v1 = vcombine.low %v3016_v48, %v3020_v3  ;;  %v3039_v55 = vcombine.high %v3016_v48, %v3020_v3  ;;  %v3233_v25 = vrot.slane %v3226_v49, %v6425_v32  ;;  %v3241_v53 = vrot.slane %v5215_v44, %v6425_v32 }
 0x8d7   : > { %v3249_v61 = vrot.slane %v3242_v31, %v6425_v32  ;;  %v3257_v26 = vrot.slane %v5216_v40, %v6425_v32 }
 0x8d8   : > { %v3046_v54 = vrot.slane %v3038_v1, %v6425_v32  ;;  %v3053_v7 = vrot.slane %v3039_v55, %v6425_v32  ;;  %v3259_v50 = vcombine.high %v3233_v25, %v3241_v53  ;;  %v3258_v28 = vcombine.low %v3233_v25, %v3241_v53 }
 0x8d9   : > { %v3275_v34 = vcombine.high %v3249_v61, %v3257_v26  ;;  %v3274_v13 = vcombine.low %v3249_v61, %v3257_v26 }
 0x8da   : > { %v3054_v2 = vcombine.low %v3030_v0, %v3046_v54  ;;  %v3055_v20 = vcombine.high %v3030_v0, %v3046_v54  ;;  %v3070_v27 = vcombine.low %v3037_v19, %v3053_v7  ;;  %v3071_v6 = vcombine.high %v3037_v19, %v3053_v7 }
 0x8db   : > { %v3273_v10 = vrot.slane %v3259_v50, %v6432_v47  ;;  %v3289_v42 = vrot.slane %v3275_v34, %v6432_v47  ;;  %v7522_v58 = vrot.slane %v3258_v28, %v6432_v47  ;;  %v7525_v48 = vrot.slane %v3274_v13, %v6432_v47 }
 0x8dc   : > { %v3062_v62 = vrot.slane %v3054_v2, %v6432_v47  ;;  %v3069_v12 = vrot.slane %v3055_v20, %v6432_v47  ;;  %v3078_v59 = vrot.slane %v3070_v27, %v6432_v47  ;;  %v3085_v35 = vrot.slane %v3071_v6, %v6432_v47 }
 0x8dd   : > { %v3292_v29 = vcombine.low %v3273_v10, %v3289_v42  ;;  %v3291_v38 = vcombine.high %v7522_v58, %v7525_v48  ;;  %v3293_v11 = vcombine.high %v3273_v10, %v3289_v42  ;;  %v3290_v21 = vcombine.low %v7522_v58, %v7525_v48 }
 0x8de   : > { %v3158_v39 = vcombine.low %v3062_v62, %v3069_v12  ;;  %v5213_v8 = vcombine.high %v3062_v62, %v3069_v12  ;;  %v3174_v52 = vcombine.low %v3078_v59, %v3085_v35  ;;  %v5214_v33 = vcombine.high %v3078_v59, %v3085_v35 }
 0x8e0   : > { %v3165_v41 = vrot.slane %v3158_v39, %v6425_v32  ;;  %v3173_v14 = vrot.slane %v5213_v8, %v6425_v32  ;;  %v3181_v16 = vrot.slane %v3174_v52, %v6425_v32  ;;  %v3189_v15 = vrot.slane %v5214_v33, %v6425_v32 }
 0x8e2   : > { %v3191_v63 = vcombine.high %v3165_v41, %v3173_v14  ;;  %v3207_v57 = vcombine.high %v3181_v16, %v3189_v15  ;;  %v3190_v5 = vcombine.low %v3165_v41, %v3173_v14  ;;  %v3206_v3 = vcombine.low %v3181_v16, %v3189_v15 }
 0x8e4   : > { %v3205_v49 = vrot.slane %v3191_v63, %v6432_v47  ;;  %v3221_v44 = vrot.slane %v3207_v57, %v6432_v47  ;;  %v3198_v31 = vrot.slane %v3190_v5, %v6432_v47  ;;  %v3214_v40 = vrot.slane %v3206_v3, %v6432_v47 }
 0x8e6   : > { %v3224_v1 = vcombine.low %v3205_v49, %v3221_v44  ;;  %v3223_v55 = vcombine.high %v3198_v31, %v3214_v40  ;;  %v3225_v25 = vcombine.high %v3205_v49, %v3221_v44  ;;  %v3222_v53 = vcombine.low %v3198_v31, %v3214_v40 }
 0x8e8   : > { %v5633_v0 = vpack.i.bf16 %v3292_v29, %v3224_v1  ;;  %v5628_v19 = vpack.i.bf16 %v3291_v38, %v3223_v55  ;;  %v5638_v61 = vpack.i.bf16 %v3293_v11, %v3225_v25 }
 0x8ea   : > { %5634 = vrot.lane.b32.xlu1 %v5633_v0, %s6060_s20  ;;  %5629 = vrot.lane.b32.xlu0 %v5628_v19, %s6061_s23 }
 0x8ee   : > { %5639 = vrot.lane.b32.xlu1 %v5638_v61, %s6062_s14 }
 0x903   : > { %v4083_v26 = vpop.xlane.xlu0 %4082 }
 0x904   : > { %v4105_v13 = vadd.f32 %v4083_v26, %v7462_v60 }
 0x906   : > { %v4086_v54 = vpop.xlane.xlu1 %4085  ;;  %5792 = vrcp.f32 %v4105_v13 }
 0x907   : > { %v4106_v20 = vadd.f32 %v4086_v54, %v7458_v18 }
 0x90b   : > { %v4089_v50 = vpop.xlane.xlu0 %4088 }
 0x90c   : > { %v4107_v2 = vadd.f32 %v4089_v50, %v7470_v36 }
 0x90e   : > { %5794 = vrcp.f32 %v4107_v2 }
 0x90f   : > { %v4092_v7 = vpop.xlane.xlu1 %4091  ;;  %v4095_v34 = vpop.xlane.xlu0 %4094  ;;  %5796 = vrcp.f32 %v4106_v20 }
 0x910   : > { %v4108_v27 = vadd.f32 %v4092_v7, %v7478_v43  ;;  %v4109_v42 = vadd.f32 %v4095_v34, %v7483_v46  ;;  %v5793_v52 = vpop.eup %5792 }
 0x912   : > { %5798 = vrcp.f32 %v4108_v27 }
 0x913   : > { %v4098_v28 = vpop.xlane.xlu1 %4097  ;;  %v4101_v6 = vpop.xlane.xlu0 %4100  ;;  %5800 = vrcp.f32 %v4109_v42 }
 0x914   : > { %v4110_v62 = vadd.f32 %v4098_v28, %v7466_v23  ;;  %v4111_v36 = vadd.f32 %v4101_v6, %v7488_v45 }
 0x916   : > { %5802 = vrcp.f32 %v4110_v62 }
 0x917   : > { %v4104_v10 = vpop.xlane.xlu1 %4103  ;;  %5804 = vrcp.f32 %v4111_v36 }
 0x918   : > { %v4112_v29 = vadd.f32 %v4104_v10, %v7474_v24  ;;  %v5795_v15 = vpop.eup %5794 }
 0x919   : > { %v5797_v3 = vpop.eup %5796 }
 0x91a   : > { %5806 = vrcp.f32 %v4112_v29 }
 0x91c   : > { %v5799_v1 = vpop.eup %5798 }
 0x95c   : > { %v5635_v58 = vpop.permute.xlu1 %5634  ;;  %v5630_v48 = vpop.permute.xlu0 %5629 }
 0x95d   : > { %v5632_v12 = vunpack.i.h.bf16 %v5630_v48  ;;  %v5631_v60 = vunpack.i.l.bf16 %v5630_v48  ;;  %v5637_v59 = vunpack.i.h.bf16 %v5635_v58  ;;  %v5636_v18 = vunpack.i.l.bf16 %v5635_v58 }
 0x95f   : > { %v3319_v43 = vsel %vm2496_vm2, %v3290_v21, %v5632_v12  ;;  %v3318_v35 = vsel %vm2496_vm2, %v3222_v53, %v5631_v60  ;;  %v5801_v53 = vpop.eup %5800 }
 0x960   : > { %v5640_v46 = vpop.permute.xlu1 %5639  ;;  %v3320_v8 = vsel %vm2697_vm4, %v3318_v35, %v5636_v18  ;;  %v3321_v45 = vsel %vm2697_vm4, %v3319_v43, %v5637_v59  ;;  %v5803_v61 = vpop.eup %5802 }
 0x961   : > { %v5642_v38 = vunpack.i.h.bf16 %v5640_v46  ;;  %v5641_v11 = vunpack.i.l.bf16 %v5640_v46 }
 0x962   : > { %v4162_v23 = vpop.f32.mrb[36].mxu1  ;;  %v4206_v39 = vpop.f32.mrb[48].mxu0 }
 0x963   : > { %v4301_v21 = vadd.f32 %v4162_v23, %v7314_v56  ;;  %v4303_v33 = vadd.f32 %v4206_v39, %v7414_v30  ;;  %v3323_v41 = vsel %vm3322_vm6, %v3320_v8, %v5641_v11  ;;  %v3324_v24 = vsel %vm3322_vm6, %v3321_v45, %v5642_v38  ;;  %v5467_v14 = vpop.f32.mrb[37].mxu1  ;;  %v5473_v16 = vpop.f32.mrb[49].mxu0 }
 0x964   : > { %v4627_v63 = vpack.c.bf16 %v3324_v24, %v3323_v41  ;;  %v4165_v57 = vpop.f32.mrb[38].mxu1  ;;  %v4209_v5 = vpop.f32.mrb[50].mxu0 }
 0x965   : > { %v4317_v49 = vmul.f32 %v5793_v52, %v4301_v21  ;;  %v4319_v44 = vmul.f32 %v5795_v15, %v4303_v33  ;;  %v4302_v31 = vadd.f32 %v4165_v57, %v7418_v51  ;;  %v4304_v56 = vadd.f32 %v4209_v5, %v7422_v17  ;;  %v5468_v40 = vpop.f32.mrb[39].mxu1  ;;  %v5474_v30 = vpop.f32.mrb[51].mxu0 }
 0x966   : > { %5491 = vmatprep.mubr.msk.bf16.mxu1 %vm511_vm0, %v4627_v63  ;;  %v5805_v51 = vpop.eup %5804 }
 0x967   : > { %v4318_v55 = vmul.f32 %v5797_v3, %v4302_v31  ;;  %v4320_v25 = vmul.f32 %v5799_v1, %v4304_v56  ;;  %v5807_v10 = vpop.eup %5806 }
 0x96a   : > { %v4250_v0 = vpop.f32.mrb[40].mxu1  ;;  %v4294_v19 = vpop.f32.mrb[52].mxu0 }
 0x96b   : > { %v4305_v26 = vadd.f32 %v4250_v0, %v7426_v9  ;;  %v4307_v54 = vadd.f32 %v4294_v19, %v7429_v22  ;;  %v5479_v7 = vpop.f32.mrb[41].mxu1  ;;  %v5485_v50 = vpop.f32.mrb[53].mxu0 }
 0x96c   : > { %v4253_v28 = vpop.f32.mrb[42].mxu1  ;;  %v4297_v17 = vpop.f32.mrb[54].mxu0 }
 0x96d   : > { %v4321_v34 = vmul.f32 %v5801_v53, %v4305_v26  ;;  %v4323_v13 = vmul.f32 %v5805_v51, %v4307_v54  ;;  %v4306_v2 = vadd.f32 %v4253_v28, %v7433_v37  ;;  %v4308_v20 = vadd.f32 %v4297_v17, %v7436_v4  ;;  %v5480_v27 = vpop.f32.mrb[43].mxu1  ;;  %v5486_v6 = vpop.f32.mrb[55].mxu0  ;;  %v5660_v17 = vld [vmem:[#allocation5] sm:$0xff]  }
 0x96e   : > { %5487 = vmatprep.subr.bf16.mxu1 %v5660_v17 }
 0x96f   : > { %v4325_v42 = vcombine.low %v4317_v49, %v4321_v34  ;;  %v4326_v58 = vcombine.high %v4317_v49, %v4321_v34  ;;  %v4341_v48 = vcombine.low %v4319_v44, %v4323_v13  ;;  %v4342_v9 = vcombine.high %v4319_v44, %v4323_v13  ;;  %5488 = vmatpush3.bf16.msra.mxu1 %v5660_v17 }
 0x970   : > { %v4322_v62 = vmul.f32 %v5803_v61, %v4306_v2  ;;  %v4324_v22 = vmul.f32 %v5807_v10, %v4308_v20 }
 0x971   : > { %v4333_v12 = vrot.slane %v4325_v42, %v6425_v32  ;;  %v4340_v60 = vrot.slane %v4326_v58, %v6425_v32  ;;  %v4349_v36 = vrot.slane %v4341_v48, %v6425_v32  ;;  %v4356_v59 = vrot.slane %v4342_v9, %v6425_v32 }
 0x972   : > { %v4393_v37 = vcombine.low %v4318_v55, %v4322_v62  ;;  %v4394_v18 = vcombine.high %v4318_v55, %v4322_v62  ;;  %v4409_v4 = vcombine.low %v4320_v25, %v4324_v22  ;;  %v4410_v43 = vcombine.high %v4320_v25, %v4324_v22 }
 0x973   : > { %v4357_v35 = vcombine.low %v4333_v12, %v4349_v36  ;;  %v4358_v29 = vcombine.high %v4333_v12, %v4349_v36  ;;  %v4373_v46 = vcombine.low %v4340_v60, %v4356_v59  ;;  %v4374_v38 = vcombine.high %v4340_v60, %v4356_v59  ;;  %v5661_v36 = vld [vmem:[#allocation5 + $0x8] sm:$0xff]  }
 0x974   : > { %v4401_v11 = vrot.slane %v4393_v37, %v6425_v32  ;;  %v4408_v23 = vrot.slane %v4394_v18, %v6425_v32  ;;  %v4417_v39 = vrot.slane %v4409_v4, %v6425_v32  ;;  %v4424_v8 = vrot.slane %v4410_v43, %v6425_v32  ;;  %5489 = vmatprep.subr.bf16.mxu1 %v5661_v36 }
 0x975   : > { %v4365_v45 = vrot.slane %v4357_v35, %v6432_v47  ;;  %v4372_v52 = vrot.slane %v4358_v29, %v6432_v47  ;;  %v4381_v21 = vrot.slane %v4373_v46, %v6432_v47  ;;  %v4388_v33 = vrot.slane %v4374_v38, %v6432_v47  ;;  %5490 = vmatpush3.bf16.msra.mxu1 %v5661_v36 }
 0x976   : > { %v4425_v41 = vcombine.low %v4401_v11, %v4417_v39  ;;  %v4426_v24 = vcombine.high %v4401_v11, %v4417_v39  ;;  %v4441_v14 = vcombine.low %v4408_v23, %v4424_v8  ;;  %v4442_v16 = vcombine.high %v4408_v23, %v4424_v8 }
 0x977   : > { %v4461_v15 = vcombine.low %v4365_v45, %v4372_v52  ;;  %v5233_v63 = vcombine.high %v4365_v45, %v4372_v52  ;;  %v4477_v57 = vcombine.low %v4381_v21, %v4388_v33  ;;  %v5234_v5 = vcombine.high %v4381_v21, %v4388_v33 }
 0x978   : > { %v4433_v3 = vrot.slane %v4425_v41, %v6432_v47  ;;  %v4440_v49 = vrot.slane %v4426_v24, %v6432_v47  ;;  %v4449_v44 = vrot.slane %v4441_v14, %v6432_v47  ;;  %v4456_v31 = vrot.slane %v4442_v16, %v6432_v47 }
 0x979   : > { %v4468_v56 = vrot.slane %v4461_v15, %v6425_v32  ;;  %v4476_v40 = vrot.slane %v5233_v63, %v6425_v32  ;;  %v4484_v30 = vrot.slane %v4477_v57, %v6425_v32  ;;  %v4492_v1 = vrot.slane %v5234_v5, %v6425_v32  ;;  %v5237_v63 = vld [vmem:[#allocation7] ss:$0 sm:$0xff] }
 0x97a   : > { %v4529_v55 = vcombine.low %v4433_v3, %v4440_v49  ;;  %v5235_v25 = vcombine.high %v4433_v3, %v4440_v49  ;;  %v4545_v53 = vcombine.low %v4449_v44, %v4456_v31  ;;  %v5236_v0 = vcombine.high %v4449_v44, %v4456_v31 }
 0x97b   : > { %v4494_v19 = vcombine.high %v4468_v56, %v4476_v40  ;;  %v4510_v61 = vcombine.high %v4484_v30, %v4492_v1  ;;  %v4493_v26 = vcombine.low %v4468_v56, %v4476_v40  ;;  %v4509_v54 = vcombine.low %v4484_v30, %v4492_v1  ;;  %v5824_v56 = vld [vmem:[%s6329_s13] sm:$0xff]  ;;  %v5825_v1 = vld [vmem:[%s6329_s13 + $0x10] sm:$0xff] }
 0x97c   : > { %v4536_v7 = vrot.slane %v4529_v55, %v6425_v32  ;;  %v4544_v50 = vrot.slane %v5235_v25, %v6425_v32  ;;  %v4552_v51 = vrot.slane %v4545_v53, %v6425_v32  ;;  %v4560_v28 = vrot.slane %v5236_v0, %v6425_v32  ;;  %v5826_v53 = vld [vmem:[%s6329_s13 + $0x8] sm:$0xff] }
 0x97d   : > { %v4508_v34 = vrot.slane %v4494_v19, %v6432_v47  ;;  %v4524_v13 = vrot.slane %v4510_v61, %v6432_v47  ;;  %v4501_v2 = vrot.slane %v4493_v26, %v6432_v47  ;;  %v4517_v20 = vrot.slane %v4509_v54, %v6432_v47  ;;  %v5827_v26 = vld [vmem:[%s6329_s13 + $0x18] sm:$0xff] }
 0x97e   : > { %v4562_v27 = vcombine.high %v4536_v7, %v4544_v50  ;;  %v4578_v6 = vcombine.high %v4552_v51, %v4560_v28  ;;  %v4561_v10 = vcombine.low %v4536_v7, %v4544_v50  ;;  %v4577_v42 = vcombine.low %v4552_v51, %v4560_v28 }
 0x97f   : > { %v4527_v58 = vcombine.low %v4508_v34, %v4524_v13  ;;  %v4526_v48 = vcombine.high %v4501_v2, %v4517_v20  ;;  %v4528_v9 = vcombine.high %v4508_v34, %v4524_v13  ;;  %v4525_v62 = vcombine.low %v4501_v2, %v4517_v20 }
 0x980   : > { %v4576_v32 = vrot.slane %v4562_v27, %v6432_v47  ;;  %v4592_v22 = vrot.slane %v4578_v6, %v6432_v47  ;;  %v4569_v12 = vrot.slane %v4561_v10, %v6432_v47  ;;  %v4585_v60 = vrot.slane %v4577_v42, %v6432_v47 }
 0x982   : > { %v4595_v59 = vcombine.low %v4576_v32, %v4592_v22  ;;  %v4594_v37 = vcombine.high %v4569_v12, %v4585_v60  ;;  %v4596_v18 = vcombine.high %v4576_v32, %v4592_v22  ;;  %v4593_v4 = vcombine.low %v4569_v12, %v4585_v60 }
 0x984   : > { %v5648_v43 = vpack.i.bf16 %v4595_v59, %v4527_v58  ;;  %v5643_v35 = vpack.i.bf16 %v4594_v37, %v4526_v48  ;;  %v5653_v29 = vpack.i.bf16 %v4596_v18, %v4528_v9  ;;  %v5662_v59 = vld [vmem:[%s7745_s9] sm:$0xff]   ;;  %v5663_v37 = vld [vmem:[%s7745_s9 + $0x8] sm:$0xff]  }
 0x985   : > { %5495 = vmatprep.subr.bf16.mxu0 %v5662_v59 }
 0x986   : > { %5649 = vrot.lane.b32.xlu0 %v5648_v43, %s6060_s20  ;;  %5644 = vrot.lane.b32.xlu1 %v5643_v35, %s6061_s23  ;;  %s5264_s20 = sshll.u32 %s6156_s29, 9 }
 0x987   : > { %5496 = vmatpush3.bf16.msra.mxu0 %v5662_v59  ;;  %s7690_s29 = scalar_lea.hbm %s7828_s12, %s5264_s20 }
 0x988   : > { %5497 = vmatprep.subr.bf16.mxu0 %v5663_v37 }
 0x98a   : > { %5654 = vrot.lane.b32.xlu1 %v5653_v29, %s6062_s14 }
 0x98b   : > { %5498 = vmatpush3.bf16.msra.mxu0 %v5663_v37 }
 0x9f8   : > { %v5645_v46 = vpop.permute.xlu1 %5644  ;;  %v5650_v38 = vpop.permute.xlu0 %5649 }
 0x9f9   : > { %v5647_v11 = vunpack.i.h.bf16 %v5645_v46  ;;  %v5646_v47 = vunpack.i.l.bf16 %v5645_v46  ;;  %v5652_v23 = vunpack.i.h.bf16 %v5650_v38  ;;  %v5651_v39 = vunpack.i.l.bf16 %v5650_v38 }
 0x9fb   : > { %v4622_v8 = vsel %vm2496_vm2, %v4593_v4, %v5647_v11  ;;  %v4621_v45 = vsel %vm2496_vm2, %v4525_v62, %v5646_v47 }
 0x9fc   : > { %v5655_v52 = vpop.permute.xlu1 %5654  ;;  %v4624_v41 = vsel %vm2697_vm4, %v4622_v8, %v5652_v23  ;;  %v4623_v24 = vsel %vm2697_vm4, %v4621_v45, %v5651_v39 }
 0x9fd   : > { %v5657_v21 = vunpack.i.h.bf16 %v5655_v52  ;;  %v5656_v33 = vunpack.i.l.bf16 %v5655_v52  ;;  %v5242_v52 = vld [vmem:[#allocation8] ss:$0 sm:$0xff] }
 0x9ff   : > { %v4625_v14 = vsel %vm3322_vm6, %v4623_v24, %v5656_v33  ;;  %v4626_v16 = vsel %vm3322_vm6, %v4624_v41, %v5657_v21 }
 0xa00   : > { %v4628_v15 = vpack.c.bf16 %v4626_v16, %v4625_v14  ;;  %v5243_v16 = vld [vmem:[#allocation10] ss:$0 sm:$0xff] }
 0xa02   : > { %5492 = vmatmul.mubr.msk.bf16.vlgmr.msra.gmra.mrb[44].mxu1 %vm511_vm0, %v4628_v15 }
 0xad5   : > { %v5493_v57 = vpop.f32.mrb[44].mxu1 }
 0xad6   : > { %v4692_v5 = vpop.f32.mrb[45].mxu1  ;;  %v4701_v3 = vadd.f32 %v5493_v57, %v5237_v63 }
 0xad7   : > { %v4693_v49 = vadd.f32 %v5237_v63, %v4692_v5  ;;  %v5494_v44 = vpop.f32.mrb[46].mxu1 }
 0xad8   : > { %v4695_v31 = vpop.f32.mrb[47].mxu1  ;;  %v7615_v55 = vadd.f32 %v5825_v1, %v4701_v3  ;;  %v4704_v25 = vadd.f32 %v5494_v44, %v5237_v63 }
 0xad9   : > { %v7612_v40 = vadd.f32 %v5824_v56, %v4693_v49  ;;  %v4696_v30 = vadd.f32 %v5237_v63, %v4695_v31 }
 0xada   : > { %v7625_v54 = vadd.f32 %v5827_v26, %v4704_v25  ;;  %v4719_v7 = vsel %vm511_vm0, %v7615_v55, 0.0  ;;  %v5667_v26 = vld [vmem:[%s7747_s11 + $0x18] sm:$0xff]  }
 0xadb   : > { %v7618_v0 = vadd.f32 %v5826_v53, %v4696_v30  ;;  %v4713_v19 = vsel %vm511_vm0, %v7612_v40, 0.0  ;;  %v5664_v53 = vld [vmem:[%s7747_s11] sm:$0xff]  }
 0xadc   : > { %4714 = vadd.xlane.f32.xlu0 %v4713_v19  ;;  %v4722_v50 = vsel %vm511_vm0, %v7625_v54, 0.0  ;;  %v5665_v19 = vld [vmem:[%s7747_s11 + $0x8] sm:$0xff]   ;;  %5503 = vmatprep.subr.bf16.mxu1 %v5664_v53 }
 0xadd   : > { %v4716_v61 = vsel %vm511_vm0, %v7618_v0, 0.0  ;;  %5504 = vmatpush3.bf16.msra.mxu1 %v5664_v53 }
 0xade   : > { %4717 = vadd.xlane.f32.xlu1 %v4716_v61  ;;  %5505 = vmatprep.subr.bf16.mxu1 %v5665_v19  ;;  %v5666_v61 = vld [vmem:[%s7747_s11 + $0x10] sm:$0xff]  }
 0xae0   : > { %4720 = vadd.xlane.f32.xlu0 %v4719_v7  ;;  %v5668_v7 = vld [vmem:[%s7747_s11 + $0x20] sm:$0xff]  }
 0xae1   : > { %5506 = vmatpush3.bf16.msra.mxu1 %v5665_v19 }
 0xae2   : > { %5507 = vmatprep.subr.bf16.mxu1 %v5666_v61 }
 0xae4   : > { %4723 = vadd.xlane.f32.xlu0 %v4722_v50  ;;  %v5669_v50 = vld [vmem:[%s7747_s11 + $0x28] sm:$0xff]  }
 0xae5   : > { %5508 = vmatpush3.bf16.msra.mxu1 %v5666_v61 }
 0xae6   : > { %5509 = vmatprep.subr.bf16.mxu1 %v5667_v26 }
 0xae9   : > { %5510 = vmatpush3.bf16.msra.mxu1 %v5667_v26 }
 0xaea   : > { %5511 = vmatprep.subr.bf16.mxu1 %v5668_v7 }
 0xaed   : > { %5512 = vmatpush3.bf16.msra.mxu1 %v5668_v7 }
 0xaee   : > { %5513 = vmatprep.subr.bf16.mxu1 %v5669_v50 }
 0xaf1   : > { %5514 = vmatpush3.bf16.msra.mxu1 %v5669_v50 }
 0xb69   : > { %v4715_v51 = vpop.xlane.xlu0 %4714 }
 0xb6a   : > { %v4725_v28 = vmul.f32 0.03125, %v4715_v51  ;;  %v5670_v51 = vld [vmem:[%s7747_s11 + $0x30] sm:$0xff]  }
 0xb6b   : > { %v4718_v17 = vpop.xlane.xlu1 %4717  ;;  %5515 = vmatprep.subr.bf16.mxu1 %v5670_v51 }
 0xb6c   : > { %v4729_v34 = vsub.f32 %v7612_v40, %v4725_v28  ;;  %v4726_v13 = vmul.f32 0.03125, %v4718_v17  ;;  %v5671_v28 = vld [vmem:[%s7747_s11 + $0x38] sm:$0xff]   ;;  %5516 = vmatpush3.bf16.msra.mxu1 %v5670_v51  ;;  %v5244_v17 = vld [vmem:[%s7746_s10] ss:$0 sm:$0xff] }
 0xb6d   : > { %v4721_v2 = vpop.xlane.xlu0 %4720  ;;  %5517 = vmatprep.subr.bf16.mxu1 %v5671_v28 }
 0xb6e   : > { %v4730_v20 = vsub.f32 %v7618_v0, %v4726_v13  ;;  %v4727_v27 = vmul.f32 0.03125, %v4721_v2  ;;  %v4733_v6 = vmul.f32 %v4729_v34, %v4729_v34 }
 0xb70   : > { %v4731_v10 = vsub.f32 %v7615_v55, %v4727_v27  ;;  %v4737_v42 = vsel %vm511_vm0, %v4733_v6, 0.0  ;;  %v4734_v58 = vmul.f32 %v4730_v20, %v4730_v20  ;;  %5518 = vmatpush3.bf16.msra.mxu1 %v5671_v28 }
 0xb71   : > { %4738 = vadd.xlane.f32.xlu0 %v4737_v42  ;;  %v4724_v48 = vpop.xlane.xlu0 %4723 }
 0xb72   : > { %v4728_v9 = vmul.f32 0.03125, %v4724_v48  ;;  %v4740_v62 = vsel %vm511_vm0, %v4734_v58, 0.0  ;;  %v4735_v32 = vmul.f32 %v4731_v10, %v4731_v10 }
 0xb73   : > { %4741 = vadd.xlane.f32.xlu1 %v4740_v62 }
 0xb74   : > { %v4732_v22 = vsub.f32 %v7625_v54, %v4728_v9  ;;  %v4743_v12 = vsel %vm511_vm0, %v4735_v32, 0.0 }
 0xb75   : > { %4744 = vadd.xlane.f32.xlu0 %v4743_v12 }
 0xb76   : > { %v4736_v60 = vmul.f32 %v4732_v22, %v4732_v22 }
 0xb78   : > { %v4746_v36 = vsel %vm511_vm0, %v4736_v60, 0.0 }
 0xb79   : > { %4747 = vadd.xlane.f32.xlu1 %v4746_v36 }
 0xbfe   : > { %v4739_v18 = vpop.xlane.xlu0 %4738 }
 0xbff   : > { %v4749_v4 = vmul.f32 0.03125, %v4739_v18 }
 0xc00   : > { %v4742_v43 = vpop.xlane.xlu1 %4741 }
 0xc01   : > { %v4753_v35 = vadd.f32 1e-05, %v4749_v4  ;;  %v4750_v29 = vmul.f32 0.03125, %v4742_v43 }
 0xc02   : > { %v4745_v46 = vpop.xlane.xlu0 %4744 }
 0xc03   : > { %5808 = vrsqrt.f32 %v4753_v35  ;;  %v4754_v38 = vadd.f32 1e-05, %v4750_v29  ;;  %v4751_v11 = vmul.f32 0.03125, %v4745_v46 }
 0xc05   : > { %5810 = vrsqrt.f32 %v4754_v38  ;;  %v4755_v47 = vadd.f32 1e-05, %v4751_v11 }
 0xc06   : > { %v4748_v23 = vpop.xlane.xlu1 %4747 }
 0xc07   : > { %5812 = vrsqrt.f32 %v4755_v47  ;;  %v4752_v39 = vmul.f32 0.03125, %v4748_v23 }
 0xc09   : > { %v4756_v8 = vadd.f32 1e-05, %v4752_v39 }
 0xc0b   : > { %5814 = vrsqrt.f32 %v4756_v8 }
 0xc0d   : > { %v5809_v45 = vpop.eup %5808 }
 0xc0e   : > { %v4761_v21 = vmul.f32 %v5809_v45, %v4729_v34 }
 0xc0f   : > { %v5811_v33 = vpop.eup %5810 }
 0xc10   : > { %v4762_v41 = vmul.f32 %v5811_v33, %v4730_v20  ;;  %v4771_v24 = vmul.f32 %v5242_v52, %v4761_v21 }
 0xc11   : > { %v5813_v14 = vpop.eup %5812 }
 0xc12   : > { %v4763_v15 = vmul.f32 %v5813_v14, %v4731_v10  ;;  %v4772_v63 = vmul.f32 %v5242_v52, %v4762_v41  ;;  %v4781_v57 = vadd.f32 %v5243_v16, %v4771_v24 }
 0xc14   : > { %v4782_v5 = vadd.f32 %v5243_v16, %v4772_v63  ;;  %v4773_v49 = vmul.f32 %v5242_v52, %v4763_v15 }
 0xc15   : > { %v5815_v3 = vpop.eup %5814 }
 0xc16   : > { %v4764_v44 = vmul.f32 %v5815_v3, %v4732_v22  ;;  %v4785_v31 = vpack.c.bf16 %v4782_v5, %v4781_v57  ;;  %v4783_v30 = vadd.f32 %v5243_v16, %v4773_v49 }
 0xc18   : > { %v4774_v56 = vmul.f32 %v5242_v52, %v4764_v44  ;;  %5499 = vmatprep.mubr.msk.bf16.mxu0 %vm511_vm0, %v4785_v31  ;;  %v5249_v31 = vld [vmem:[%s7826_s28] ss:$0 sm:$0xff] }
 0xc1a   : > { %v4784_v1 = vadd.f32 %v5243_v16, %v4774_v56 }
 0xc1c   : > { %v4786_v25 = vpack.c.bf16 %v4784_v1, %v4783_v30 }
 0xc1e   : > { %5500 = vmatmul.mubr.msk.bf16.vlgmr.msra.gmra.mrb[56].mxu0 %vm511_vm0, %v4786_v25 }
 0xcf1   : > { %v5501_v34 = vpop.f32.mrb[56].mxu0 }
 0xcf2   : > { %v4859_v13 = vadd.f32 %v5501_v34, %v5244_v17  ;;  %v4850_v2 = vpop.f32.mrb[57].mxu0 }
 0xcf3   : > { %v4851_v20 = vadd.f32 %v5244_v17, %v4850_v2  ;;  %v5502_v27 = vpop.f32.mrb[58].mxu0 }
 0xcf4   : > { %v4871_v6 = vmul.f32 0.044715, %v4859_v13  ;;  %v4862_v10 = vadd.f32 %v5502_v27, %v5244_v17  ;;  %v4853_v42 = vpop.f32.mrb[59].mxu0  ;;  %v4867_v33 = vmul.f32 0.5, %v4859_v13 }
 0xcf5   : > { %v4869_v58 = vmul.f32 0.044715, %v4851_v20  ;;  %v4854_v48 = vadd.f32 %v5244_v17, %v4853_v42  ;;  %v4865_v14 = vmul.f32 0.5, %v4851_v20 }
 0xcf6   : > { %v4875_v9 = vmul.f32 %v4871_v6, %v4859_v13  ;;  %v4872_v62 = vmul.f32 0.044715, %v4862_v10  ;;  %v4868_v41 = vmul.f32 0.5, %v4862_v10 }
 0xcf7   : > { %v4873_v32 = vmul.f32 %v4869_v58, %v4851_v20  ;;  %v4870_v22 = vmul.f32 0.044715, %v4854_v48  ;;  %v4866_v16 = vmul.f32 0.5, %v4854_v48 }
 0xcf8   : > { %v4879_v12 = vmul.f32 %v4875_v9, %v4859_v13  ;;  %v4876_v60 = vmul.f32 %v4872_v62, %v4862_v10 }
 0xcf9   : > { %v4877_v36 = vmul.f32 %v4873_v32, %v4851_v20  ;;  %v4874_v59 = vmul.f32 %v4870_v22, %v4854_v48 }
 0xcfa   : > { %v4883_v37 = vadd.f32 %v4879_v12, %v4859_v13  ;;  %v4880_v18 = vmul.f32 %v4876_v60, %v4862_v10 }
 0xcfb   : > { %v4878_v4 = vmul.f32 %v4874_v59, %v4854_v48  ;;  %v4881_v43 = vadd.f32 %v4877_v36, %v4851_v20 }
 0xcfc   : > { %v4887_v35 = vmul.f32 0.7978846, %v4883_v37  ;;  %v4884_v29 = vadd.f32 %v4880_v18, %v4862_v10 }
 0xcfd   : > { %v4882_v46 = vadd.f32 %v4878_v4, %v4854_v48  ;;  %v4885_v38 = vmul.f32 0.7978846, %v4881_v43 }
 0xcfe   : > { %5816 = vtanh.f32 %v4887_v35  ;;  %v4888_v11 = vmul.f32 0.7978846, %v4884_v29 }
 0xcff   : > { %v4886_v47 = vmul.f32 0.7978846, %v4882_v46  ;;  %5818 = vtanh.f32 %v4885_v38 }
 0xd00   : > { %5820 = vtanh.f32 %v4888_v11 }
 0xd01   : > { %5822 = vtanh.f32 %v4886_v47 }
 0xd08   : > { %v5817_v23 = vpop.eup %5816 }
 0xd09   : > { %v5819_v39 = vpop.eup %5818  ;;  %v4895_v8 = vadd.f32 1.0, %v5817_v23 }
 0xd0a   : > { %v5821_v45 = vpop.eup %5820  ;;  %v4893_v52 = vadd.f32 1.0, %v5819_v39 }
 0xd0b   : > { %v5823_v21 = vpop.eup %5822  ;;  %v4896_v24 = vadd.f32 1.0, %v5821_v45  ;;  %v4899_v63 = vmul.f32 %v4895_v8, %v4867_v33 }
 0xd0c   : > { %v4894_v15 = vadd.f32 1.0, %v5823_v21  ;;  %v4897_v5 = vmul.f32 %v4893_v52, %v4865_v14 }
 0xd0d   : > { %v4900_v57 = vmul.f32 %v4896_v24, %v4868_v41 }
 0xd0e   : > { %v4898_v3 = vmul.f32 %v4894_v15, %v4866_v16 }
 0xd0f   : > { %v4902_v49 = vpack.c.bf16 %v4900_v57, %v4899_v63 }
 0xd10   : > { %v4901_v44 = vpack.c.bf16 %v4898_v3, %v4897_v5 }
 0xd12   : > { %5519 = vmatprep.mubr.bf16.mxu1 %v4901_v44 }
 0xd13   : > { %5520 = vmatmul.mubr.bf16.vlgmr.msra.gmra.mrb[48].mxu1 %v4902_v49 }
 0xde6   : > { %v5521_v56 = vpop.f32.mrb[48].mxu1 }
 0xde7   : > { %v5017_v30 = vadd.f32 %v5521_v56, %v5249_v31  ;;  %v5008_v1 = vpop.f32.mrb[49].mxu1 }
 0xde8   : > { %v5009_v25 = vadd.f32 %v5249_v31, %v5008_v1  ;;  %v5522_v53 = vpop.f32.mrb[50].mxu1 }
 0xde9   : > { %v5025_v19 = vadd.f32 %v5017_v30, %v7615_v55  ;;  %v5020_v61 = vadd.f32 %v5522_v53, %v5249_v31  ;;  %v5011_v26 = vpop.f32.mrb[51].mxu1 }
 0xdea   : > { %v5023_v7 = vadd.f32 %v5009_v25, %v7612_v40  ;;  %v5012_v50 = vadd.f32 %v5249_v31, %v5011_v26 }
 0xdeb   : > { %5029 = vst.msk [vmem:[%s498_s16 + $0x10] sm:$0xff] %vm511_vm0, %v5025_v19  ;;  %v5026_v51 = vadd.f32 %v5020_v61, %v7625_v54 }
 0xdec   : > { %5027 = vst.msk [vmem:[%s498_s16] sm:$0xff] %vm511_vm0, %v5023_v7  ;;  %v5024_v55 = vadd.f32 %v5012_v50, %v7618_v0 }
 0xded   : > { %5030 = vst.msk [vmem:[%s498_s16 + $0x18] sm:$0xff] %vm511_vm0, %v5026_v51 }
 0xdee   : > { %5028 = vst.msk [vmem:[%s498_s16 + $0x8] sm:$0xff] %vm511_vm0, %v5024_v55 }
 0xdef   : > { %5981 = shalt.err (!%p5978_p10)
}
 0xdf0   : > { %s5982_s24 = scalar_lea.hbm %s7690_s29, 512  ;;  %s5986_s28 = scalar_lea.hbm %s7828_s12, 1024 }
 0xdf1   : > { %p5983_p0 = scmp.ne.s32.totalorder %s7690_s29, %s5982_s24  ;;  %p5987_p4 = scmp.lt.u32.totalorder %s7690_s29, %s7828_s12 }
 0xdf2   : > { %p5988_p12 = scmp.lt.u32.totalorder %s5986_s28, %s5982_s24  ;;  %p5990_p8 = scmp.lt.u32.totalorder %s5982_s24, %s7690_s29 }
 0xdf3   : > { %p5984_p2 = pnand %p5983_p0, %p7829_p11 }
 0xdf4   : > { %p5989_p7 = por %p5988_p12, %p5987_p4 }
 0xdf5   : > { %p5985_p3 = pneg %p5984_p2 }
 0xdf6   : > { %p5991_p13 = por %p5990_p8, %p5989_p7 }
 0xdf8   : > { %p5992_p1 = pnand %p5991_p13, %p5985_p3 }
 0xdfa   : > { %5995 = shalt.err (!%p5992_p1)
}
 0xdfb   : > { %s6064_s14 = smov 128  }
 0xdfc   : > { %5543 = dma.vmem_to_hbm [thread:$0]  (%p7829_p11), %s7682_s22, 512, %s7690_s29, %s7694_s18, %s6064_s14, %s6064_s14, %s6061_s23  }
 0xdfd PF: > { %s7830_s13 = sld [smem:[#allocation18_spill]]  ;;  %s7831_s17 = sld [smem:[#allocation16_spill]] }
 0xdfe   : > { %s7832_s19 = sld [smem:[#allocation22_spill]] }
 0xe03   : > { %p5575_p6 = scmp.ge.s32.totalorder %s7830_s13, 2  ;;  %s5060_s21 = sand.u32 1, %s7831_s17  }
 0xe04   : > { %p7833_p9 = scmp.ne.s32.totalorder %s7832_s19, 0  ;;  %s5061_s15 = scalar_lea.sflag [#allocation4], %s5060_s21 }
 0xe06   : > { %p5562_p5 = pnand %p5575_p6, %p7833_p9 }
 0xe08   : > { %6025 = dma.done.wait (!%p5562_p5), %s5061_s15, 512  }
 0xe09   : > { %6027 = vsyncadd (!%p5562_p5), %s5061_s15, 4294966784  ;;  %s7834_s28 = sld [smem:[#allocation19_spill]]  ;;  %s7835_s24 = sld [smem:[#allocation17_spill]] }
 0xe0a   : > { %s7836_s27 = sld [smem:[#allocation20_spill]]  ;;  %s7837_s25 = smov %s6034_s26 }
 0xe0f   : > { %p26_p10 = scmp.ge.s32.totalorder %s7834_s28, 4   ;;  %s7838_s26 = smov %s7835_s24 }
 0xe11   :  { %28 = sbr.rel (!%p26_p10) target bundleno = 9 (0x9), region = 128 }
 0xe18   :  { %5066 = vsyncpa [#allocation3], 1 }
 0xe19   :  { %5068 = vsyncpa [#allocation3 + $0x1], 1 }
 0xe1a   :  { %5069 = vsyncpa [#allocation6], 1 }
 0xe1b   :  { %5070 = vsyncpa [#allocation9], 1 }
 0xe1c   :  { %5071 = vsyncpa [#allocation4], 1 }
 0xe1d   :  { %5073 = vsyncpa [#allocation4 + $0x1], 1 }

</bundles_post_ra>
